<compile_context>
chip_gen: v7x
topology: tpu7x:2x2x1
jax: 0.10.0
libtpu: 0.0.40
codegen_flags: <defaults>
</compile_context>

<pallas_src>
import functools

import jax
import jax.numpy as jnp
import numpy as np
from jax.experimental import pallas as pl
from jax.experimental.pallas import tpu as pltpu

F_G = 256
F_X = 256
HW_LIN = 64 * 512 // F_G    # = 128  (must equal spatial width W)
B = 2
H = 4
W = HW_LIN
C = F_X                     # == F_G


def scc_kernel(x_ref, g_ref, wxT_ref, bx_ref, wgT_ref, bg_ref, vb_ref, wl1_ref,
               out_ref, *, rows, width, inv_c):
    x_blk = x_ref[...]                                   # (C, rows*width) f32
    g_blk = g_ref[...]                                   # (C, rows*width) f32
    cblk = x_blk.shape[0]

    # torch.mean(., dim=1) on the MXU: (1/C) * ones(1,C) @ blk, all f32.
    ones = jnp.full((1, cblk), inv_c, dtype=jnp.float32)
    sx_cols = jnp.dot(ones, x_blk, preferred_element_type=jnp.float32)   # (1, cols)
    sg_cols = jnp.dot(ones, g_blk, preferred_element_type=jnp.float32)   # (1, cols)

    # (1, rows*width) -> (rows, width): one spatial row h per sublane row.
    def split_rows(v):
        return jnp.concatenate(
            [v[:, r * width:(r + 1) * width] for r in range(rows)], axis=0)

    s_x = split_rows(sx_cols)                            # (rows, width) f32
    s_g = split_rows(sg_cols)

    # mlpx / mlpgx (nn.Linear over the last axis) + ReLU, batched over rows, f32.
    a_x = jnp.dot(s_x, wxT_ref[...], preferred_element_type=jnp.float32) + bx_ref[...]
    a_x = jnp.maximum(a_x, 0.0)
    a_g = jnp.dot(s_g, wgT_ref[...], preferred_element_type=jnp.float32) + bg_ref[...]
    a_g = jnp.maximum(a_g, 0.0)

    # (sp_att_x + sp_att_g)/2 -> sigmoid   (the .unsqueeze(1) in the PyTorch
    # code is a no-op: its result is discarded)
    gate = jax.nn.sigmoid((a_x + a_g) * 0.5)             # (rows, width) f32
    gate_cols = jnp.concatenate(
        [gate[r:r + 1, :] for r in range(rows)], axis=1)  # (1, rows*width)

    vb = vb_ref[...]                                     # (F_g, 2) f32
    v1 = vb[:, 0:1]                                      # wl2 @ retconv weight
    bias = vb[:, 1:2]                                    # wl2 @ retconv bias + last bias

    # lastconv2d + ReLU:  wl1 @ x  +  v1 * gate  +  fused bias
    x_bf = x_blk.astype(jnp.bfloat16)                    # in-kernel cast (VALU slack)
    acc = jnp.dot(wl1_ref[...], x_bf, preferred_element_type=jnp.float32)
    acc = acc + v1 * gate_cols + bias
    out_ref[...] = jnp.maximum(acc, 0.0).astype(out_ref.dtype)


@jax.jit
def scc_forward(g, x, params):
    Bs, Cx, Hs, Ws = x.shape
    Bg, Cg, Hg, Wg = g.shape
    assert (Bs, Hs, Ws) == (Bg, Hg, Wg), "g and x spatial/batch dims must match"
    # The module only typechecks if W == hw and F_x == F_g; fail loudly otherwise.
    assert Ws == HW_LIN and Cx == F_X and Cg == F_G and F_X == F_G, (Cx, Cg, Ws, HW_LIN)
    HWs = Hs * Ws

    # Free row-major reshapes: NCHW -> (B, C, H*W).  No transpose, no copy.
    x3 = x.reshape(Bs, Cx, HWs)
    g3 = g.reshape(Bg, Cg, HWs)

    wxT = params["mlpx_w"].T                             # (hw, hw) f32: y = s @ W^T + b
    bx = params["mlpx_b"].reshape(1, Ws)
    wgT = params["mlpgx_w"].T
    bg = params["mlpgx_b"].reshape(1, Ws)

    wl = params["last_w"].reshape(F_G, 2 * F_G)          # lastconv2d (F_g, 2F_g, 1, 1)
    wl1 = wl[:, :Cx].astype(jnp.bfloat16)                # part applied to x
    wl2 = wl[:, Cx:]                                     # part applied to sp_att_sum2
    wret = params["ret_w"].reshape(F_G)                  # retconv2d weight (F_g,1,1,1)
    bret = params["ret_b"]
    v1 = wl2 @ wret                                      # (F_g,)  folds wl2 @ retconv w
    bias_fused = wl2 @ bret + params["last_b"]           # (F_g,)  folds both biases
    vb = jnp.stack([v1, bias_fused], axis=1).astype(jnp.float32)   # (F_g, 2)

    full = lambda b: (0, 0)
    perb = lambda b: (b, 0, 0)

    kernel = functools.partial(scc_kernel, rows=Hs, width=Ws, inv_c=1.0 / Cx)

    flops = (2 * F_G * Cx * Bs * HWs          # lastconv matmul
             + 2 * 2 * Cx * Bs * HWs          # two channel means
             + 2 * 2 * Ws * Ws * Bs * Hs)     # two small Linears
    bytes_accessed = (x3.size * 4 + g3.size * 4 + Bs * F_G * HWs * 4
                      + wxT.size * 4 + wgT.size * 4 + wl1.size * 2
                      + vb.size * 4 + bx.size * 4 + bg.size * 4)

    out3 = pl.pallas_call(
        kernel,
        out_shape=jax.ShapeDtypeStruct((Bs, F_G, HWs), jnp.float32),
        grid_spec=pltpu.PrefetchScalarGridSpec(
            num_scalar_prefetch=0,
            grid=(Bs,),
            in_specs=[
                pl.BlockSpec((None, Cx, HWs), perb),   # x slab (leading dim squeezed)
                pl.BlockSpec((None, Cg, HWs), perb),   # g slab
                pl.BlockSpec((Ws, Ws), full),          # mlpx  W^T (f32)
                pl.BlockSpec((1, Ws), full),           # mlpx  b
                pl.BlockSpec((Ws, Ws), full),          # mlpgx W^T (f32)
                pl.BlockSpec((1, Ws), full),           # mlpgx b
                pl.BlockSpec((F_G, 2), full),          # [wl2@wret, wl2@bret + b_last]
                pl.BlockSpec((F_G, Cx), full),         # lastconv weight, x part (bf16)
            ],
            out_specs=pl.BlockSpec((None, F_G, HWs), perb),
        ),
        compiler_params=pltpu.CompilerParams(
            dimension_semantics=("parallel",)),
        cost_estimate=pl.CostEstimate(
            flops=flops,
            transcendentals=Bs * Hs * Ws,
            bytes_accessed=bytes_accessed),
    )(x3, g3, wxT, bx, wgT, bg, vb, wl1)

    # (B, F_g, H*W) -> NCHW is a free reshape.
    return out3.reshape(Bs, F_G, Hs, Ws)


def scc_reference(g, x, p):
    """Pure-JAX f32 mirror of the PyTorch forward (NCHW)."""
    spx = jnp.mean(x, axis=1, keepdims=True)                        # (B,1,H,W)
    sp_att_x = jnp.einsum("bchw,ow->bcho", spx, p["mlpx_w"]) + p["mlpx_b"]
    sp_att_x = jnp.maximum(sp_att_x, 0.0)
    spg = jnp.mean(g, axis=1, keepdims=True)
    sp_att_g = jnp.einsum("bchw,ow->bcho", spg, p["mlpgx_w"]) + p["mlpgx_b"]
    sp_att_g = jnp.maximum(sp_att_g, 0.0)
    s = jax.nn.sigmoid((sp_att_x + sp_att_g) / 2.0)                 # (B,1,H,W)
    sp2 = s * p["ret_w"].reshape(1, F_G, 1, 1) + p["ret_b"].reshape(1, F_G, 1, 1)
    cat = jnp.concatenate([x, sp2], axis=1)                         # (B,2F_g,H,W)
    out = jnp.einsum("bkhw,ck->bchw", cat, p["last_w"].reshape(F_G, 2 * F_G))
    out = out + p["last_b"].reshape(1, F_G, 1, 1)
    return jnp.maximum(out, 0.0)


def init_params(key):
    ks = jax.random.split(key, 8)
    u = lambda k, shape, scale: jax.random.uniform(k, shape, jnp.float32, -scale, scale)
    return {
        "mlpx_w": u(ks[0], (HW_LIN, HW_LIN), 0.05),
        "mlpx_b": u(ks[1], (HW_LIN,), 0.05),
        "mlpgx_w": u(ks[2], (HW_LIN, HW_LIN), 0.05),
        "mlpgx_b": u(ks[3], (HW_LIN,), 0.05),
        "ret_w": u(ks[4], (F_G, 1, 1, 1), 0.5),
        "ret_b": u(ks[5], (F_G,), 0.5),
        "last_w": u(ks[6], (F_G, 2 * F_G, 1, 1), 0.04),
        "last_b": u(ks[7], (F_G,), 0.04),
    }
    # NOTE: conv2dx / conv2dg from __init__ are never used in forward(), so
    # they are omitted.


if __name__ == "__main__":
    key = jax.random.PRNGKey(0)
    kg, kx, kp = jax.random.split(key, 3)
    g = jax.random.normal(kg, (B, F_G, H, W), jnp.float32)
    x = jax.random.normal(kx, (B, F_X, H, W), jnp.float32)
    params = init_params(kp)

    out = jax.block_until_ready(scc_forward(g, x, params))
    ref = jax.block_until_ready(scc_reference(g, x, params))
    assert out.shape == (B, F_G, H, W), out.shape
    err = float(np.max(np.abs(np.asarray(out) - np.asarray(ref))))
    # Only the wl1 matmul streams bf16 (f32 accumulation); everything else f32.
    assert np.allclose(np.asarray(out), np.asarray(ref), rtol=2e-2, atol=2e-2), err
    print("KERNEL_OK")
</pallas_src>

<mosaic_0001>
module attributes {stable_mosaic.version = 11 : i64} {
  func.func @scc_kernel(%arg0: i32, %arg1: memref<1x256x512xf32, #tpu.memory_space<vmem>>, %arg2: memref<1x256x512xf32, #tpu.memory_space<vmem>>, %arg3: memref<128x128xf32, #tpu.memory_space<vmem>>, %arg4: memref<1x128xf32, #tpu.memory_space<vmem>>, %arg5: memref<128x128xf32, #tpu.memory_space<vmem>>, %arg6: memref<1x128xf32, #tpu.memory_space<vmem>>, %arg7: memref<256x2xf32, #tpu.memory_space<vmem>>, %arg8: memref<256x256xbf16, #tpu.memory_space<vmem>>, %arg9: memref<1x256x512xf32, #tpu.memory_space<vmem>>) attributes {dimension_semantics = [#tpu.dimension_semantics<parallel>], iteration_bounds = array<i64: 2>, scalar_prefetch = 0 : i64, scratch_operands = 0 : i64, tpu.core_type = #tpu.core_type<tc>, window_params = [{transform_indices = @transform_0, window_bounds = array<i64: 1, 256, 512>}, {transform_indices = @transform_1, window_bounds = array<i64: 1, 256, 512>}, {pipeline_mode = #tpu.pipeline_mode<synchronous>, transform_indices = @transform_2, window_bounds = array<i64: 128, 128>}, {pipeline_mode = #tpu.pipeline_mode<synchronous>, transform_indices = @transform_3, window_bounds = array<i64: 1, 128>}, {pipeline_mode = #tpu.pipeline_mode<synchronous>, transform_indices = @transform_4, window_bounds = array<i64: 128, 128>}, {pipeline_mode = #tpu.pipeline_mode<synchronous>, transform_indices = @transform_5, window_bounds = array<i64: 1, 128>}, {pipeline_mode = #tpu.pipeline_mode<synchronous>, transform_indices = @transform_6, window_bounds = array<i64: 256, 2>}, {pipeline_mode = #tpu.pipeline_mode<synchronous>, transform_indices = @transform_7, window_bounds = array<i64: 256, 256>}, {transform_indices = @transform_8, window_bounds = array<i64: 1, 256, 512>}]} {
    %c0 = arith.constant 0 : index
    %c0_0 = arith.constant 0 : index
    %c0_1 = arith.constant 0 : index
    %0 = vector.load %arg1[%c0, %c0_0, %c0_1] : memref<1x256x512xf32, #tpu.memory_space<vmem>>, vector<1x256x512xf32>
    %1 = vector.shape_cast %0 : vector<1x256x512xf32> to vector<256x512xf32>
    %c0_2 = arith.constant 0 : index
    %c0_3 = arith.constant 0 : index
    %c0_4 = arith.constant 0 : index
    %2 = vector.load %arg2[%c0_2, %c0_3, %c0_4] : memref<1x256x512xf32, #tpu.memory_space<vmem>>, vector<1x256x512xf32>
    %3 = vector.shape_cast %2 : vector<1x256x512xf32> to vector<256x512xf32>
    %cst = arith.constant 3.906250e-03 : f32
    %4 = vector.broadcast %cst : f32 to vector<1x256xf32>
    %cst_5 = arith.constant dense<0.000000e+00> : vector<1x512xf32>
    %5 = tpu.matmul %4, %1, %cst_5 {dimension_numbers = #tpu.dot_dimension_numbers<[1], [0], [0], [1], [0, 0, 1, 1], [], []>} : vector<1x256xf32>, vector<256x512xf32>, vector<1x512xf32> -> vector<1x512xf32>
    %cst_6 = arith.constant dense<0.000000e+00> : vector<1x512xf32>
    %6 = tpu.matmul %4, %3, %cst_6 {dimension_numbers = #tpu.dot_dimension_numbers<[1], [0], [0], [1], [0, 0, 1, 1], [], []>} : vector<1x256xf32>, vector<256x512xf32>, vector<1x512xf32> -> vector<1x512xf32>
    %7 = vector.extract_strided_slice %5 {offsets = [0, 0], sizes = [1, 128], strides = [1, 1]} : vector<1x512xf32> to vector<1x128xf32>
    %8 = vector.extract_strided_slice %5 {offsets = [0, 128], sizes = [1, 128], strides = [1, 1]} : vector<1x512xf32> to vector<1x128xf32>
    %9 = vector.extract_strided_slice %5 {offsets = [0, 256], sizes = [1, 128], strides = [1, 1]} : vector<1x512xf32> to vector<1x128xf32>
    %10 = vector.extract_strided_slice %5 {offsets = [0, 384], sizes = [1, 128], strides = [1, 1]} : vector<1x512xf32> to vector<1x128xf32>
    %11 = tpu.concatenate %7, %8, %9, %10 in 0 : vector<1x128xf32>, vector<1x128xf32>, vector<1x128xf32>, vector<1x128xf32> -> vector<4x128xf32>
    %12 = vector.extract_strided_slice %6 {offsets = [0, 0], sizes = [1, 128], strides = [1, 1]} : vector<1x512xf32> to vector<1x128xf32>
    %13 = vector.extract_strided_slice %6 {offsets = [0, 128], sizes = [1, 128], strides = [1, 1]} : vector<1x512xf32> to vector<1x128xf32>
    %14 = vector.extract_strided_slice %6 {offsets = [0, 256], sizes = [1, 128], strides = [1, 1]} : vector<1x512xf32> to vector<1x128xf32>
    %15 = vector.extract_strided_slice %6 {offsets = [0, 384], sizes = [1, 128], strides = [1, 1]} : vector<1x512xf32> to vector<1x128xf32>
    %16 = tpu.concatenate %12, %13, %14, %15 in 0 : vector<1x128xf32>, vector<1x128xf32>, vector<1x128xf32>, vector<1x128xf32> -> vector<4x128xf32>
    %c0_7 = arith.constant 0 : index
    %c0_8 = arith.constant 0 : index
    %17 = vector.load %arg3[%c0_7, %c0_8] : memref<128x128xf32, #tpu.memory_space<vmem>>, vector<128x128xf32>
    %cst_9 = arith.constant dense<0.000000e+00> : vector<4x128xf32>
    %18 = tpu.matmul %11, %17, %cst_9 {dimension_numbers = #tpu.dot_dimension_numbers<[1], [0], [0], [1], [0, 0, 1, 1], [], []>} : vector<4x128xf32>, vector<128x128xf32>, vector<4x128xf32> -> vector<4x128xf32>
    %c0_10 = arith.constant 0 : index
    %c0_11 = arith.constant 0 : index
    %19 = vector.load %arg4[%c0_10, %c0_11] : memref<1x128xf32, #tpu.memory_space<vmem>>, vector<1x128xf32>
    %20 = vector.broadcast %19 : vector<1x128xf32> to vector<4x128xf32>
    %21 = arith.addf %18, %20 : vector<4x128xf32>
    %cst_12 = arith.constant 0.000000e+00 : f32
    %22 = vector.broadcast %cst_12 : f32 to vector<4x128xf32>
    %23 = arith.maximumf %21, %22 : vector<4x128xf32>
    %c0_13 = arith.constant 0 : index
    %c0_14 = arith.constant 0 : index
    %24 = vector.load %arg5[%c0_13, %c0_14] : memref<128x128xf32, #tpu.memory_space<vmem>>, vector<128x128xf32>
    %cst_15 = arith.constant dense<0.000000e+00> : vector<4x128xf32>
    %25 = tpu.matmul %16, %24, %cst_15 {dimension_numbers = #tpu.dot_dimension_numbers<[1], [0], [0], [1], [0, 0, 1, 1], [], []>} : vector<4x128xf32>, vector<128x128xf32>, vector<4x128xf32> -> vector<4x128xf32>
    %c0_16 = arith.constant 0 : index
    %c0_17 = arith.constant 0 : index
    %26 = vector.load %arg6[%c0_16, %c0_17] : memref<1x128xf32, #tpu.memory_space<vmem>>, vector<1x128xf32>
    %27 = vector.broadcast %26 : vector<1x128xf32> to vector<4x128xf32>
    %28 = arith.addf %25, %27 : vector<4x128xf32>
    %cst_18 = arith.constant 0.000000e+00 : f32
    %29 = vector.broadcast %cst_18 : f32 to vector<4x128xf32>
    %30 = arith.maximumf %28, %29 : vector<4x128xf32>
    %31 = arith.addf %23, %30 : vector<4x128xf32>
    %cst_19 = arith.constant 5.000000e-01 : f32
    %32 = vector.broadcast %cst_19 : f32 to vector<4x128xf32>
    %33 = arith.mulf %31, %32 : vector<4x128xf32>
    %34 = arith.negf %33 : vector<4x128xf32>
    %35 = math.exp %34 : vector<4x128xf32>
    %cst_20 = arith.constant 1.000000e+00 : f32
    %36 = vector.broadcast %cst_20 : f32 to vector<4x128xf32>
    %37 = arith.addf %36, %35 : vector<4x128xf32>
    %38 = arith.divf %36, %37 : vector<4x128xf32>
    %39 = vector.extract_strided_slice %38 {offsets = [0, 0], sizes = [1, 128], strides = [1, 1]} : vector<4x128xf32> to vector<1x128xf32>
    %40 = vector.extract_strided_slice %38 {offsets = [1, 0], sizes = [1, 128], strides = [1, 1]} : vector<4x128xf32> to vector<1x128xf32>
    %41 = vector.extract_strided_slice %38 {offsets = [2, 0], sizes = [1, 128], strides = [1, 1]} : vector<4x128xf32> to vector<1x128xf32>
    %42 = vector.extract_strided_slice %38 {offsets = [3, 0], sizes = [1, 128], strides = [1, 1]} : vector<4x128xf32> to vector<1x128xf32>
    %43 = tpu.concatenate %39, %40, %41, %42 in 1 : vector<1x128xf32>, vector<1x128xf32>, vector<1x128xf32>, vector<1x128xf32> -> vector<1x512xf32>
    %c0_21 = arith.constant 0 : index
    %c0_22 = arith.constant 0 : index
    %44 = vector.load %arg7[%c0_21, %c0_22] : memref<256x2xf32, #tpu.memory_space<vmem>>, vector<256x2xf32>
    %45 = vector.extract_strided_slice %44 {offsets = [0, 0], sizes = [256, 1], strides = [1, 1]} : vector<256x2xf32> to vector<256x1xf32>
    %46 = vector.extract_strided_slice %44 {offsets = [0, 1], sizes = [256, 1], strides = [1, 1]} : vector<256x2xf32> to vector<256x1xf32>
    %47 = arith.truncf %1 : vector<256x512xf32> to vector<256x512xbf16>
    %c0_23 = arith.constant 0 : index
    %c0_24 = arith.constant 0 : index
    %48 = vector.load %arg8[%c0_23, %c0_24] : memref<256x256xbf16, #tpu.memory_space<vmem>>, vector<256x256xbf16>
    %cst_25 = arith.constant dense<0.000000e+00> : vector<256x512xf32>
    %49 = tpu.matmul %48, %47, %cst_25 {dimension_numbers = #tpu.dot_dimension_numbers<[1], [0], [0], [1], [0, 0, 1, 1], [], []>} : vector<256x256xbf16>, vector<256x512xbf16>, vector<256x512xf32> -> vector<256x512xf32>
    %50 = vector.broadcast %45 : vector<256x1xf32> to vector<256x512xf32>
    %51 = vector.broadcast %43 : vector<1x512xf32> to vector<256x512xf32>
    %52 = arith.mulf %50, %51 : vector<256x512xf32>
    %53 = arith.addf %49, %52 : vector<256x512xf32>
    %54 = vector.broadcast %46 : vector<256x1xf32> to vector<256x512xf32>
    %55 = arith.addf %53, %54 : vector<256x512xf32>
    %cst_26 = arith.constant 0.000000e+00 : f32
    %56 = vector.broadcast %cst_26 : f32 to vector<256x512xf32>
    %57 = arith.maximumf %55, %56 : vector<256x512xf32>
    %c0_27 = arith.constant 0 : index
    %c0_28 = arith.constant 0 : index
    %c0_29 = arith.constant 0 : index
    %58 = vector.load %arg9[%c0_27, %c0_28, %c0_29] : memref<1x256x512xf32, #tpu.memory_space<vmem>>, vector<1x256x512xf32>
    %59 = vector.shape_cast %58 : vector<1x256x512xf32> to vector<256x512xf32>
    %60 = vector.shape_cast %57 : vector<256x512xf32> to vector<1x256x512xf32>
    tpu.vector_store %arg9[%c0_27, %c0_28, %c0_29], %60 {strides = array<i32>} : memref<1x256x512xf32, #tpu.memory_space<vmem>>, vector<1x256x512xf32>,
    return
  }
  func.func @transform_0(%arg0: i32) -> (i32, i32, i32) {
    %c0_i32 = arith.constant 0 : i32
    %c0_i32_0 = arith.constant 0 : i32
    %c0_i32_1 = arith.constant 0 : i32
    return %arg0, %c0_i32, %c0_i32_0 : i32, i32, i32
  }
  func.func @transform_1(%arg0: i32) -> (i32, i32, i32) {
    %c0_i32 = arith.constant 0 : i32
    %c0_i32_0 = arith.constant 0 : i32
    %c0_i32_1 = arith.constant 0 : i32
    return %arg0, %c0_i32, %c0_i32_0 : i32, i32, i32
  }
  func.func @transform_2(%arg0: i32) -> (i32, i32) {
    %c0_i32 = arith.constant 0 : i32
    %c0_i32_0 = arith.constant 0 : i32
    %c0_i32_1 = arith.constant 0 : i32
    return %c0_i32, %c0_i32_0 : i32, i32
  }
  func.func @transform_3(%arg0: i32) -> (i32, i32) {
    %c0_i32 = arith.constant 0 : i32
    %c0_i32_0 = arith.constant 0 : i32
    %c0_i32_1 = arith.constant 0 : i32
    return %c0_i32, %c0_i32_0 : i32, i32
  }
  func.func @transform_4(%arg0: i32) -> (i32, i32) {
    %c0_i32 = arith.constant 0 : i32
    %c0_i32_0 = arith.constant 0 : i32
    %c0_i32_1 = arith.constant 0 : i32
    return %c0_i32, %c0_i32_0 : i32, i32
  }
  func.func @transform_5(%arg0: i32) -> (i32, i32) {
    %c0_i32 = arith.constant 0 : i32
    %c0_i32_0 = arith.constant 0 : i32
    %c0_i32_1 = arith.constant 0 : i32
    return %c0_i32, %c0_i32_0 : i32, i32
  }
  func.func @transform_6(%arg0: i32) -> (i32, i32) {
    %c0_i32 = arith.constant 0 : i32
    %c0_i32_0 = arith.constant 0 : i32
    %c0_i32_1 = arith.constant 0 : i32
    return %c0_i32, %c0_i32_0 : i32, i32
  }
  func.func @transform_7(%arg0: i32) -> (i32, i32) {
    %c0_i32 = arith.constant 0 : i32
    %c0_i32_0 = arith.constant 0 : i32
    %c0_i32_1 = arith.constant 0 : i32
    return %c0_i32, %c0_i32_0 : i32, i32
  }
  func.func @transform_8(%arg0: i32) -> (i32, i32, i32) {
    %c0_i32 = arith.constant 0 : i32
    %c0_i32_0 = arith.constant 0 : i32
    %c0_i32_1 = arith.constant 0 : i32
    return %arg0, %c0_i32, %c0_i32_0 : i32, i32, i32
  }
}

</mosaic_0001>

<bundles_post_ra>
// kernel: scc_forward.1
= control target key start
LH: loop header
LB: loop body
LE: loop exit
PB: predicated region body
PF: predicated region fallthrough
CT: control target
= control target key end

     0   :  { %s3241_s27 = smov 0   ;;  %s4991_s0 = inlined_call_operand.vmem [shape: f32[2,256,512], index: 0, kind: input, shape index: {}]   ;;  %s4992_s1 = inlined_call_operand.vmem [shape: f32[2,256,512], index: 1, kind: input, shape index: {}]   ;;  %s4993_s2 = inlined_call_operand.vmem [shape: f32[128,128], index: 2, kind: input, shape index: {}]   ;;  %s4994_s3 = inlined_call_operand.vmem [shape: f32[1,128], index: 3, kind: input, shape index: {}]   ;;  %s4995_s4 = inlined_call_operand.vmem [shape: f32[128,128], index: 4, kind: input, shape index: {}]   ;;  %s4996_s5 = inlined_call_operand.vmem [shape: f32[1,128], index: 5, kind: input, shape index: {}]   ;;  %s4997_s6 = inlined_call_operand.vmem [shape: f32[256,2], index: 6, kind: input, shape index: {}]   ;;  %s4998_s7 = inlined_call_operand.vmem [shape: bf16[256,256], index: 7, kind: input, shape index: {}]   ;;  %s4999_s8 = inlined_call_operand.vmem [shape: f32[2,256,512], index: 8, kind: output, shape index: {}]  }
   0x1 LB: > { %s2653_s28 = sadd.s32 4294967295, %s3188_s27   ;;  %p2657_p0 = scmp.ge.s32.totalorder %s3188_s27, 1  ;;  %s3188_s27 = sphi %s3241_s27, %s18_s27  }
   0x2   : > { %p272_p1 = scmp.lt.s32.totalorder %s3188_s27, 3 }
   0x4   : > { %p273_p2 = pnand %p2657_p0, %p272_p1 }
   0x6   : > { %276 = sbr.rel (%p273_p2) target bundleno = 774 (0x306), region = 52 }
   0xd   : > { %p311_p3 = scmp.lt.s32.totalorder %s2653_s28, 1  ;;  %v5000_v0 = vmov 0.00390625   ;;  %vm3192_vm0 = vmmov 0   ;;  %vm875_vm1 = vcmask 1040384   ;;  %vm877_vm2 = vcmask 1041408  }
   0xe   : > { %646 = vmatprep.mubr.f32.mxu0 %v5000_v0  ;;  %717 = vmatprep.mubr.f32.mxu1 %v5000_v0  ;;  %vm879_vm3 = vcmask 1042432  }
   0xf   : > { %s5147_s28 = smov (!%p311_p3, %s2653_s28), 1 }
  0x10   : > { %s3251_s29 = sshll.u32 %s5147_s28, 10 }
  0x11   : > { %s3257_s10 = scalar_lea.vmem %s4991_s0, %s3251_s29  ;;  %s3557_s13 = scalar_lea.vmem %s4992_s1, %s3251_s29 }
  0x12   : > { %v327_v1 = vld [vmem:[%s3257_s10 + $0x8] sm:$0xff]  ;;  %v326_v3 = vld [vmem:[%s3257_s10] sm:$0xff]  ;;  %v329_v6 = vld [vmem:[%s3257_s10 + $0x18] sm:$0xff]  ;;  %s4409_s12 = scalar_lea.vmem %s4999_s8, %s3251_s29 }
  0x13   : > { %v331_v2 = vld [vmem:[%s3257_s10 + $0x28] sm:$0xff]  ;;  %v330_v5 = vld [vmem:[%s3257_s10 + $0x20] sm:$0xff]  ;;  %v333_v7 = vld [vmem:[%s3257_s10 + $0x38] sm:$0xff] }
  0x14   : > { %v3262_v4 = vpack.c.bf16 %v331_v2, %v327_v1  ;;  %v3267_v8 = vpack.c.bf16 %v330_v5, %v326_v3  ;;  %v3269_v9 = vpack.c.bf16 %v333_v7, %v329_v6  ;;  %v328_v10 = vld [vmem:[%s3257_s10 + $0x10] sm:$0xff]  ;;  %v335_v12 = vld [vmem:[%s3257_s10 + $0x48] sm:$0xff]  ;;  %v334_v15 = vld [vmem:[%s3257_s10 + $0x40] sm:$0xff] }
  0x15   : > { %v332_v11 = vld [vmem:[%s3257_s10 + $0x30] sm:$0xff]  ;;  %v339_v14 = vld [vmem:[%s3257_s10 + $0x68] sm:$0xff]  ;;  %v338_v16 = vld [vmem:[%s3257_s10 + $0x60] sm:$0xff] }
  0x16   : > { %2809 = vmatprep.subr.bf16.mxu0 %v3262_v4  ;;  %v3275_v13 = vpack.c.bf16 %v332_v11, %v328_v10  ;;  %2873 = vmatprep.subr.bf16.mxu1 %v3269_v9  ;;  %v3282_v17 = vpack.c.bf16 %v339_v14, %v335_v12  ;;  %v3284_v18 = vpack.c.bf16 %v338_v16, %v334_v15  ;;  %v337_v19 = vld [vmem:[%s3257_s10 + $0x58] sm:$0xff]  ;;  %v336_v21 = vld [vmem:[%s3257_s10 + $0x50] sm:$0xff]  ;;  %v343_v24 = vld [vmem:[%s3257_s10 + $0x88] sm:$0xff] }
  0x17   : > { %2811 = vmatpush1.bf16.msra.mxu0 %v3267_v8  ;;  %v341_v20 = vld [vmem:[%s3257_s10 + $0x78] sm:$0xff]  ;;  %v340_v23 = vld [vmem:[%s3257_s10 + $0x70] sm:$0xff]  ;;  %v347_v25 = vld [vmem:[%s3257_s10 + $0xa8] sm:$0xff] }
  0x18   : > { %2875 = vmatpush1.bf16.msra.mxu1 %v3275_v13  ;;  %v3290_v22 = vpack.c.bf16 %v341_v20, %v337_v19  ;;  %2813 = vmatprep.subr.bf16.mxu0 %v3282_v17  ;;  %v3296_v26 = vpack.c.bf16 %v340_v23, %v336_v21  ;;  %v3298_v27 = vpack.c.bf16 %v347_v25, %v343_v24  ;;  %v342_v28 = vld [vmem:[%s3257_s10 + $0x80] sm:$0xff]  ;;  %v345_v30 = vld [vmem:[%s3257_s10 + $0x98] sm:$0xff]  ;;  %v344_v32 = vld [vmem:[%s3257_s10 + $0x90] sm:$0xff] }
  0x19   : > { %v346_v29 = vld [vmem:[%s3257_s10 + $0xa0] sm:$0xff]  ;;  %v349_v31 = vld [vmem:[%s3257_s10 + $0xb8] sm:$0xff]  ;;  %v348_v33 = vld [vmem:[%s3257_s10 + $0xb0] sm:$0xff] }
  0x1a   : > { %2877 = vmatprep.subr.bf16.mxu1 %v3290_v22  ;;  %v3308_v34 = vpack.c.bf16 %v346_v29, %v342_v28  ;;  %v3310_v35 = vpack.c.bf16 %v349_v31, %v345_v30  ;;  %v351_v36 = vld [vmem:[%s3257_s10 + $0xc8] sm:$0xff]  ;;  %v350_v38 = vld [vmem:[%s3257_s10 + $0xc0] sm:$0xff]  ;;  %v3317_v39 = vpack.c.bf16 %v348_v33, %v344_v32  ;;  %v353_v42 = vld [vmem:[%s3257_s10 + $0xd8] sm:$0xff] }
  0x1b   : > { %2815 = vmatpush1.bf16.msra.mxu0 %v3284_v18  ;;  %v355_v37 = vld [vmem:[%s3257_s10 + $0xe8] sm:$0xff]  ;;  %v354_v41 = vld [vmem:[%s3257_s10 + $0xe0] sm:$0xff]  ;;  %v357_v43 = vld [vmem:[%s3257_s10 + $0xf8] sm:$0xff] }
  0x1c   : > { %5052 = vst [vmem:[#allocation2_spill] sm:$0xff] %v3310_v35  ;;  %2879 = vmatpush1.bf16.msra.mxu1 %v3296_v26  ;;  %2817 = vmatprep.subr.bf16.mxu0 %v3298_v27  ;;  %5053 = vst [vmem:[#allocation3_spill] sm:$0xff] %v3317_v39  ;;  %v3319_v40 = vpack.c.bf16 %v355_v37, %v351_v36  ;;  %v3325_v44 = vpack.c.bf16 %v357_v43, %v353_v42  ;;  %v352_v45 = vld [vmem:[%s3257_s10 + $0xd0] sm:$0xff]  ;;  %v359_v47 = vld [vmem:[%s3257_s10 + $0x108] sm:$0xff] }
  0x1d   : > { %2881 = vmatprep.subr.bf16.mxu1 %v3310_v35  ;;  %v356_v46 = vld [vmem:[%s3257_s10 + $0xf0] sm:$0xff]  ;;  %v363_v48 = vld [vmem:[%s3257_s10 + $0x128] sm:$0xff]  ;;  %v3332_v49 = vpack.c.bf16 %v354_v41, %v350_v38  ;;  %v361_v50 = vld [vmem:[%s3257_s10 + $0x118] sm:$0xff] }
  0x1e   : > { %5054 = vst [vmem:[#allocation4_spill] sm:$0xff] %v3325_v44  ;;  %v365_v51 = vld [vmem:[%s3257_s10 + $0x138] sm:$0xff]  ;;  %v3338_v52 = vpack.c.bf16 %v356_v46, %v352_v45  ;;  %v3340_v53 = vpack.c.bf16 %v363_v48, %v359_v47  ;;  %v358_v54 = vld [vmem:[%s3257_s10 + $0x100] sm:$0xff]  ;;  %v360_v56 = vld [vmem:[%s3257_s10 + $0x110] sm:$0xff] }
  0x1f   : > { %2819 = vmatpush1.bf16.msra.mxu0 %v3308_v34  ;;  %v362_v55 = vld [vmem:[%s3257_s10 + $0x120] sm:$0xff]  ;;  %v3346_v57 = vpack.c.bf16 %v365_v51, %v361_v50  ;;  %v364_v58 = vld [vmem:[%s3257_s10 + $0x130] sm:$0xff]  ;;  %v367_v59 = vld [vmem:[%s3257_s10 + $0x148] sm:$0xff] }
  0x20   : > { %2883 = vmatpush1.bf16.msra.mxu1 %v3317_v39  ;;  %2821 = vmatprep.subr.bf16.mxu0 %v3319_v40  ;;  %5055 = vst [vmem:[#allocation5_spill] sm:$0xff] %v3338_v52  ;;  %v371_v60 = vld [vmem:[%s3257_s10 + $0x168] sm:$0xff]  ;;  %v369_v61 = vld [vmem:[%s3257_s10 + $0x158] sm:$0xff]  ;;  %v3354_v63 = vpack.c.bf16 %v362_v55, %v358_v54  ;;  %v3358_v1 = vpack.c.bf16 %v364_v58, %v360_v56  ;;  %v366_v3 = vld [vmem:[%s3257_s10 + $0x140] sm:$0xff] }
  0x21   : > { %2885 = vmatprep.subr.bf16.mxu1 %v3325_v44  ;;  %5056 = vst [vmem:[#allocation6_spill] sm:$0xff] %v3346_v57  ;;  %v373_v62 = vld [vmem:[%s3257_s10 + $0x178] sm:$0xff]  ;;  %v3360_v2 = vpack.c.bf16 %v371_v60, %v367_v59  ;;  %v370_v5 = vld [vmem:[%s3257_s10 + $0x160] sm:$0xff]  ;;  %v368_v6 = vld [vmem:[%s3257_s10 + $0x150] sm:$0xff] }
  0x22   : > { %5057 = vst [vmem:[#allocation7_spill] sm:$0xff] %v3358_v1  ;;  %v3366_v7 = vpack.c.bf16 %v373_v62, %v369_v61  ;;  %v372_v10 = vld [vmem:[%s3257_s10 + $0x170] sm:$0xff]  ;;  %v375_v11 = vld [vmem:[%s3257_s10 + $0x188] sm:$0xff]  ;;  %v377_v14 = vld [vmem:[%s3257_s10 + $0x198] sm:$0xff]  ;;  %v3374_v16 = vpack.c.bf16 %v370_v5, %v366_v3 }
  0x23   : > { %2823 = vmatpush1.bf16.msra.mxu0 %v3332_v49  ;;  %v379_v12 = vld [vmem:[%s3257_s10 + $0x1a8] sm:$0xff]  ;;  %v381_v15 = vld [vmem:[%s3257_s10 + $0x1b8] sm:$0xff]  ;;  %v3378_v19 = vpack.c.bf16 %v372_v10, %v368_v6  ;;  %v374_v21 = vld [vmem:[%s3257_s10 + $0x180] sm:$0xff] }
  0x24   : > { %2887 = vmatpush1.bf16.msra.mxu1 %v3338_v52  ;;  %2825 = vmatprep.subr.bf16.mxu0 %v3340_v53  ;;  %5058 = vst [vmem:[#allocation8_spill] sm:$0xff] %v3366_v7  ;;  %v3380_v20 = vpack.c.bf16 %v379_v12, %v375_v11  ;;  %v378_v23 = vld [vmem:[%s3257_s10 + $0x1a0] sm:$0xff]  ;;  %v376_v24 = vld [vmem:[%s3257_s10 + $0x190] sm:$0xff]  ;;  %v3386_v25 = vpack.c.bf16 %v381_v15, %v377_v14  ;;  %v383_v29 = vld [vmem:[%s3257_s10 + $0x1c8] sm:$0xff] }
  0x25   : > { %2889 = vmatprep.subr.bf16.mxu1 %v3346_v57  ;;  %5059 = vst [vmem:[#allocation9_spill] sm:$0xff] %v3378_v19  ;;  %v380_v28 = vld [vmem:[%s3257_s10 + $0x1b0] sm:$0xff]  ;;  %v387_v30 = vld [vmem:[%s3257_s10 + $0x1e8] sm:$0xff]  ;;  %v385_v31 = vld [vmem:[%s3257_s10 + $0x1d8] sm:$0xff]  ;;  %v3394_v33 = vpack.c.bf16 %v378_v23, %v374_v21 }
  0x26   : > { %5060 = vst [vmem:[#allocation10_spill] sm:$0xff] %v3386_v25  ;;  %v389_v32 = vld [vmem:[%s3257_s10 + $0x1f8] sm:$0xff]  ;;  %v3398_v36 = vpack.c.bf16 %v380_v28, %v376_v24  ;;  %v3400_v37 = vpack.c.bf16 %v387_v30, %v383_v29  ;;  %v382_v38 = vld [vmem:[%s3257_s10 + $0x1c0] sm:$0xff]  ;;  %v384_v42 = vld [vmem:[%s3257_s10 + $0x1d0] sm:$0xff] }
  0x27   : > { %2827 = vmatpush1.bf16.msra.mxu0 %v3354_v63  ;;  %v386_v41 = vld [vmem:[%s3257_s10 + $0x1e0] sm:$0xff]  ;;  %v3406_v43 = vpack.c.bf16 %v389_v32, %v385_v31  ;;  %v388_v45 = vld [vmem:[%s3257_s10 + $0x1f0] sm:$0xff]  ;;  %v391_v46 = vld [vmem:[%s3257_s10 + $0x208] sm:$0xff] }
  0x28   : > { %2891 = vmatpush1.bf16.msra.mxu1 %v3358_v1  ;;  %2829 = vmatprep.subr.bf16.mxu0 %v3360_v2  ;;  %5061 = vst [vmem:[#allocation11_spill] sm:$0xff] %v3398_v36  ;;  %v395_v47 = vld [vmem:[%s3257_s10 + $0x228] sm:$0xff]  ;;  %v393_v48 = vld [vmem:[%s3257_s10 + $0x218] sm:$0xff]  ;;  %v3414_v51 = vpack.c.bf16 %v386_v41, %v382_v38  ;;  %v3418_v54 = vpack.c.bf16 %v388_v45, %v384_v42  ;;  %v390_v56 = vld [vmem:[%s3257_s10 + $0x200] sm:$0xff] }
  0x29   : > { %2893 = vmatprep.subr.bf16.mxu1 %v3366_v7  ;;  %5062 = vst [vmem:[#allocation12_spill] sm:$0xff] %v3406_v43  ;;  %v397_v50 = vld [vmem:[%s3257_s10 + $0x238] sm:$0xff]  ;;  %v3420_v55 = vpack.c.bf16 %v395_v47, %v391_v46  ;;  %v394_v58 = vld [vmem:[%s3257_s10 + $0x220] sm:$0xff]  ;;  %v392_v59 = vld [vmem:[%s3257_s10 + $0x210] sm:$0xff]  ;;  %v5080_v7 = vmov 0.00390625  }
  0x2a   : > { %5063 = vst [vmem:[#allocation13_spill] sm:$0xff] %v3418_v54  ;;  %v3426_v60 = vpack.c.bf16 %v397_v50, %v393_v48  ;;  %v396_v61 = vld [vmem:[%s3257_s10 + $0x230] sm:$0xff]  ;;  %v399_v62 = vld [vmem:[%s3257_s10 + $0x248] sm:$0xff]  ;;  %v401_v5 = vld [vmem:[%s3257_s10 + $0x258] sm:$0xff]  ;;  %v3434_v10 = vpack.c.bf16 %v394_v58, %v390_v56 }
  0x2b   : > { %2831 = vmatpush1.bf16.msra.mxu0 %v3374_v16  ;;  %v403_v3 = vld [vmem:[%s3257_s10 + $0x268] sm:$0xff]  ;;  %v405_v6 = vld [vmem:[%s3257_s10 + $0x278] sm:$0xff]  ;;  %v3438_v11 = vpack.c.bf16 %v396_v61, %v392_v59  ;;  %v398_v14 = vld [vmem:[%s3257_s10 + $0x240] sm:$0xff] }
  0x2c   : > { %2895 = vmatpush1.bf16.msra.mxu1 %v3378_v19  ;;  %2833 = vmatprep.subr.bf16.mxu0 %v3380_v20  ;;  %5064 = vst [vmem:[#allocation14_spill] sm:$0xff] %v3426_v60  ;;  %v3440_v12 = vpack.c.bf16 %v403_v3, %v399_v62  ;;  %v402_v15 = vld [vmem:[%s3257_s10 + $0x260] sm:$0xff]  ;;  %v400_v21 = vld [vmem:[%s3257_s10 + $0x250] sm:$0xff]  ;;  %v3446_v23 = vpack.c.bf16 %v405_v6, %v401_v5  ;;  %v407_v28 = vld [vmem:[%s3257_s10 + $0x288] sm:$0xff] }
  0x2d   : > { %2897 = vmatprep.subr.bf16.mxu1 %v3386_v25  ;;  %5065 = vst [vmem:[#allocation15_spill] sm:$0xff] %v3438_v11  ;;  %v404_v24 = vld [vmem:[%s3257_s10 + $0x270] sm:$0xff]  ;;  %v411_v29 = vld [vmem:[%s3257_s10 + $0x2a8] sm:$0xff]  ;;  %v409_v30 = vld [vmem:[%s3257_s10 + $0x298] sm:$0xff]  ;;  %v3454_v32 = vpack.c.bf16 %v402_v15, %v398_v14 }
  0x2e   : > { %5066 = vst [vmem:[#allocation16_spill] sm:$0xff] %v3446_v23  ;;  %v413_v31 = vld [vmem:[%s3257_s10 + $0x2b8] sm:$0xff]  ;;  %v3458_v38 = vpack.c.bf16 %v404_v24, %v400_v21  ;;  %v3460_v41 = vpack.c.bf16 %v411_v29, %v407_v28  ;;  %v406_v42 = vld [vmem:[%s3257_s10 + $0x280] sm:$0xff]  ;;  %v408_v46 = vld [vmem:[%s3257_s10 + $0x290] sm:$0xff] }
  0x2f   : > { %2835 = vmatpush1.bf16.msra.mxu0 %v3394_v33  ;;  %v410_v45 = vld [vmem:[%s3257_s10 + $0x2a0] sm:$0xff]  ;;  %v3466_v47 = vpack.c.bf16 %v413_v31, %v409_v30  ;;  %v412_v48 = vld [vmem:[%s3257_s10 + $0x2b0] sm:$0xff]  ;;  %v415_v50 = vld [vmem:[%s3257_s10 + $0x2c8] sm:$0xff] }
  0x30   : > { %2899 = vmatpush1.bf16.msra.mxu1 %v3398_v36  ;;  %2837 = vmatprep.subr.bf16.mxu0 %v3400_v37  ;;  %5067 = vst [vmem:[#allocation17_spill] sm:$0xff] %v3458_v38  ;;  %v419_v56 = vld [vmem:[%s3257_s10 + $0x2e8] sm:$0xff]  ;;  %v417_v58 = vld [vmem:[%s3257_s10 + $0x2d8] sm:$0xff]  ;;  %v3474_v61 = vpack.c.bf16 %v410_v45, %v406_v42  ;;  %v3478_v62 = vpack.c.bf16 %v412_v48, %v408_v46  ;;  %v414_v5 = vld [vmem:[%s3257_s10 + $0x2c0] sm:$0xff] }
  0x31   : > { %2901 = vmatprep.subr.bf16.mxu1 %v3406_v43  ;;  %5068 = vst [vmem:[#allocation18_spill] sm:$0xff] %v3466_v47  ;;  %v421_v59 = vld [vmem:[%s3257_s10 + $0x2f8] sm:$0xff]  ;;  %v3480_v3 = vpack.c.bf16 %v419_v56, %v415_v50  ;;  %v418_v6 = vld [vmem:[%s3257_s10 + $0x2e0] sm:$0xff]  ;;  %v416_v14 = vld [vmem:[%s3257_s10 + $0x2d0] sm:$0xff] }
  0x32   : > { %5069 = vst [vmem:[#allocation19_spill] sm:$0xff] %v3478_v62  ;;  %v3486_v15 = vpack.c.bf16 %v421_v59, %v417_v58  ;;  %v420_v21 = vld [vmem:[%s3257_s10 + $0x2f0] sm:$0xff]  ;;  %v423_v24 = vld [vmem:[%s3257_s10 + $0x308] sm:$0xff]  ;;  %v425_v29 = vld [vmem:[%s3257_s10 + $0x318] sm:$0xff]  ;;  %v3494_v31 = vpack.c.bf16 %v418_v6, %v414_v5 }
  0x33   : > { %2839 = vmatpush1.bf16.msra.mxu0 %v3414_v51  ;;  %v427_v28 = vld [vmem:[%s3257_s10 + $0x328] sm:$0xff]  ;;  %v429_v30 = vld [vmem:[%s3257_s10 + $0x338] sm:$0xff]  ;;  %v3498_v42 = vpack.c.bf16 %v420_v21, %v416_v14  ;;  %v422_v46 = vld [vmem:[%s3257_s10 + $0x300] sm:$0xff] }
  0x34   : > { %2903 = vmatpush1.bf16.msra.mxu1 %v3418_v54  ;;  %2841 = vmatprep.subr.bf16.mxu0 %v3420_v55  ;;  %5070 = vst [vmem:[#allocation20_spill] sm:$0xff] %v3486_v15  ;;  %v3500_v45 = vpack.c.bf16 %v427_v28, %v423_v24  ;;  %v426_v48 = vld [vmem:[%s3257_s10 + $0x320] sm:$0xff]  ;;  %v424_v50 = vld [vmem:[%s3257_s10 + $0x310] sm:$0xff]  ;;  %v3506_v56 = vpack.c.bf16 %v429_v30, %v425_v29  ;;  %v431_v59 = vld [vmem:[%s3257_s10 + $0x348] sm:$0xff] }
  0x35   : > { %2905 = vmatprep.subr.bf16.mxu1 %v3426_v60  ;;  %5071 = vst [vmem:[#allocation21_spill] sm:$0xff] %v3498_v42  ;;  %v428_v58 = vld [vmem:[%s3257_s10 + $0x330] sm:$0xff]  ;;  %v435_v5 = vld [vmem:[%s3257_s10 + $0x368] sm:$0xff]  ;;  %v433_v6 = vld [vmem:[%s3257_s10 + $0x358] sm:$0xff]  ;;  %v3514_v21 = vpack.c.bf16 %v426_v48, %v422_v46 }
  0x36   : > { %5072 = vst [vmem:[#allocation22_spill] sm:$0xff] %v3506_v56  ;;  %v437_v14 = vld [vmem:[%s3257_s10 + $0x378] sm:$0xff]  ;;  %v3518_v24 = vpack.c.bf16 %v428_v58, %v424_v50  ;;  %v3520_v28 = vpack.c.bf16 %v435_v5, %v431_v59  ;;  %v430_v29 = vld [vmem:[%s3257_s10 + $0x340] sm:$0xff]  ;;  %v432_v0 = vld [vmem:[%s3257_s10 + $0x350] sm:$0xff] }
  0x37   : > { %2843 = vmatpush1.bf16.msra.mxu0 %v3434_v10  ;;  %v434_v30 = vld [vmem:[%s3257_s10 + $0x360] sm:$0xff]  ;;  %v436_v46 = vld [vmem:[%s3257_s10 + $0x370] sm:$0xff]  ;;  %v439_v48 = vld [vmem:[%s3257_s10 + $0x388] sm:$0xff] }
  0x38   : > { %2907 = vmatpush1.bf16.msra.mxu1 %v3438_v11  ;;  %2845 = vmatprep.subr.bf16.mxu0 %v3440_v12  ;;  %5073 = vst [vmem:[#allocation23_spill] sm:$0xff] %v3518_v24  ;;  %v441_v50 = vld [vmem:[%s3257_s10 + $0x398] sm:$0xff]  ;;  %v3534_v59 = vpack.c.bf16 %v434_v30, %v430_v29  ;;  %v3538_v5 = vpack.c.bf16 %v436_v46, %v432_v0  ;;  %v444_v29 = vld [vmem:[%s3257_s10 + $0x3b0] sm:$0xff]  ;;  %v447_v30 = vld [vmem:[%s3257_s10 + $0x3c8] sm:$0xff] }
  0x39   : > { %2909 = vmatprep.subr.bf16.mxu1 %v3446_v23  ;;  %v445_v58 = vld [vmem:[%s3257_s10 + $0x3b8] sm:$0xff]  ;;  %v456_v11 = vld [vmem:[%s3557_s13 + $0x10] sm:$0xff]  ;;  %v471_v25 = vld [vmem:[%s3557_s13 + $0x88] sm:$0xff] }
  0x3a   : > { %5075 = vst [vmem:[#allocation25_spill] sm:$0xff] %v3538_v5  ;;  %v453_v23 = vld [vmem:[%s3257_s10 + $0x3f8] sm:$0xff]  ;;  %v460_v54 = vld [vmem:[%s3557_s13 + $0x30] sm:$0xff]  ;;  %v475_v19 = vld [vmem:[%s3557_s13 + $0xa8] sm:$0xff] }
  0x3b   : > { %2847 = vmatpush1.bf16.msra.mxu0 %v3454_v32  ;;  %v469_v43 = vld [vmem:[%s3557_s13 + $0x78] sm:$0xff]  ;;  %v468_v36 = vld [vmem:[%s3557_s13 + $0x70] sm:$0xff]  ;;  %v491_v1 = vld [vmem:[%s3557_s13 + $0x128] sm:$0xff] }
  0x3c   : > { %2911 = vmatpush1.bf16.msra.mxu1 %v3458_v38  ;;  %2849 = vmatprep.subr.bf16.mxu0 %v3460_v41  ;;  %v449_v38 = vld [vmem:[%s3257_s10 + $0x3d8] sm:$0xff]  ;;  %v520_v44 = vld [vmem:[%s3557_s13 + $0x210] sm:$0xff]  ;;  %v527_v35 = vld [vmem:[%s3557_s13 + $0x248] sm:$0xff] }
  0x3d   : > { %2913 = vmatprep.subr.bf16.mxu1 %v3466_v47  ;;  %v3546_v47 = vpack.c.bf16 %v445_v58, %v441_v50  ;;  %v450_v50 = vld [vmem:[%s3257_s10 + $0x3e0] sm:$0xff]  ;;  %v448_v58 = vld [vmem:[%s3257_s10 + $0x3d0] sm:$0xff]  ;;  %v525_v57 = vld [vmem:[%s3557_s13 + $0x238] sm:$0xff] }
  0x3e   : > { %v524_v39 = vld [vmem:[%s3557_s13 + $0x230] sm:$0xff] }
  0x3f   : > { %2851 = vmatpush1.bf16.msra.mxu0 %v3474_v61  ;;  %5076 = vst [vmem:[#allocation26_spill] sm:$0xff] %v3546_v47 }
  0x40   : > { %2915 = vmatpush1.bf16.msra.mxu1 %v3478_v62  ;;  %2853 = vmatprep.subr.bf16.mxu0 %v3480_v3  ;;  %v440_v62 = vld [vmem:[%s3257_s10 + $0x390] sm:$0xff] }
  0x41   : > { %2917 = vmatprep.subr.bf16.mxu1 %v3486_v15  ;;  %v3526_v15 = vpack.c.bf16 %v437_v14, %v433_v6  ;;  %v438_v14 = vld [vmem:[%s3257_s10 + $0x380] sm:$0xff] }
  0x43   : > { %2855 = vmatpush1.bf16.msra.mxu0 %v3494_v31  ;;  %5074 = vst [vmem:[#allocation24_spill] sm:$0xff] %v3526_v15 }
  0x44   : > { %2919 = vmatpush1.bf16.msra.mxu1 %v3498_v42  ;;  %2857 = vmatprep.subr.bf16.mxu0 %v3500_v45  ;;  %v443_v42 = vld [vmem:[%s3257_s10 + $0x3a8] sm:$0xff] }
  0x45   : > { %2921 = vmatprep.subr.bf16.mxu1 %v3506_v56  ;;  %v3540_v6 = vpack.c.bf16 %v443_v42, %v439_v48  ;;  %v442_v56 = vld [vmem:[%s3257_s10 + $0x3a0] sm:$0xff]  ;;  %v3564_v42 = vpack.c.bf16 %v444_v29, %v440_v62  ;;  %v457_v62 = vld [vmem:[%s3557_s13 + $0x18] sm:$0xff] }
  0x46   : > { %v3560_v0 = vpack.c.bf16 %v442_v56, %v438_v14  ;;  %v446_v48 = vld [vmem:[%s3257_s10 + $0x3c0] sm:$0xff]  ;;  %v452_v56 = vld [vmem:[%s3257_s10 + $0x3f0] sm:$0xff]  ;;  %v455_v14 = vld [vmem:[%s3557_s13 + $0x8] sm:$0xff] }
  0x47   : > { %2859 = vmatpush1.bf16.msra.mxu0 %v3514_v21  ;;  %5077 = vst [vmem:[#allocation27_spill] sm:$0xff] %v3564_v42  ;;  %v3580_v29 = vpack.c.bf16 %v450_v50, %v446_v48  ;;  %v463_v48 = vld [vmem:[%s3557_s13 + $0x48] sm:$0xff] }
  0x48   : > { %2923 = vmatpush1.bf16.msra.mxu1 %v3518_v24  ;;  %2861 = vmatprep.subr.bf16.mxu0 %v3520_v28  ;;  %v451_v24 = vld [vmem:[%s3257_s10 + $0x3e8] sm:$0xff] }
  0x49   : > { %2925 = vmatprep.subr.bf16.mxu1 %v3526_v15  ;;  %v3566_v46 = vpack.c.bf16 %v451_v24, %v447_v30  ;;  %v3572_v15 = vpack.c.bf16 %v453_v23, %v449_v38  ;;  %v461_v24 = vld [vmem:[%s3557_s13 + $0x38] sm:$0xff]  ;;  %v3584_v23 = vpack.c.bf16 %v452_v56, %v448_v58  ;;  %v454_v30 = vld [vmem:[%s3557_s13] sm:$0xff]  ;;  %v467_v50 = vld [vmem:[%s3557_s13 + $0x68] sm:$0xff]  ;;  %v3002_v58 = vpack.c.bf16 %v460_v54, %v456_v11 }
  0x4a   : > { %v3000_v60 = vpack.c.bf16 %v461_v24, %v457_v62  ;;  %v2940_v56 = vpack.c.bf16 %v467_v50, %v463_v48  ;;  %v466_v62 = vld [vmem:[%s3557_s13 + $0x60] sm:$0xff]  ;;  %v464_v24 = vld [vmem:[%s3557_s13 + $0x50] sm:$0xff] }
  0x4b   : > { %2863 = vmatpush1.bf16.msra.mxu0 %v3534_v59  ;;  %5078 = vst [vmem:[#allocation28_spill] sm:$0xff] %v3572_v15  ;;  %5079 = vst [vmem:[#allocation29_spill] sm:$0xff] %v3584_v23  ;;  %v470_v11 = vld [vmem:[%s3557_s13 + $0x80] sm:$0xff]  ;;  %v476_v50 = vld [vmem:[%s3557_s13 + $0xb0] sm:$0xff] }
  0x4c   : > { %2927 = vmatpush1.bf16.msra.mxu1 %v3538_v5  ;;  %2865 = vmatprep.subr.bf16.mxu0 %v3540_v6  ;;  %v459_v5 = vld [vmem:[%s3557_s13 + $0x28] sm:$0xff] }
  0x4d   : > { %2929 = vmatprep.subr.bf16.mxu1 %v3546_v47  ;;  %v2936_v38 = vpack.c.bf16 %v459_v5, %v455_v14  ;;  %v458_v47 = vld [vmem:[%s3557_s13 + $0x20] sm:$0xff] }
  0x4e   : > { %v2938_v5 = vpack.c.bf16 %v458_v47, %v454_v30  ;;  %v462_v14 = vld [vmem:[%s3557_s13 + $0x40] sm:$0xff]  ;;  %v473_v47 = vld [vmem:[%s3557_s13 + $0x98] sm:$0xff]  ;;  %v472_v30 = vld [vmem:[%s3557_s13 + $0x90] sm:$0xff] }
  0x4f   : > { %2867 = vmatpush1.bf16.msra.mxu0 %v3560_v0  ;;  %v2942_v54 = vpack.c.bf16 %v466_v62, %v462_v14  ;;  %v481_v14 = vld [vmem:[%s3557_s13 + $0xd8] sm:$0xff]  ;;  %v480_v62 = vld [vmem:[%s3557_s13 + $0xd0] sm:$0xff] }
  0x50   : > { %2931 = vmatpush1.bf16.msra.mxu1 %v3564_v42  ;;  %2869 = vmatprep.subr.bf16.mxu0 %v3566_v46  ;;  %v465_v42 = vld [vmem:[%s3557_s13 + $0x58] sm:$0xff] }
  0x51   : > { %2933 = vmatprep.subr.bf16.mxu1 %v3572_v15  ;;  %v3004_v15 = vpack.c.bf16 %v469_v43, %v465_v42  ;;  %v3006_v43 = vpack.c.bf16 %v468_v36, %v464_v24  ;;  %v474_v42 = vld [vmem:[%s3557_s13 + $0xa0] sm:$0xff] }
  0x53   : > { %2871 = vmatpush1.bf16.msra.mxu0 %v3580_v29 }
  0x54   : > { %2935 = vmatpush1.bf16.msra.mxu1 %v3584_v23  ;;  %2937 = vmatprep.subr.bf16.mxu0 %v2936_v38  ;;  %v477_v38 = vld [vmem:[%s3557_s13 + $0xb8] sm:$0xff]  ;;  %v479_v23 = vld [vmem:[%s3557_s13 + $0xc8] sm:$0xff] }
  0x55   : > { %3001 = vmatprep.subr.bf16.mxu1 %v3000_v60  ;;  %v2944_v60 = vpack.c.bf16 %v475_v19, %v471_v25  ;;  %v3008_v48 = vpack.c.bf16 %v477_v38, %v473_v47  ;;  %v2946_v19 = vpack.c.bf16 %v474_v42, %v470_v11  ;;  %v3010_v25 = vpack.c.bf16 %v476_v50, %v472_v30  ;;  %v484_v47 = vld [vmem:[%s3557_s13 + $0xf0] sm:$0xff]  ;;  %v487_v38 = vld [vmem:[%s3557_s13 + $0x108] sm:$0xff]  ;;  %v486_v42 = vld [vmem:[%s3557_s13 + $0x100] sm:$0xff] }
  0x56   : > { %647 = vmatmul.mubr.f32.vlgmr.msra.gmra.mrb[0].mxu0 %v5080_v7  ;;  %v2952_v11 = vpack.c.bf16 %v491_v1, %v487_v38  ;;  %v490_v30 = vld [vmem:[%s3557_s13 + $0x120] sm:$0xff]  ;;  %v500_v38 = vld [vmem:[%s3557_s13 + $0x170] sm:$0xff] }
  0x57   : > { %2939 = vmatpush1.bf16.msra.mxu0 %v2938_v5  ;;  %718 = vmatmul.mubr.f32.vlgmr.msra.gmra.mrb[0].mxu1 %v5080_v7  ;;  %v483_v5 = vld [vmem:[%s3557_s13 + $0xe8] sm:$0xff]  ;;  %v2954_v1 = vpack.c.bf16 %v490_v30, %v486_v42 }
  0x58   : > { %3003 = vmatpush1.bf16.msra.mxu1 %v3002_v58  ;;  %2941 = vmatprep.subr.bf16.mxu0 %v2940_v56  ;;  %v485_v58 = vld [vmem:[%s3557_s13 + $0xf8] sm:$0xff]  ;;  %v2948_v36 = vpack.c.bf16 %v483_v5, %v479_v23  ;;  %v482_v56 = vld [vmem:[%s3557_s13 + $0xe0] sm:$0xff]  ;;  %v492_v5 = vld [vmem:[%s3557_s13 + $0x130] sm:$0xff] }
  0x59   : > { %3005 = vmatprep.subr.bf16.mxu1 %v3004_v15  ;;  %788 = vmatprep.mubr.f32.mxu0 %v5080_v7  ;;  %v478_v15 = vld [vmem:[%s3557_s13 + $0xc0] sm:$0xff]  ;;  %v3012_v24 = vpack.c.bf16 %v485_v58, %v481_v14  ;;  %v495_v14 = vld [vmem:[%s3557_s13 + $0x148] sm:$0xff] }
  0x5a   : > { %859 = vmatprep.mubr.f32.mxu1 %v5080_v7  ;;  %v2950_v23 = vpack.c.bf16 %v482_v56, %v478_v15  ;;  %v499_v58 = vld [vmem:[%s3557_s13 + $0x168] sm:$0xff]  ;;  %v494_v56 = vld [vmem:[%s3557_s13 + $0x140] sm:$0xff] }
  0x5b   : > { %2943 = vmatpush1.bf16.msra.mxu0 %v2942_v54  ;;  %v489_v54 = vld [vmem:[%s3557_s13 + $0x118] sm:$0xff]  ;;  %v2956_v15 = vpack.c.bf16 %v499_v58, %v495_v14  ;;  %v508_v58 = vld [vmem:[%s3557_s13 + $0x1b0] sm:$0xff] }
  0x5c   : > { %3007 = vmatpush1.bf16.msra.mxu1 %v3006_v43  ;;  %2945 = vmatprep.subr.bf16.mxu0 %v2944_v60  ;;  %v493_v43 = vld [vmem:[%s3557_s13 + $0x138] sm:$0xff]  ;;  %v3014_v60 = vpack.c.bf16 %v484_v47, %v480_v62  ;;  %v498_v62 = vld [vmem:[%s3557_s13 + $0x160] sm:$0xff] }
  0x5d   : > { %3009 = vmatprep.subr.bf16.mxu1 %v3008_v48  ;;  %v488_v48 = vld [vmem:[%s3557_s13 + $0x110] sm:$0xff]  ;;  %v3016_v50 = vpack.c.bf16 %v493_v43, %v489_v54  ;;  %v503_v54 = vld [vmem:[%s3557_s13 + $0x188] sm:$0xff] }
  0x5e   : > { %v507_v43 = vld [vmem:[%s3557_s13 + $0x1a8] sm:$0xff] }
  0x5f   : > { %2947 = vmatpush1.bf16.msra.mxu0 %v2946_v19  ;;  %v497_v19 = vld [vmem:[%s3557_s13 + $0x158] sm:$0xff]  ;;  %v2960_v30 = vpack.c.bf16 %v507_v43, %v503_v54 }
  0x60   : > { %3011 = vmatpush1.bf16.msra.mxu1 %v3010_v25  ;;  %2949 = vmatprep.subr.bf16.mxu0 %v2948_v36  ;;  %v501_v25 = vld [vmem:[%s3557_s13 + $0x178] sm:$0xff]  ;;  %v3018_v36 = vpack.c.bf16 %v492_v5, %v488_v48  ;;  %v502_v48 = vld [vmem:[%s3557_s13 + $0x180] sm:$0xff]  ;;  %v504_v5 = vld [vmem:[%s3557_s13 + $0x190] sm:$0xff] }
  0x61   : > { %3013 = vmatprep.subr.bf16.mxu1 %v3012_v24  ;;  %v496_v24 = vld [vmem:[%s3557_s13 + $0x150] sm:$0xff]  ;;  %v3020_v47 = vpack.c.bf16 %v501_v25, %v497_v19  ;;  %v511_v19 = vld [vmem:[%s3557_s13 + $0x1c8] sm:$0xff]  ;;  %v3026_v54 = vpack.c.bf16 %v508_v58, %v504_v5  ;;  %v529_v58 = vld [vmem:[%s3557_s13 + $0x258] sm:$0xff] }
  0x62   : > { %v3022_v42 = vpack.c.bf16 %v500_v38, %v496_v24  ;;  %v515_v25 = vld [vmem:[%s3557_s13 + $0x1e8] sm:$0xff]  ;;  %v512_v24 = vld [vmem:[%s3557_s13 + $0x1d0] sm:$0xff] }
  0x63   : > { %2951 = vmatpush1.bf16.msra.mxu0 %v2950_v23  ;;  %v505_v23 = vld [vmem:[%s3557_s13 + $0x198] sm:$0xff]  ;;  %v516_v38 = vld [vmem:[%s3557_s13 + $0x1f0] sm:$0xff]  ;;  %v2964_v43 = vpack.c.bf16 %v515_v25, %v511_v19 }
  0x64   : > { %3015 = vmatpush1.bf16.msra.mxu1 %v3014_v60  ;;  %2953 = vmatprep.subr.bf16.mxu0 %v2952_v11  ;;  %v509_v60 = vld [vmem:[%s3557_s13 + $0x1b8] sm:$0xff]  ;;  %v2958_v11 = vpack.c.bf16 %v498_v62, %v494_v56  ;;  %v514_v56 = vld [vmem:[%s3557_s13 + $0x1e0] sm:$0xff] }
  0x65   : > { %3017 = vmatprep.subr.bf16.mxu1 %v3016_v50  ;;  %v506_v50 = vld [vmem:[%s3557_s13 + $0x1a0] sm:$0xff]  ;;  %v3024_v14 = vpack.c.bf16 %v509_v60, %v505_v23  ;;  %v523_v23 = vld [vmem:[%s3557_s13 + $0x228] sm:$0xff]  ;;  %v521_v60 = vld [vmem:[%s3557_s13 + $0x218] sm:$0xff] }
  0x66   : > { %v2962_v62 = vpack.c.bf16 %v506_v50, %v502_v48  ;;  %v522_v48 = vld [vmem:[%s3557_s13 + $0x220] sm:$0xff]  ;;  %v3032_v5 = vpack.c.bf16 %v525_v57, %v521_v60  ;;  %v533_v19 = vld [vmem:[%s3557_s13 + $0x278] sm:$0xff]  ;;  %v536_v60 = vld [vmem:[%s3557_s13 + $0x290] sm:$0xff] }
  0x67   : > { %2955 = vmatpush1.bf16.msra.mxu0 %v2954_v1  ;;  %v510_v1 = vld [vmem:[%s3557_s13 + $0x1c0] sm:$0xff]  ;;  %v3036_v57 = vpack.c.bf16 %v533_v19, %v529_v58 }
  0x68   : > { %3019 = vmatpush1.bf16.msra.mxu1 %v3018_v36  ;;  %2957 = vmatprep.subr.bf16.mxu0 %v2956_v15  ;;  %v513_v36 = vld [vmem:[%s3557_s13 + $0x1d8] sm:$0xff]  ;;  %v2966_v50 = vpack.c.bf16 %v514_v56, %v510_v1  ;;  %v3034_v1 = vpack.c.bf16 %v524_v39, %v520_v44 }
  0x69   : > { %3021 = vmatprep.subr.bf16.mxu1 %v3020_v47  ;;  %v517_v15 = vld [vmem:[%s3557_s13 + $0x1f8] sm:$0xff]  ;;  %v519_v47 = vld [vmem:[%s3557_s13 + $0x208] sm:$0xff] }
  0x6a   : > { %v3028_v52 = vpack.c.bf16 %v517_v15, %v513_v36  ;;  %v526_v36 = vld [vmem:[%s3557_s13 + $0x240] sm:$0xff] }
  0x6b   : > { %2959 = vmatpush1.bf16.msra.mxu0 %v2958_v11  ;;  %v518_v11 = vld [vmem:[%s3557_s13 + $0x200] sm:$0xff] }
  0x6c   : > { %3023 = vmatpush1.bf16.msra.mxu1 %v3022_v42  ;;  %2961 = vmatprep.subr.bf16.mxu0 %v2960_v30  ;;  %v3030_v42 = vpack.c.bf16 %v516_v38, %v512_v24  ;;  %v2968_v30 = vpack.c.bf16 %v523_v23, %v519_v47  ;;  %v2970_v25 = vpack.c.bf16 %v522_v48, %v518_v11  ;;  %v530_v15 = vld [vmem:[%s3557_s13 + $0x260] sm:$0xff]  ;;  %v535_v24 = vld [vmem:[%s3557_s13 + $0x288] sm:$0xff]  ;;  %v537_v47 = vld [vmem:[%s3557_s13 + $0x298] sm:$0xff] }
  0x6d   : > { %3025 = vmatprep.subr.bf16.mxu1 %v3024_v14  ;;  %v531_v14 = vld [vmem:[%s3557_s13 + $0x268] sm:$0xff]  ;;  %v538_v23 = vld [vmem:[%s3557_s13 + $0x2a0] sm:$0xff]  ;;  %v540_v48 = vld [vmem:[%s3557_s13 + $0x2b0] sm:$0xff] }
  0x6e   : > { %v2972_v56 = vpack.c.bf16 %v531_v14, %v527_v35  ;;  %v539_v38 = vld [vmem:[%s3557_s13 + $0x2a8] sm:$0xff]  ;;  %v2974_v35 = vpack.c.bf16 %v530_v15, %v526_v36  ;;  %v3042_v58 = vpack.c.bf16 %v540_v48, %v536_v60  ;;  %v548_v15 = vld [vmem:[%s3557_s13 + $0x2f0] sm:$0xff]  ;;  %v561_v48 = vld [vmem:[%s3557_s13 + $0x358] sm:$0xff] }
  0x6f   : > { %2963 = vmatpush1.bf16.msra.mxu0 %v2962_v62  ;;  %v532_v62 = vld [vmem:[%s3557_s13 + $0x270] sm:$0xff]  ;;  %v2976_v44 = vpack.c.bf16 %v539_v38, %v535_v24  ;;  %v557_v24 = vld [vmem:[%s3557_s13 + $0x338] sm:$0xff]  ;;  %v559_v60 = vld [vmem:[%s3557_s13 + $0x348] sm:$0xff] }
  0x70   : > { %3027 = vmatpush1.bf16.msra.mxu1 %v3026_v54  ;;  %2965 = vmatprep.subr.bf16.mxu0 %v2964_v43  ;;  %v541_v54 = vld [vmem:[%s3557_s13 + $0x2b8] sm:$0xff]  ;;  %v534_v43 = vld [vmem:[%s3557_s13 + $0x280] sm:$0xff] }
  0x71   : > { %3029 = vmatprep.subr.bf16.mxu1 %v3028_v52  ;;  %v528_v52 = vld [vmem:[%s3557_s13 + $0x250] sm:$0xff]  ;;  %v3040_v11 = vpack.c.bf16 %v541_v54, %v537_v47  ;;  %v2978_v14 = vpack.c.bf16 %v538_v23, %v534_v43 }
  0x72   : > { %v3038_v39 = vpack.c.bf16 %v532_v62, %v528_v52  ;;  %v551_v52 = vld [vmem:[%s3557_s13 + $0x308] sm:$0xff]  ;;  %v553_v62 = vld [vmem:[%s3557_s13 + $0x318] sm:$0xff]  ;;  %v556_v23 = vld [vmem:[%s3557_s13 + $0x330] sm:$0xff] }
  0x73   : > { %2967 = vmatpush1.bf16.msra.mxu0 %v2966_v50  ;;  %v543_v50 = vld [vmem:[%s3557_s13 + $0x2c8] sm:$0xff]  ;;  %v3048_v43 = vpack.c.bf16 %v557_v24, %v553_v62 }
  0x74   : > { %3031 = vmatpush1.bf16.msra.mxu1 %v3030_v42  ;;  %2969 = vmatprep.subr.bf16.mxu0 %v2968_v30  ;;  %v547_v42 = vld [vmem:[%s3557_s13 + $0x2e8] sm:$0xff]  ;;  %v545_v30 = vld [vmem:[%s3557_s13 + $0x2d8] sm:$0xff] }
  0x75   : > { %3033 = vmatprep.subr.bf16.mxu1 %v3032_v5  ;;  %v549_v5 = vld [vmem:[%s3557_s13 + $0x2f8] sm:$0xff]  ;;  %v2980_v19 = vpack.c.bf16 %v547_v42, %v543_v50 }
  0x76   : > { %v3044_v36 = vpack.c.bf16 %v549_v5, %v545_v30  ;;  %v565_v50 = vld [vmem:[%s3557_s13 + $0x378] sm:$0xff] }
  0x77   : > { %2971 = vmatpush1.bf16.msra.mxu0 %v2970_v25  ;;  %v542_v25 = vld [vmem:[%s3557_s13 + $0x2c0] sm:$0xff] }
  0x78   : > { %3035 = vmatpush1.bf16.msra.mxu1 %v3034_v1  ;;  %2973 = vmatprep.subr.bf16.mxu0 %v2972_v56  ;;  %v546_v1 = vld [vmem:[%s3557_s13 + $0x2e0] sm:$0xff]  ;;  %v544_v56 = vld [vmem:[%s3557_s13 + $0x2d0] sm:$0xff] }
  0x79   : > { %3037 = vmatprep.subr.bf16.mxu1 %v3036_v57  ;;  %v555_v57 = vld [vmem:[%s3557_s13 + $0x328] sm:$0xff]  ;;  %v2982_v38 = vpack.c.bf16 %v546_v1, %v542_v25  ;;  %v3046_v47 = vpack.c.bf16 %v548_v15, %v544_v56  ;;  %v3052_v25 = vpack.c.bf16 %v565_v50, %v561_v48  ;;  %v564_v1 = vld [vmem:[%s3557_s13 + $0x370] sm:$0xff]  ;;  %v569_v15 = vld [vmem:[%s3557_s13 + $0x398] sm:$0xff] }
  0x7a   : > { %v2984_v54 = vpack.c.bf16 %v555_v57, %v551_v52  ;;  %v567_v56 = vld [vmem:[%s3557_s13 + $0x388] sm:$0xff]  ;;  %v573_v52 = vld [vmem:[%s3557_s13 + $0x3b8] sm:$0xff] }
  0x7b   : > { %2975 = vmatpush1.bf16.msra.mxu0 %v2974_v35  ;;  %v550_v35 = vld [vmem:[%s3557_s13 + $0x300] sm:$0xff] }
  0x7c   : > { %3039 = vmatpush1.bf16.msra.mxu1 %v3038_v39  ;;  %2977 = vmatprep.subr.bf16.mxu0 %v2976_v44  ;;  %v554_v39 = vld [vmem:[%s3557_s13 + $0x320] sm:$0xff]  ;;  %v552_v44 = vld [vmem:[%s3557_s13 + $0x310] sm:$0xff] }
  0x7d   : > { %3041 = vmatprep.subr.bf16.mxu1 %v3040_v11  ;;  %v563_v11 = vld [vmem:[%s3557_s13 + $0x368] sm:$0xff]  ;;  %v2986_v42 = vpack.c.bf16 %v554_v39, %v550_v35  ;;  %v3050_v30 = vpack.c.bf16 %v556_v23, %v552_v44  ;;  %v3056_v35 = vpack.c.bf16 %v573_v52, %v569_v15  ;;  %v572_v39 = vld [vmem:[%s3557_s13 + $0x3b0] sm:$0xff]  ;;  %v577_v23 = vld [vmem:[%s3557_s13 + $0x3d8] sm:$0xff]  ;;  %v3191_v15 = vmov 0.0|0.0  }
  0x7e   : > { %v2988_v5 = vpack.c.bf16 %v563_v11, %v559_v60  ;;  %v575_v44 = vld [vmem:[%s3557_s13 + $0x3c8] sm:$0xff]  ;;  %v581_v60 = vld [vmem:[%s3557_s13 + $0x3f8] sm:$0xff]  ;;  %v895_v52 = vld [vmem:[%s4993_s2 + $0x10] sm:$0xff] }
  0x7f   : > { %2979 = vmatpush1.bf16.msra.mxu0 %v2978_v14  ;;  %v558_v14 = vld [vmem:[%s3557_s13 + $0x340] sm:$0xff] }
  0x80   : > { %3043 = vmatpush1.bf16.msra.mxu1 %v3042_v58  ;;  %2981 = vmatprep.subr.bf16.mxu0 %v2980_v19  ;;  %v562_v58 = vld [vmem:[%s3557_s13 + $0x360] sm:$0xff]  ;;  %v560_v19 = vld [vmem:[%s3557_s13 + $0x350] sm:$0xff] }
  0x81   : > { %3045 = vmatprep.subr.bf16.mxu1 %v3044_v36  ;;  %v571_v36 = vld [vmem:[%s3557_s13 + $0x3a8] sm:$0xff]  ;;  %v2990_v57 = vpack.c.bf16 %v562_v58, %v558_v14  ;;  %v3054_v62 = vpack.c.bf16 %v564_v1, %v560_v19  ;;  %v576_v14 = vld [vmem:[%s3557_s13 + $0x3d0] sm:$0xff]  ;;  %v893_v1 = vld [vmem:[%s4993_s2] sm:$0xff] }
  0x82   : > { %v2992_v24 = vpack.c.bf16 %v571_v36, %v567_v56  ;;  %v580_v58 = vld [vmem:[%s3557_s13 + $0x3f0] sm:$0xff]  ;;  %v894_v56 = vld [vmem:[%s4993_s2 + $0x8] sm:$0xff] }
  0x83   : > { %2983 = vmatpush1.bf16.msra.mxu0 %v2982_v38  ;;  %v566_v38 = vld [vmem:[%s3557_s13 + $0x380] sm:$0xff]  ;;  %v3065_v36 = vpack.c.bf16 %v894_v56, %v893_v1  ;;  %v989_v56 = vld [vmem:[%s4995_s4 + $0x10] sm:$0xff] }
  0x84   : > { %3047 = vmatpush1.bf16.msra.mxu1 %v3046_v47  ;;  %2985 = vmatprep.subr.bf16.mxu0 %v2984_v54  ;;  %v570_v47 = vld [vmem:[%s3557_s13 + $0x3a0] sm:$0xff]  ;;  %v568_v54 = vld [vmem:[%s3557_s13 + $0x390] sm:$0xff] }
  0x85   : > { %3049 = vmatprep.subr.bf16.mxu1 %v3048_v43  ;;  %v579_v43 = vld [vmem:[%s3557_s13 + $0x3e8] sm:$0xff]  ;;  %v2994_v11 = vpack.c.bf16 %v570_v47, %v566_v38  ;;  %v3058_v48 = vpack.c.bf16 %v572_v39, %v568_v54  ;;  %v900_v54 = vld [vmem:[%s4993_s2 + $0x38] sm:$0xff]  ;;  %v901_v39 = vld [vmem:[%s4993_s2 + $0x40] sm:$0xff] }
  0x86   : > { %v2996_v50 = vpack.c.bf16 %v579_v43, %v575_v44  ;;  %v898_v38 = vld [vmem:[%s4993_s2 + $0x28] sm:$0xff] }
  0x87   : > { %2987 = vmatpush1.bf16.msra.mxu0 %v2986_v42  ;;  %v574_v42 = vld [vmem:[%s3557_s13 + $0x3c0] sm:$0xff]  ;;  %v902_v44 = vld [vmem:[%s4993_s2 + $0x48] sm:$0xff] }
  0x88   : > { %3051 = vmatpush1.bf16.msra.mxu1 %v3050_v30  ;;  %2989 = vmatprep.subr.bf16.mxu0 %v2988_v5  ;;  %v578_v30 = vld [vmem:[%s3557_s13 + $0x3e0] sm:$0xff]  ;;  %v3060_v5 = vpack.c.bf16 %v581_v60, %v577_v23  ;;  %v3077_v43 = vpack.c.bf16 %v902_v44, %v901_v39  ;;  %v903_v23 = vld [vmem:[%s4993_s2 + $0x50] sm:$0xff]  ;;  %v904_v60 = vld [vmem:[%s4993_s2 + $0x58] sm:$0xff] }
  0x89   : > { %3053 = vmatprep.subr.bf16.mxu1 %v3052_v25  ;;  %v2998_v19 = vpack.c.bf16 %v578_v30, %v574_v42  ;;  %v3062_v25 = vpack.c.bf16 %v580_v58, %v576_v14  ;;  %v907_v30 = vld [vmem:[%s4993_s2 + $0x70] sm:$0xff]  ;;  %v3193_v58 = vmov 0.0   ;;  %v998_v44 = vld [vmem:[%s4995_s4 + $0x58] sm:$0xff] }
  0x8a   : > { %v997_v39 = vld [vmem:[%s4995_s4 + $0x50] sm:$0xff] }
  0x8b   : > { %2991 = vmatpush1.bf16.msra.mxu0 %v2990_v57  ;;  %v896_v57 = vld [vmem:[%s4993_s2 + $0x18] sm:$0xff] }
  0x8c   : > { %3055 = vmatpush1.bf16.msra.mxu1 %v3054_v62  ;;  %2993 = vmatprep.subr.bf16.mxu0 %v2992_v24  ;;  %v3068_v62 = vpack.c.bf16 %v896_v57, %v895_v52  ;;  %v897_v24 = vld [vmem:[%s4993_s2 + $0x20] sm:$0xff]  ;;  %v992_v57 = vld [vmem:[%s4995_s4 + $0x28] sm:$0xff] }
  0x8d   : > { %3057 = vmatprep.subr.bf16.mxu1 %v3056_v35  ;;  %v3071_v47 = vpack.c.bf16 %v898_v38, %v897_v24  ;;  %v991_v52 = vld [vmem:[%s4995_s4 + $0x20] sm:$0xff]  ;;  %v993_v24 = vld [vmem:[%s4995_s4 + $0x30] sm:$0xff]  ;;  %v994_v38 = vld [vmem:[%s4995_s4 + $0x38] sm:$0xff] }
  0x8f   : > { %2995 = vmatpush1.bf16.msra.mxu0 %v2994_v11  ;;  %v3080_v11 = vpack.c.bf16 %v904_v60, %v903_v23  ;;  %v999_v23 = vld [vmem:[%s4995_s4 + $0x60] sm:$0xff]  ;;  %v1000_v60 = vld [vmem:[%s4995_s4 + $0x68] sm:$0xff] }
  0x90   : > { %3059 = vmatpush1.bf16.msra.mxu1 %v3058_v48  ;;  %2997 = vmatprep.subr.bf16.mxu0 %v2996_v50  ;;  %v905_v48 = vld [vmem:[%s4993_s2 + $0x60] sm:$0xff]  ;;  %v906_v50 = vld [vmem:[%s4993_s2 + $0x68] sm:$0xff] }
  0x91   : > { %3061 = vmatprep.subr.bf16.mxu1 %v3060_v5  ;;  %v3083_v42 = vpack.c.bf16 %v906_v50, %v905_v48  ;;  %v908_v5 = vld [vmem:[%s4993_s2 + $0x78] sm:$0xff]  ;;  %v1001_v48 = vld [vmem:[%s4995_s4 + $0x70] sm:$0xff] }
  0x92   : > { %v3086_v14 = vpack.c.bf16 %v908_v5, %v907_v30  ;;  %v1002_v50 = vld [vmem:[%s4995_s4 + $0x78] sm:$0xff]  ;;  %v3194_v30 = vmov 0   ;;  %v3836_v5 = vld [vmem:[%s4997_s6 + $0x10] sm:$0xff] }
  0x93   : > { %2999 = vmatpush1.bf16.msra.mxu0 %v2998_v19  ;;  %v987_v19 = vld [vmem:[%s4995_s4] sm:$0xff]  ;;  %3127 = vset.pattern.permute.xlu1 %v3194_v30 }
  0x94   : > { %3063 = vmatpush1.bf16.msra.mxu1 %v3062_v25  ;;  %3064 = vmatprep.subr.bf16.mxu0 %v3191_v15  ;;  %v988_v25 = vld [vmem:[%s4995_s4 + $0x8] sm:$0xff] }
  0x95   : > { %3088 = vmatprep.subr.bf16.mxu1 %v3191_v15  ;;  %v3089_v1 = vpack.c.bf16 %v988_v25, %v987_v19  ;;  %3126 = vset.pattern.permute.xlu0 %v3194_v30  ;;  %v3866_v19 = vld [vmem:[%s4997_s6 + $0x20] sm:$0xff]  ;;  %v3872_v25 = vld [vmem:[%s4997_s6 + $0x38] sm:$0xff] }
  0x96   : > { %789 = vmatmul.mubr.f32.vlgmr.msra.gmra.mrb[2].mxu0 %v5080_v7  ;;  %1236 = vperm.xlu1 %3127, %v3836_v5   ;;  %v4125_v30 = vld [vmem:[%s4998_s7 + $0x34] ss:$8 sps:$4 sm:$0xff]  }
  0x97   : > { %860 = vmatmul.mubr.f32.vlgmr.msra.gmra.mrb[2].mxu1 %v5080_v7  ;;  %3066 = vmatpush3.bf16.msra.mxu0 %v3065_v36  ;;  %v899_v7 = vld [vmem:[%s4993_s2 + $0x30] sm:$0xff] }
  0x98   : > { %3067 = vmatprep.subr.bf16.mxu0 %v3191_v15  ;;  %v3074_v35 = vpack.c.bf16 %v900_v54, %v899_v7  ;;  %2770 = vmatprep.mubr.msk.f32.mxu0 %vm3192_vm0, %v3193_v58  ;;  %v995_v7 = vld [vmem:[%s4995_s4 + $0x40] sm:$0xff]  ;;  %v996_v54 = vld [vmem:[%s4995_s4 + $0x48] sm:$0xff] }
  0x99   : > { %2805 = vmatprep.mubr.msk.f32.mxu1 %vm3192_vm0, %v3193_v58  ;;  %3090 = vmatpush3.bf16.msra.mxu1 %v3089_v1  ;;  %v3860_v58 = vld [vmem:[%s4997_s6 + $0x28] sm:$0xff]  ;;  %v3878_v1 = vld [vmem:[%s4997_s6 + $0x30] sm:$0xff] }
  0x9a   : > { %3091 = vmatprep.subr.bf16.mxu1 %v3191_v15 }
  0x9b   : > { %3069 = vmatpush3.bf16.msra.mxu0 %v3068_v62  ;;  %v3095_v62 = vpack.c.bf16 %v992_v57, %v991_v52 }
  0x9c   : > { %3070 = vmatprep.subr.bf16.mxu0 %v3191_v15 }
  0x9f   : > { %3072 = vmatpush3.bf16.msra.mxu0 %v3071_v47  ;;  %v3098_v47 = vpack.c.bf16 %v994_v38, %v993_v24 }
  0xa0   : > { %3073 = vmatprep.subr.bf16.mxu0 %v3191_v15 }
  0xa3   : > { %3075 = vmatpush3.bf16.msra.mxu0 %v3074_v35  ;;  %v3101_v35 = vpack.c.bf16 %v996_v54, %v995_v7 }
  0xa4   : > { %3076 = vmatprep.subr.bf16.mxu0 %v3191_v15 }
  0xa7   : > { %3078 = vmatpush3.bf16.msra.mxu0 %v3077_v43  ;;  %v3104_v43 = vpack.c.bf16 %v998_v44, %v997_v39  ;;  %v3908_v39 = vld [vmem:[%s4997_s6 + $0x50] sm:$0xff] }
  0xa8   : > { %3079 = vmatprep.subr.bf16.mxu0 %v3191_v15 }
  0xab   : > { %3081 = vmatpush3.bf16.msra.mxu0 %v3080_v11  ;;  %v3107_v11 = vpack.c.bf16 %v1000_v60, %v999_v23  ;;  %v3916_v23 = vld [vmem:[%s4997_s6 + $0x68] sm:$0xff]  ;;  %v3921_v60 = vld [vmem:[%s4997_s6 + $0x60] sm:$0xff] }
  0xac   : > { %3082 = vmatprep.subr.bf16.mxu0 %v3191_v15 }
  0xaf   : > { %3084 = vmatpush3.bf16.msra.mxu0 %v3083_v42  ;;  %v3110_v42 = vpack.c.bf16 %v1002_v50, %v1001_v48  ;;  %v3936_v48 = vld [vmem:[%s4997_s6 + $0x70] sm:$0xff] }
  0xb0   : > { %3085 = vmatprep.subr.bf16.mxu0 %v3191_v15  ;;  %v5083_v50 = vld [vmem:[#allocation4_spill] sm:$0xff] }
  0xb3   : > { %3087 = vmatpush3.bf16.msra.mxu0 %v3086_v14  ;;  %v3854_v14 = vld [vmem:[%s4997_s6 + $0x8] sm:$0xff] }
  0xb4   : > { %1688 = vmatprep.subr.bf16.mxu0 %v3262_v4  ;;  %v990_v4 = vld [vmem:[%s4995_s4 + $0x18] sm:$0xff] }
  0xb5   : > { %v3092_v36 = vpack.c.bf16 %v990_v4, %v989_v56  ;;  %v3884_v56 = vld [vmem:[%s4997_s6 + $0x48] sm:$0xff] }
  0xb7   : > { %3093 = vmatpush3.bf16.msra.mxu1 %v3092_v36  ;;  %v3890_v36 = vld [vmem:[%s4997_s6 + $0x40] sm:$0xff] }
  0xb8   : > { %3094 = vmatprep.subr.bf16.mxu1 %v3191_v15 }
  0xbb   : > { %3096 = vmatpush3.bf16.msra.mxu1 %v3095_v62  ;;  %v3896_v62 = vld [vmem:[%s4997_s6 + $0x58] sm:$0xff] }
  0xbc   : > { %3097 = vmatprep.subr.bf16.mxu1 %v3191_v15 }
  0xbf   : > { %3099 = vmatpush3.bf16.msra.mxu1 %v3098_v47 }
  0xc0   : > { %3100 = vmatprep.subr.bf16.mxu1 %v3191_v15 }
  0xc3   : > { %3102 = vmatpush3.bf16.msra.mxu1 %v3101_v35  ;;  %v3902_v35 = vld [vmem:[%s4998_s7 + $0x4] ss:$8 sps:$4 sm:$0xff]  }
  0xc4   : > { %3103 = vmatprep.subr.bf16.mxu1 %v3191_v15 }
  0xc7   : > { %3105 = vmatpush3.bf16.msra.mxu1 %v3104_v43 }
  0xc8   : > { %3106 = vmatprep.subr.bf16.mxu1 %v3191_v15 }
  0xcb   : > { %3108 = vmatpush3.bf16.msra.mxu1 %v3107_v11  ;;  %v3931_v11 = vld [vmem:[%s4997_s6 + $0x78] sm:$0xff] }
  0xcc   : > { %3109 = vmatprep.subr.bf16.mxu1 %v3191_v15  ;;  %v3842_v15 = vld [vmem:[%s4997_s6] sm:$0xff] }
  0xcd   : > { %1226 = vperm.xlu0 %3126, %v3842_v15  }
  0xcf   : > { %3111 = vmatpush3.bf16.msra.mxu1 %v3110_v42  ;;  %v5084_v42 = vld [vmem:[#allocation5_spill] sm:$0xff] }
  0xd0   : > { %1881 = vmatprep.subr.bf16.mxu1 %v3269_v9  ;;  %v3848_v9 = vld [vmem:[%s4997_s6 + $0x18] sm:$0xff] }
  0xd1   : > { %1241 = vperm.xlu1 %3127, %v3848_v9   ;;  %1231 = vperm.xlu0 %3126, %v3854_v14  }
  0xd5   : > { %1251 = vperm.xlu1 %3127, %v3860_v58   ;;  %1246 = vperm.xlu0 %3126, %v3866_v19  }
  0xd9   : > { %1261 = vperm.xlu1 %3127, %v3872_v25   ;;  %1256 = vperm.xlu0 %3126, %v3878_v1  }
  0xdd   : > { %1271 = vperm.xlu1 %3127, %v3884_v56   ;;  %1266 = vperm.xlu0 %3126, %v3890_v36  }
  0xe1   : > { %1281 = vperm.xlu1 %3127, %v3896_v62   ;;  %1276 = vperm.xlu0 %3126, %v3908_v39  }
  0xe5   : > { %1291 = vperm.xlu1 %3127, %v3916_v23   ;;  %1286 = vperm.xlu0 %3126, %v3921_v60  }
  0xe9   : > { %1301 = vperm.xlu1 %3127, %v3931_v11   ;;  %1296 = vperm.xlu0 %3126, %v3936_v48  }
 0x129   : > { %v648_v4 = vpop.f32.mrb[0].mxu0 }
 0x12a   : > { %v650_v52 = vpop.f32.mrb[1].mxu0  ;;  %v719_v57 = vpop.f32.mrb[0].mxu1 }
 0x12b   : > { %v867_v24 = vrot.slane %v650_v52, 7  ;;  %v870_v38 = vrot.slane %v719_v57, 6  ;;  %v721_v47 = vpop.f32.mrb[1].mxu1  ;;  %v4165_v52 = vld [vmem:[%s4998_s7 + $0x54] ss:$8 sps:$4 sm:$0xff]   ;;  %v5093_v57 = vld [vmem:[#allocation14_spill] sm:$0xff] }
 0x12c   : > { %v873_v7 = vrot.slane %v721_v47, 5  ;;  %v5096_v47 = vld [vmem:[#allocation17_spill] sm:$0xff] }
 0x12d   : > { %v876_v54 = vsel %vm875_vm1, %v648_v4, %v867_v24  ;;  %v4159_v4 = vld [vmem:[%s4998_s7 + $0x40] ss:$8 sps:$4 sm:$0xff]   ;;  %v5095_v24 = vld [vmem:[#allocation16_spill] sm:$0xff] }
 0x12e   : > { %v878_v44 = vsel %vm877_vm2, %v876_v54, %v870_v38  ;;  %v3147_v38 = vld [vmem:[%s4998_s7 + $0x50] ss:$8 sps:$4 sm:$0xff]   ;;  %v5097_v54 = vld [vmem:[#allocation18_spill] sm:$0xff] }
 0x12f   : > { %v880_v43 = vsel %vm879_vm3, %v878_v44, %v873_v7  ;;  %v3148_v7 = vld [vmem:[%s4998_s7 + $0x64] ss:$8 sps:$4 sm:$0xff]   ;;  %v3150_v44 = vld [vmem:[%s4998_s7 + $0x60] ss:$8 sps:$4 sm:$0xff]  }
 0x130   : > { %2771 = vmatmul.mubr.f32.vlgmr.msra.gmra.mrb[4].mxu0 %v880_v43  ;;  %v5100_v43 = vld [vmem:[#allocation21_spill] sm:$0xff] }
 0x131   : > { %1689 = vmatpush1.bf16.msra.mxu0 %v3267_v8  ;;  %1720 = vmatprep.mubr.bf16.mxu0 %v3902_v35  ;;  %v3945_v8 = vld [vmem:[%s4997_s6 + $0x88] sm:$0xff] }
 0x132   : > { %1690 = vmatprep.subr.bf16.mxu0 %v3282_v17  ;;  %v3950_v17 = vld [vmem:[%s4997_s6 + $0x80] sm:$0xff]  ;;  %1311 = vperm.xlu1 %3127, %v3945_v8  }
 0x133   : > { %1306 = vperm.xlu0 %3126, %v3950_v17  }
 0x135   : > { %1691 = vmatpush1.bf16.msra.mxu0 %v3284_v18  ;;  %v3959_v18 = vld [vmem:[%s4997_s6 + $0x98] sm:$0xff] }
 0x136   : > { %1692 = vmatprep.subr.bf16.mxu0 %v3298_v27  ;;  %v3964_v27 = vld [vmem:[%s4997_s6 + $0x90] sm:$0xff]  ;;  %1321 = vperm.xlu1 %3127, %v3959_v18  }
 0x137   : > { %1316 = vperm.xlu0 %3126, %v3964_v27  }
 0x139   : > { %1693 = vmatpush1.bf16.msra.mxu0 %v3308_v34  ;;  %v3973_v34 = vld [vmem:[%s4997_s6 + $0xa8] sm:$0xff] }
 0x13a   : > { %1694 = vmatprep.subr.bf16.mxu0 %v3319_v40  ;;  %v3978_v40 = vld [vmem:[%s4997_s6 + $0xa0] sm:$0xff]  ;;  %1331 = vperm.xlu1 %3127, %v3973_v34  }
 0x13b   : > { %1326 = vperm.xlu0 %3126, %v3978_v40  }
 0x13d   : > { %1695 = vmatpush1.bf16.msra.mxu0 %v3332_v49  ;;  %v3987_v49 = vld [vmem:[%s4997_s6 + $0xb8] sm:$0xff] }
 0x13e   : > { %1696 = vmatprep.subr.bf16.mxu0 %v3340_v53  ;;  %v3992_v53 = vld [vmem:[%s4997_s6 + $0xb0] sm:$0xff]  ;;  %1341 = vperm.xlu1 %3127, %v3987_v49  }
 0x13f   : > { %1336 = vperm.xlu0 %3126, %v3992_v53  }
 0x141   : > { %1697 = vmatpush1.bf16.msra.mxu0 %v3354_v63  ;;  %v4001_v63 = vld [vmem:[%s4997_s6 + $0xc8] sm:$0xff] }
 0x142   : > { %1698 = vmatprep.subr.bf16.mxu0 %v3360_v2  ;;  %v4006_v2 = vld [vmem:[%s4997_s6 + $0xc0] sm:$0xff]  ;;  %1351 = vperm.xlu1 %3127, %v4001_v63  }
 0x143   : > { %1346 = vperm.xlu0 %3126, %v4006_v2  }
 0x145   : > { %1699 = vmatpush1.bf16.msra.mxu0 %v3374_v16  ;;  %v4015_v16 = vld [vmem:[%s4997_s6 + $0xd8] sm:$0xff] }
 0x146   : > { %1700 = vmatprep.subr.bf16.mxu0 %v3380_v20  ;;  %v4020_v20 = vld [vmem:[%s4997_s6 + $0xd0] sm:$0xff]  ;;  %1361 = vperm.xlu1 %3127, %v4015_v16  }
 0x147   : > { %1356 = vperm.xlu0 %3126, %v4020_v20  }
 0x149   : > { %1701 = vmatpush1.bf16.msra.mxu0 %v3394_v33  ;;  %v4029_v33 = vld [vmem:[%s4997_s6 + $0xe8] sm:$0xff] }
 0x14a   : > { %1702 = vmatprep.subr.bf16.mxu0 %v3400_v37  ;;  %v4034_v37 = vld [vmem:[%s4997_s6 + $0xe0] sm:$0xff]  ;;  %1371 = vperm.xlu1 %3127, %v4029_v33  }
 0x14b   : > { %1366 = vperm.xlu0 %3126, %v4034_v37  }
 0x14d   : > { %1703 = vmatpush1.bf16.msra.mxu0 %v3414_v51  ;;  %v4043_v51 = vld [vmem:[%s4997_s6 + $0xf8] sm:$0xff] }
 0x14e   : > { %1704 = vmatprep.subr.bf16.mxu0 %v3420_v55  ;;  %v4048_v55 = vld [vmem:[%s4997_s6 + $0xf0] sm:$0xff]  ;;  %1381 = vperm.xlu1 %3127, %v4043_v51  }
 0x14f   : > { %1376 = vperm.xlu0 %3126, %v4048_v55  }
 0x151   : > { %1705 = vmatpush1.bf16.msra.mxu0 %v3434_v10  ;;  %v3195_v10 = vmov 1  }
 0x152   : > { %1706 = vmatprep.subr.bf16.mxu0 %v3440_v12  ;;  %3129 = vset.pattern.permute.xlu1 %v3195_v10 }
 0x153   : > { %2079 = vperm.xlu1 %3129, %v3854_v14   ;;  %3128 = vset.pattern.permute.xlu0 %v3195_v10  ;;  %v4139_v14 = vld [vmem:[%s4998_s7 + $0x30] ss:$8 sps:$4 sm:$0xff]   ;;  %v3169_v10 = vld [vmem:[%s4998_s7 + $0xd4] ss:$8 sps:$4 sm:$0xff]  }
 0x154   : > { %2075 = vperm.xlu0 %3128, %v3842_v15   ;;  %v5086_v15 = vld [vmem:[#allocation7_spill] sm:$0xff] }
 0x155   : > { %1707 = vmatpush1.bf16.msra.mxu0 %v3454_v32 }
 0x156   : > { %1708 = vmatprep.subr.bf16.mxu0 %v3460_v41 }
 0x157   : > { %2083 = vperm.xlu1 %3129, %v3836_v5   ;;  %v5085_v5 = vld [vmem:[#allocation6_spill] sm:$0xff] }
 0x158   : > { %2087 = vperm.xlu0 %3128, %v3848_v9   ;;  %v5087_v9 = vld [vmem:[#allocation8_spill] sm:$0xff] }
 0x159   : > { %1709 = vmatpush1.bf16.msra.mxu0 %v3474_v61 }
 0x15a   : > { %1710 = vmatprep.subr.bf16.mxu0 %v3480_v3 }
 0x15b   : > { %2091 = vperm.xlu1 %3129, %v3866_v19   ;;  %v4145_v19 = vld [vmem:[%s4998_s7 + $0x44] ss:$8 sps:$4 sm:$0xff]  }
 0x15c   : > { %2095 = vperm.xlu0 %3128, %v3860_v58   ;;  %v5088_v58 = vld [vmem:[#allocation9_spill] sm:$0xff] }
 0x15d   : > { %1711 = vmatpush1.bf16.msra.mxu0 %v3494_v31 }
 0x15e   : > { %1712 = vmatprep.subr.bf16.mxu0 %v3500_v45 }
 0x15f   : > { %2099 = vperm.xlu1 %3129, %v3878_v1   ;;  %v5090_v1 = vld [vmem:[#allocation11_spill] sm:$0xff] }
 0x160   : > { %2103 = vperm.xlu0 %3128, %v3872_v25   ;;  %v5089_v25 = vld [vmem:[#allocation10_spill] sm:$0xff] }
 0x161   : > { %1713 = vmatpush1.bf16.msra.mxu0 %v3514_v21  ;;  %v4076_v21 = vld [vmem:[%s4998_s7] ss:$8 sps:$4 sm:$0xff]  }
 0x162   : > { %1714 = vmatprep.subr.bf16.mxu0 %v3520_v28 }
 0x163   : > { %2107 = vperm.xlu1 %3129, %v3890_v36   ;;  %v5092_v36 = vld [vmem:[#allocation13_spill] sm:$0xff] }
 0x164   : > { %2111 = vperm.xlu0 %3128, %v3884_v56   ;;  %v5091_v56 = vld [vmem:[#allocation12_spill] sm:$0xff] }
 0x165   : > { %1715 = vmatpush1.bf16.msra.mxu0 %v3534_v59  ;;  %v4084_v59 = vld [vmem:[%s4998_s7 + $0x14] ss:$8 sps:$4 sm:$0xff]  }
 0x166   : > { %1716 = vmatprep.subr.bf16.mxu0 %v3540_v6 }
 0x167   : > { %2115 = vperm.xlu1 %3129, %v3908_v39   ;;  %v5099_v39 = vld [vmem:[#allocation20_spill] sm:$0xff] }
 0x168   : > { %2119 = vperm.xlu0 %3128, %v3896_v62   ;;  %v5094_v62 = vld [vmem:[#allocation15_spill] sm:$0xff] }
 0x169   : > { %1717 = vmatpush1.bf16.msra.mxu0 %v3560_v0  ;;  %v790_v12 = vpop.f32.mrb[2].mxu0 }
 0x16a   : > { %v792_v32 = vpop.f32.mrb[3].mxu0  ;;  %v861_v41 = vpop.f32.mrb[2].mxu1  ;;  %1718 = vmatprep.subr.bf16.mxu0 %v3566_v46  ;;  %v4099_v46 = vld [vmem:[%s4998_s7 + $0x10] ss:$8 sps:$4 sm:$0xff]  }
 0x16b   : > { %v882_v61 = vrot.slane %v792_v32, 7  ;;  %v885_v3 = vrot.slane %v861_v41, 6  ;;  %v863_v31 = vpop.f32.mrb[3].mxu1  ;;  %2123 = vperm.xlu1 %3129, %v3921_v60   ;;  %v5101_v60 = vld [vmem:[#allocation22_spill] sm:$0xff] }
 0x16c   : > { %v888_v45 = vrot.slane %v863_v31, 5  ;;  %2127 = vperm.xlu0 %3128, %v3916_v23   ;;  %v3151_v23 = vld [vmem:[%s4998_s7 + $0x74] ss:$8 sps:$4 sm:$0xff]   ;;  %v3172_v32 = vld [vmem:[%s4998_s7 + $0xe4] ss:$8 sps:$4 sm:$0xff]   ;;  %v4265_v31 = vpop.permute.xlu1 %1236 }
 0x16d   : > { %v890_v28 = vsel %vm875_vm1, %v790_v12, %v882_v61  ;;  %1719 = vmatpush1.bf16.msra.mxu0 %v3580_v29  ;;  %v5081_v29 = vld [vmem:[#allocation2_spill] sm:$0xff]  ;;  %v3171_v12 = vld [vmem:[%s4998_s7 + $0xd0] ss:$8 sps:$4 sm:$0xff]   ;;  %v3175_v61 = vld [vmem:[%s4998_s7 + $0xf4] ss:$8 sps:$4 sm:$0xff]  }
 0x16e   : > { %v891_v6 = vsel %vm877_vm2, %v890_v28, %v885_v3  ;;  %v3174_v41 = vld [vmem:[%s4998_s7 + $0xe0] ss:$8 sps:$4 sm:$0xff]   ;;  %v3177_v3 = vld [vmem:[%s4998_s7 + $0xf0] ss:$8 sps:$4 sm:$0xff]  }
 0x16f   : > { %v892_v0 = vsel %vm879_vm3, %v891_v6, %v888_v45  ;;  %2131 = vperm.xlu1 %3129, %v3936_v48   ;;  %v5103_v48 = vld [vmem:[#allocation24_spill] sm:$0xff]  ;;  %v4267_v45 = vpop.permute.xlu0 %1226 }
 0x170   : > { %1721 = vmatmul.mubr.bf16.vlgmr.msra.gmra.mrb[8].mxu0 %v4076_v21  ;;  %2806 = vmatmul.mubr.f32.vlgmr.msra.gmra.mrb[4].mxu1 %v892_v0 }
 0x171   : > { %1882 = vmatpush1.bf16.msra.mxu1 %v3275_v13  ;;  %1730 = vmatprep.mubr.bf16.mxu0 %v4084_v59  ;;  %v4105_v13 = vld [vmem:[%s4998_s7 + $0x24] ss:$8 sps:$4 sm:$0xff]  }
 0x172   : > { %1883 = vmatprep.subr.bf16.mxu1 %v3290_v22  ;;  %1913 = vmatprep.mubr.bf16.mxu1 %v3902_v35  ;;  %v5082_v22 = vld [vmem:[#allocation3_spill] sm:$0xff] }
 0x173   : > { %2135 = vperm.xlu0 %3128, %v3931_v11   ;;  %2139 = vperm.xlu1 %3129, %v3950_v17   ;;  %v5098_v35 = vld [vmem:[#allocation19_spill] sm:$0xff]  ;;  %v5104_v17 = vld [vmem:[#allocation25_spill] sm:$0xff]  ;;  %v4271_v28 = vpop.permute.xlu0 %1231 }
 0x174   : > { %v5102_v11 = vld [vmem:[#allocation23_spill] sm:$0xff] }
 0x175   : > { %1884 = vmatpush1.bf16.msra.mxu1 %v3296_v26  ;;  %v4119_v26 = vld [vmem:[%s4998_s7 + $0x20] ss:$8 sps:$4 sm:$0xff]  }
 0x176   : > { %1885 = vmatprep.subr.bf16.mxu1 %v5081_v29 }
 0x177   : > { %2143 = vperm.xlu0 %3128, %v3945_v8   ;;  %2147 = vperm.xlu1 %3129, %v3964_v27   ;;  %v3153_v8 = vld [vmem:[%s4998_s7 + $0x70] ss:$8 sps:$4 sm:$0xff]   ;;  %v5105_v27 = vld [vmem:[#allocation26_spill] sm:$0xff] }
 0x178   : > { %1731 = vmatmul.mubr.bf16.gmra.mrb[12].mxu0 %v4099_v46 }
 0x179   : > { %1886 = vmatpush1.bf16.msra.mxu1 %v5082_v22  ;;  %1740 = vmatprep.mubr.bf16.mxu0 %v4105_v13 }
 0x17a   : > { %1887 = vmatprep.subr.bf16.mxu1 %v5083_v50 }
 0x17b   : > { %2151 = vperm.xlu0 %3128, %v3959_v18   ;;  %2155 = vperm.xlu1 %3129, %v3978_v40   ;;  %v3154_v18 = vld [vmem:[%s4998_s7 + $0x84] ss:$8 sps:$4 sm:$0xff]   ;;  %v5107_v40 = vld [vmem:[#allocation28_spill] sm:$0xff] }
 0x17d   : > { %1888 = vmatpush1.bf16.msra.mxu1 %v5084_v42 }
 0x17e   : > { %1889 = vmatprep.subr.bf16.mxu1 %v5085_v5 }
 0x17f   : > { %2159 = vperm.xlu0 %3128, %v3973_v34   ;;  %2163 = vperm.xlu1 %3129, %v3992_v53   ;;  %v5106_v34 = vld [vmem:[#allocation27_spill] sm:$0xff]  ;;  %v5108_v53 = vld [vmem:[#allocation29_spill] sm:$0xff] }
 0x180   : > { %1741 = vmatmul.mubr.bf16.gmra.mrb[16].mxu0 %v4119_v26 }
 0x181   : > { %1890 = vmatpush1.bf16.msra.mxu1 %v5086_v15  ;;  %1750 = vmatprep.mubr.bf16.mxu0 %v4125_v30 }
 0x182   : > { %1891 = vmatprep.subr.bf16.mxu1 %v5087_v9 }
 0x183   : > { %2167 = vperm.xlu0 %3128, %v3987_v49   ;;  %2171 = vperm.xlu1 %3129, %v4006_v2   ;;  %v3156_v49 = vld [vmem:[%s4998_s7 + $0x80] ss:$8 sps:$4 sm:$0xff]   ;;  %v3159_v2 = vld [vmem:[%s4998_s7 + $0x90] ss:$8 sps:$4 sm:$0xff]  }
 0x185   : > { %1892 = vmatpush1.bf16.msra.mxu1 %v5088_v58 }
 0x186   : > { %1893 = vmatprep.subr.bf16.mxu1 %v5089_v25 }
 0x187   : > { %2175 = vperm.xlu0 %3128, %v4001_v63   ;;  %2179 = vperm.xlu1 %3129, %v4020_v20   ;;  %v3157_v63 = vld [vmem:[%s4998_s7 + $0x94] ss:$8 sps:$4 sm:$0xff]   ;;  %v3162_v20 = vld [vmem:[%s4998_s7 + $0xa0] ss:$8 sps:$4 sm:$0xff]  }
 0x188   : > { %1751 = vmatmul.mubr.bf16.gmra.mrb[20].mxu0 %v4139_v14 }
 0x189   : > { %1894 = vmatpush1.bf16.msra.mxu1 %v5090_v1  ;;  %1760 = vmatprep.mubr.bf16.mxu0 %v4145_v19 }
 0x18a   : > { %1895 = vmatprep.subr.bf16.mxu1 %v5091_v56 }
 0x18b   : > { %2183 = vperm.xlu0 %3128, %v4015_v16   ;;  %2187 = vperm.xlu1 %3129, %v4034_v37   ;;  %v3160_v16 = vld [vmem:[%s4998_s7 + $0xa4] ss:$8 sps:$4 sm:$0xff]   ;;  %v3165_v37 = vld [vmem:[%s4998_s7 + $0xb0] ss:$8 sps:$4 sm:$0xff]  }
 0x18d   : > { %1896 = vmatpush1.bf16.msra.mxu1 %v5092_v36 }
 0x18e   : > { %1897 = vmatprep.subr.bf16.mxu1 %v5093_v57  ;;  %v2665_v57 = vld [vmem:[%s4996_s5] ss:$0 sm:$0xff] }
 0x18f   : > { %2191 = vperm.xlu0 %3128, %v4029_v33   ;;  %2195 = vperm.xlu1 %3129, %v4048_v55   ;;  %v3163_v33 = vld [vmem:[%s4998_s7 + $0xb4] ss:$8 sps:$4 sm:$0xff]   ;;  %v3168_v55 = vld [vmem:[%s4998_s7 + $0xc0] ss:$8 sps:$4 sm:$0xff]  }
 0x190   : > { %1761 = vmatmul.mubr.bf16.gmra.mrb[24].mxu0 %v4159_v4 }
 0x191   : > { %1898 = vmatpush1.bf16.msra.mxu1 %v5094_v62  ;;  %1770 = vmatprep.mubr.bf16.mxu0 %v4165_v52 }
 0x192   : > { %1899 = vmatprep.subr.bf16.mxu1 %v5095_v24 }
 0x193   : > { %2199 = vperm.xlu0 %3128, %v4043_v51   ;;  %v3166_v51 = vld [vmem:[%s4998_s7 + $0xc4] ss:$8 sps:$4 sm:$0xff]  }
 0x195   : > { %1900 = vmatpush1.bf16.msra.mxu1 %v5096_v47 }
 0x196   : > { %1901 = vmatprep.subr.bf16.mxu1 %v5097_v54 }
 0x198   : > { %1771 = vmatmul.mubr.bf16.gmra.mrb[28].mxu0 %v3147_v38 }
 0x199   : > { %1902 = vmatpush1.bf16.msra.mxu1 %v5098_v35  ;;  %1780 = vmatprep.mubr.bf16.mxu0 %v3148_v7 }
 0x19a   : > { %1903 = vmatprep.subr.bf16.mxu1 %v5099_v39 }
 0x19d   : > { %1904 = vmatpush1.bf16.msra.mxu1 %v5100_v43 }
 0x19e   : > { %1905 = vmatprep.subr.bf16.mxu1 %v5101_v60 }
 0x1a0   : > { %1781 = vmatmul.mubr.bf16.gmra.mrb[32].mxu0 %v3150_v44 }
 0x1a1   : > { %1906 = vmatpush1.bf16.msra.mxu1 %v5102_v11  ;;  %1790 = vmatprep.mubr.bf16.mxu0 %v3151_v23 }
 0x1a2   : > { %1907 = vmatprep.subr.bf16.mxu1 %v5103_v48 }
 0x1a5   : > { %1908 = vmatpush1.bf16.msra.mxu1 %v5104_v17 }
 0x1a6   : > { %1909 = vmatprep.subr.bf16.mxu1 %v5105_v27 }
 0x1a8   : > { %1791 = vmatmul.mubr.bf16.gmra.mrb[36].mxu0 %v3153_v8 }
 0x1a9   : > { %1910 = vmatpush1.bf16.msra.mxu1 %v5106_v34  ;;  %1800 = vmatprep.mubr.bf16.mxu0 %v3154_v18 }
 0x1aa   : > { %1911 = vmatprep.subr.bf16.mxu1 %v5107_v40 }
 0x1ad   : > { %1912 = vmatpush1.bf16.msra.mxu1 %v5108_v53 }
 0x1b0   : > { %1801 = vmatmul.mubr.bf16.gmra.mrb[40].mxu0 %v3156_v49  ;;  %1914 = vmatmul.mubr.bf16.vlgmr.msra.gmra.mrb[8].mxu1 %v4076_v21  ;;  %v4269_v21 = vpop.permute.xlu1 %1241 }
 0x1b1   : > { %1810 = vmatprep.mubr.bf16.mxu0 %v3157_v63  ;;  %1923 = vmatprep.mubr.bf16.mxu1 %v4084_v59 }
 0x1b4   : > { %v4273_v0 = vpop.permute.xlu1 %1251 }
 0x1b8   : > { %1811 = vmatmul.mubr.bf16.gmra.mrb[44].mxu0 %v3159_v2  ;;  %1924 = vmatmul.mubr.bf16.gmra.mrb[12].mxu1 %v4099_v46  ;;  %v4275_v46 = vpop.permute.xlu0 %1246 }
 0x1b9   : > { %1820 = vmatprep.mubr.bf16.mxu0 %v3160_v16  ;;  %1933 = vmatprep.mubr.bf16.mxu1 %v4105_v13  ;;  %v4277_v13 = vpop.permute.xlu1 %1261 }
 0x1bc   : > { %v4279_v29 = vpop.permute.xlu0 %1256 }
 0x1bd   : > { %v4281_v22 = vpop.permute.xlu1 %1271 }
 0x1c0   : > { %1821 = vmatmul.mubr.bf16.gmra.mrb[48].mxu0 %v3162_v20  ;;  %1934 = vmatmul.mubr.bf16.gmra.mrb[16].mxu1 %v4119_v26  ;;  %v4283_v50 = vpop.permute.xlu0 %1266 }
 0x1c1   : > { %1830 = vmatprep.mubr.bf16.mxu0 %v3163_v33  ;;  %1943 = vmatprep.mubr.bf16.mxu1 %v4125_v30  ;;  %v4285_v26 = vpop.permute.xlu1 %1281 }
 0x1c4   : > { %v4287_v42 = vpop.permute.xlu0 %1276 }
 0x1c5   : > { %v4289_v30 = vpop.permute.xlu1 %1291 }
 0x1c8   : > { %1831 = vmatmul.mubr.bf16.gmra.mrb[52].mxu0 %v3165_v37  ;;  %1944 = vmatmul.mubr.bf16.gmra.mrb[20].mxu1 %v4139_v14  ;;  %v4291_v5 = vpop.permute.xlu0 %1286 }
 0x1c9   : > { %1840 = vmatprep.mubr.bf16.mxu0 %v3166_v51  ;;  %1953 = vmatprep.mubr.bf16.mxu1 %v4145_v19  ;;  %v4293_v15 = vpop.permute.xlu1 %1301 }
 0x1cc   : > { %v4295_v9 = vpop.permute.xlu0 %1296 }
 0x1cd   : > { %v4297_v14 = vpop.permute.xlu1 %1311 }
 0x1ce   : > { %5109 = vst [vmem:[#allocation2_spill] sm:$0xff] %v4297_v14 }
 0x1d0   : > { %1841 = vmatmul.mubr.bf16.gmra.mrb[56].mxu0 %v3168_v55  ;;  %1954 = vmatmul.mubr.bf16.gmra.mrb[24].mxu1 %v4159_v4  ;;  %v4299_v58 = vpop.permute.xlu0 %1306 }
 0x1d1   : > { %1850 = vmatprep.mubr.bf16.mxu0 %v3169_v10  ;;  %1963 = vmatprep.mubr.bf16.mxu1 %v4165_v52  ;;  %5110 = vst [vmem:[#allocation3_spill] sm:$0xff] %v4299_v58  ;;  %v4301_v19 = vpop.permute.xlu1 %1321  ;;  %v2664_v52 = vld [vmem:[%s4994_s3] ss:$0 sm:$0xff] }
 0x1d2   : > { %5111 = vst [vmem:[#allocation4_spill] sm:$0xff] %v4301_v19 }
 0x1d4   : > { %v4303_v25 = vpop.permute.xlu0 %1316 }
 0x1d5   : > { %5112 = vst [vmem:[#allocation5_spill] sm:$0xff] %v4303_v25  ;;  %v4305_v1 = vpop.permute.xlu1 %1331 }
 0x1d6   : > { %5113 = vst [vmem:[#allocation6_spill] sm:$0xff] %v4305_v1 }
 0x1d8   : > { %1851 = vmatmul.mubr.bf16.gmra.mrb[60].mxu0 %v3171_v12  ;;  %1964 = vmatmul.mubr.bf16.gmra.mrb[28].mxu1 %v3147_v38  ;;  %v4307_v56 = vpop.permute.xlu0 %1326 }
 0x1d9   : > { %1860 = vmatprep.mubr.bf16.mxu0 %v3172_v32  ;;  %1973 = vmatprep.mubr.bf16.mxu1 %v3148_v7  ;;  %5114 = vst [vmem:[#allocation7_spill] sm:$0xff] %v4307_v56  ;;  %v4309_v4 = vpop.permute.xlu1 %1341 }
 0x1da   : > { %5115 = vst [vmem:[#allocation8_spill] sm:$0xff] %v4309_v4 }
 0x1dc   : > { %v4311_v36 = vpop.permute.xlu0 %1336 }
 0x1dd   : > { %5116 = vst [vmem:[#allocation9_spill] sm:$0xff] %v4311_v36  ;;  %v4319_v24 = vpop.permute.xlu1 %1351 }
 0x1de   : > { %5117 = vst [vmem:[#allocation10_spill] sm:$0xff] %v4319_v24 }
 0x1e0   : > { %1861 = vmatmul.mubr.bf16.gmra.mrb[64].mxu0 %v3174_v41  ;;  %1974 = vmatmul.mubr.bf16.gmra.mrb[32].mxu1 %v3150_v44  ;;  %v4321_v38 = vpop.permute.xlu0 %1346 }
 0x1e1   : > { %1870 = vmatprep.mubr.bf16.mxu0 %v3175_v61  ;;  %1983 = vmatprep.mubr.bf16.mxu1 %v3151_v23  ;;  %5118 = vst [vmem:[#allocation11_spill] sm:$0xff] %v4321_v38  ;;  %v4325_v48 = vpop.permute.xlu1 %1361 }
 0x1e2   : > { %5119 = vst [vmem:[#allocation12_spill] sm:$0xff] %v4325_v48 }
 0x1e4   : > { %v4327_v17 = vpop.permute.xlu0 %1356 }
 0x1e5   : > { %5120 = vst [vmem:[#allocation13_spill] sm:$0xff] %v4327_v17  ;;  %v4329_v53 = vpop.permute.xlu1 %1371 }
 0x1e6   : > { %5121 = vst [vmem:[#allocation14_spill] sm:$0xff] %v4329_v53 }
 0x1e8   : > { %1871 = vmatmul.mubr.bf16.gmra.mrb[68].mxu0 %v3177_v3  ;;  %1984 = vmatmul.mubr.bf16.gmra.mrb[36].mxu1 %v3153_v8 }
 0x1e9   : > { %1993 = vmatprep.mubr.bf16.mxu1 %v3154_v18 }
 0x1f0   : > { %1994 = vmatmul.mubr.bf16.gmra.mrb[40].mxu1 %v3156_v49 }
 0x1f1   : > { %2003 = vmatprep.mubr.bf16.mxu1 %v3157_v63  ;;  %v4331_v63 = vpop.permute.xlu0 %1366 }
 0x1f2   : > { %5122 = vst [vmem:[#allocation15_spill] sm:$0xff] %v4331_v63 }
 0x1f8   : > { %2004 = vmatmul.mubr.bf16.gmra.mrb[44].mxu1 %v3159_v2 }
 0x1f9   : > { %2013 = vmatprep.mubr.bf16.mxu1 %v3160_v16 }
 0x200   : > { %2014 = vmatmul.mubr.bf16.gmra.mrb[48].mxu1 %v3162_v20  ;;  %v4337_v20 = vpop.permute.xlu1 %1381 }
 0x201   : > { %2023 = vmatprep.mubr.bf16.mxu1 %v3163_v33  ;;  %5123 = vst [vmem:[#allocation16_spill] sm:$0xff] %v4337_v20 }
 0x203   : > { %v982_v59 = vpop.f32.mrb[4].mxu0 }
 0x204   : > { %v2772_v6 = vpop.f32.mrb[5].mxu0  ;;  %v983_v62 = vadd.f32 %v2664_v52, %v982_v59 }
 0x206   : > { %v986_v43 = vmax.f32 %v983_v62, 0.0 }
 0x208   : > { %2024 = vmatmul.mubr.bf16.gmra.mrb[52].mxu1 %v3165_v37  ;;  %v4341_v37 = vpop.permute.xlu0 %1376 }
 0x209   : > { %2033 = vmatprep.mubr.bf16.mxu1 %v3166_v51  ;;  %5124 = vst [vmem:[#allocation17_spill] sm:$0xff] %v4341_v37 }
 0x210   : > { %2034 = vmatmul.mubr.bf16.gmra.mrb[56].mxu1 %v3168_v55 }
 0x211   : > { %2043 = vmatprep.mubr.bf16.mxu1 %v3169_v10 }
 0x218   : > { %2044 = vmatmul.mubr.bf16.gmra.mrb[60].mxu1 %v3171_v12  ;;  %v1384_v12 = vlaneseq }
 0x219   : > { %2053 = vmatprep.mubr.bf16.mxu1 %v3172_v32  ;;  %v4345_v32 = vpop.permute.xlu1 %2079 }
 0x21a   : > { %v1385_v6 = vshrl.u32 %v1384_v12, 7 }
 0x21c   : > { %v1386_v62 = vsub.s32 0, %v1385_v6 }
 0x220   : > { %2054 = vmatmul.mubr.bf16.gmra.mrb[64].mxu1 %v3174_v41 }
 0x221   : > { %2063 = vmatprep.mubr.bf16.mxu1 %v3175_v61  ;;  %v4349_v61 = vpop.permute.xlu0 %2075 }
 0x228   : > { %2064 = vmatmul.mubr.bf16.gmra.mrb[68].mxu1 %v3177_v3 }
 0x243   : > { %v1076_v47 = vpop.f32.mrb[4].mxu1  ;;  %v1722_v7 = vpop.f32.mrb[8].mxu0 }
 0x244   : > { %v1077_v54 = vadd.f32 %v2665_v57, %v1076_v47  ;;  %v2807_v35 = vpop.f32.mrb[5].mxu1  ;;  %v4323_v39 = vpop.f32.mrb[9].mxu0 }
 0x245   : > { %v1726_v44 = vpop.f32.mrb[10].mxu0  ;;  %v4357_v57 = vpop.permute.xlu1 %2083 }
 0x246   : > { %v1080_v23 = vmax.f32 %v1077_v54, 0.0  ;;  %v1728_v60 = vpop.f32.mrb[11].mxu0  ;;  %v4359_v47 = vpop.permute.xlu0 %2087 }
 0x248   : > { %v1081_v11 = vadd.f32 %v1080_v23, %v986_v43 }
 0x249   : > { %v4371_v12 = vpop.permute.xlu1 %2091 }
 0x24a   : > { %v2666_v8 = vmul.f32 -0.5, %v1081_v11  ;;  %v4381_v63 = vpop.permute.xlu0 %2095 }
 0x24b   : > { %v1732_v18 = vpop.f32.mrb[12].mxu0 }
 0x24c   : > { %v1084_v27 = vmul.f32 1.442695, %v2666_v8  ;;  %v1734_v34 = vpop.f32.mrb[13].mxu0 }
 0x24d   : > { %v1736_v40 = vpop.f32.mrb[14].mxu0 }
 0x24e   : > { %3178 = vpow2.f32 %v1084_v27  ;;  %v1738_v49 = vpop.f32.mrb[15].mxu0 }
 0x253   : > { %v4333_v2 = vpop.f32.mrb[16].mxu0 }
 0x254   : > { %v4335_v16 = vpop.f32.mrb[17].mxu0 }
 0x255   : > { %v4339_v33 = vpop.f32.mrb[18].mxu0 }
 0x256   : > { %v4343_v51 = vpop.f32.mrb[19].mxu0 }
 0x258   : > { %v3179_v55 = vpop.eup %3178 }
 0x259   : > { %v1086_v10 = vadd.f32 1.0, %v3179_v55 }
 0x25b   : > { %3180 = vrcp.f32 %v1086_v10  ;;  %v4347_v41 = vpop.f32.mrb[20].mxu0 }
 0x25c   : > { %v4351_v3 = vpop.f32.mrb[21].mxu0 }
 0x25d   : > { %v4353_v59 = vpop.f32.mrb[22].mxu0 }
 0x25e   : > { %v4355_v52 = vpop.f32.mrb[23].mxu0 }
 0x263   : > { %v4361_v54 = vpop.f32.mrb[24].mxu0 }
 0x264   : > { %v4363_v35 = vpop.f32.mrb[25].mxu0 }
 0x265   : > { %v3181_v43 = vpop.eup %3180  ;;  %v4365_v23 = vpop.f32.mrb[26].mxu0 }
 0x266   : > { %v1090_v11 = vrot.slane %v3181_v43, 1  ;;  %v1092_v8 = vrot.slane %v3181_v43, 2  ;;  %v1094_v27 = vrot.slane %v3181_v43, 3  ;;  %v4367_v55 = vrot.slane %v3181_v43, %v1386_v62  ;;  %v4369_v10 = vpop.f32.mrb[27].mxu0 }
 0x268   : > { %v4373_v20 = vrot.slane %v1090_v11, %v1386_v62  ;;  %v4375_v6 = vrot.slane %v1092_v8, %v1386_v62  ;;  %v4377_v37 = vrot.slane %v1094_v27, %v1386_v62  ;;  %v1400_v53 = vmul.f32 %v4367_v55, %v4267_v45 }
 0x269   : > { %v1404_v48 = vmul.f32 %v4367_v55, %v4271_v28  ;;  %v1408_v43 = vmul.f32 %v4367_v55, %v4265_v31  ;;  %v1412_v17 = vmul.f32 %v4367_v55, %v4269_v21  ;;  %v1416_v11 = vmul.f32 %v4367_v55, %v4275_v46 }
 0x26a   : > { %v1723_v62 = vadd.f32 %v1722_v7, %v1400_v53  ;;  %v1401_v8 = vmul.f32 %v4373_v20, %v4267_v45  ;;  %v1405_v27 = vmul.f32 %v4373_v20, %v4271_v28  ;;  %v1409_v24 = vmul.f32 %v4373_v20, %v4265_v31 }
 0x26b   : > { %v1727_v38 = vadd.f32 %v1726_v44, %v1404_v48  ;;  %v1733_v4 = vadd.f32 %v1732_v18, %v1408_v43  ;;  %v1737_v36 = vadd.f32 %v1736_v40, %v1412_v17  ;;  %v1413_v1 = vmul.f32 %v4373_v20, %v4269_v21  ;;  %v4399_v56 = vpop.f32.mrb[28].mxu0  ;;  %v4421_v43 = vpop.permute.xlu0 %2103 }
 0x26c   : > { %v1725_v19 = vadd.f32 %v4323_v39, %v1401_v8  ;;  %v1729_v7 = vadd.f32 %v1728_v60, %v1405_v27  ;;  %v2202_v53 = vadd.f32 %v4349_v61, %v1723_v62  ;;  %v1735_v25 = vadd.f32 %v1734_v34, %v1409_v24  ;;  %v4403_v14 = vpop.f32.mrb[29].mxu0  ;;  %v4414_v39 = vpop.permute.xlu1 %2099 }
 0x26d   : > { %v2206_v44 = vadd.f32 %v4345_v32, %v1727_v38  ;;  %v2210_v48 = vadd.f32 %v4357_v57, %v1733_v4  ;;  %v1739_v17 = vadd.f32 %v1738_v49, %v1413_v1  ;;  %v2214_v18 = vadd.f32 %v4359_v47, %v1737_v36  ;;  %v4416_v60 = vpop.f32.mrb[30].mxu0 }
 0x26e   : > { %v2207_v24 = vadd.f32 %v4345_v32, %v1729_v7  ;;  %v2203_v34 = vadd.f32 %v4349_v61, %v1725_v19  ;;  %v2330_v40 = vmax.f32 %v2202_v53, 0.0  ;;  %v2211_v38 = vadd.f32 %v4357_v57, %v1735_v25  ;;  %v4423_v1 = vpop.f32.mrb[31].mxu0 }
 0x26f   : > { %v2334_v4 = vmax.f32 %v2206_v44, 0.0  ;;  %v2338_v36 = vmax.f32 %v2210_v48, 0.0  ;;  %v2215_v49 = vadd.f32 %v4359_v47, %v1739_v17  ;;  %v2342_v62 = vmax.f32 %v2214_v18, 0.0 }
 0x270   : > { %v2335_v8 = vmax.f32 %v2207_v24, 0.0  ;;  %v2331_v27 = vmax.f32 %v2203_v34, 0.0  ;;  %2458 = vst [vmem:[%s4409_s12] sm:$0xff] %v2330_v40  ;;  %v2339_v19 = vmax.f32 %v2211_v38, 0.0  ;;  %v1743_v7 = vadd.f32 %v4333_v2, %v1416_v11 }
 0x271   : > { %2462 = vst [vmem:[%s4409_s12 + $0x20] sm:$0xff] %v2334_v4  ;;  %2466 = vst [vmem:[%s4409_s12 + $0x40] sm:$0xff] %v2338_v36  ;;  %v2343_v25 = vmax.f32 %v2215_v49, 0.0  ;;  %v1417_v53 = vmul.f32 %v4373_v20, %v4275_v46  ;;  %v1420_v44 = vmul.f32 %v4367_v55, %v4273_v0  ;;  %v1421_v48 = vmul.f32 %v4373_v20, %v4273_v0  ;;  %v4453_v4 = vpop.permute.xlu1 %2107 }
 0x272   : > { %2470 = vst [vmem:[%s4409_s12 + $0x60] sm:$0xff] %v2342_v62  ;;  %2463 = vst [vmem:[%s4409_s12 + $0x28] sm:$0xff] %v2335_v8  ;;  %v2218_v17 = vadd.f32 %v4371_v12, %v1743_v7  ;;  %v1424_v2 = vmul.f32 %v4367_v55, %v4279_v29  ;;  %v1425_v11 = vmul.f32 %v4373_v20, %v4279_v29 }
 0x273   : > { %2459 = vst [vmem:[%s4409_s12 + $0x8] sm:$0xff] %v2331_v27  ;;  %2467 = vst [vmem:[%s4409_s12 + $0x48] sm:$0xff] %v2339_v19  ;;  %v1428_v18 = vmul.f32 %v4367_v55, %v4277_v13  ;;  %v1745_v24 = vadd.f32 %v4335_v16, %v1417_v53  ;;  %v1747_v34 = vadd.f32 %v4339_v33, %v1420_v44  ;;  %v4455_v36 = vpop.f32.mrb[32].mxu0  ;;  %v4460_v16 = vpop.permute.xlu0 %2111 }
 0x274   : > { %2471 = vst [vmem:[%s4409_s12 + $0x68] sm:$0xff] %v2343_v25  ;;  %v1749_v40 = vadd.f32 %v4343_v51, %v1421_v48  ;;  %v1429_v38 = vmul.f32 %v4373_v20, %v4277_v13  ;;  %v2346_v49 = vmax.f32 %v2218_v17, 0.0  ;;  %v1753_v62 = vadd.f32 %v4347_v41, %v1424_v2  ;;  %v4462_v33 = vpop.f32.mrb[33].mxu0 }
 0x275   : > { %v1755_v8 = vadd.f32 %v4351_v3, %v1425_v11  ;;  %v1757_v27 = vadd.f32 %v4353_v59, %v1428_v18  ;;  %v2219_v51 = vadd.f32 %v4371_v12, %v1745_v24  ;;  %v2222_v19 = vadd.f32 %v4381_v63, %v1747_v34  ;;  %v4468_v53 = vpop.f32.mrb[34].mxu0 }
 0x276   : > { %v2223_v7 = vadd.f32 %v4381_v63, %v1749_v40  ;;  %v1759_v25 = vadd.f32 %v4355_v52, %v1429_v38  ;;  %2474 = vst [vmem:[%s4409_s12 + $0x80] sm:$0xff] %v2346_v49  ;;  %v2226_v41 = vadd.f32 %v4414_v39, %v1753_v62  ;;  %v1432_v44 = vmul.f32 %v4367_v55, %v4283_v50  ;;  %v4476_v48 = vpop.f32.mrb[35].mxu0 }
 0x277   : > { %v2227_v3 = vadd.f32 %v4414_v39, %v1755_v8  ;;  %v2230_v59 = vadd.f32 %v4421_v43, %v1757_v27  ;;  %v2347_v17 = vmax.f32 %v2219_v51, 0.0  ;;  %v2350_v52 = vmax.f32 %v2222_v19, 0.0  ;;  %v4489_v27 = vpop.permute.xlu1 %2115 }
 0x278   : > { %v2351_v2 = vmax.f32 %v2223_v7, 0.0  ;;  %v2231_v11 = vadd.f32 %v4421_v43, %v1759_v25  ;;  %v2354_v18 = vmax.f32 %v2226_v41, 0.0  ;;  %v1763_v40 = vadd.f32 %v4361_v54, %v1432_v44  ;;  %v4501_v25 = vpop.permute.xlu0 %2119 }
 0x279   : > { %v2355_v24 = vmax.f32 %v2227_v3, 0.0  ;;  %v2358_v34 = vmax.f32 %v2230_v59, 0.0  ;;  %2475 = vst [vmem:[%s4409_s12 + $0x88] sm:$0xff] %v2347_v17  ;;  %2478 = vst [vmem:[%s4409_s12 + $0xa0] sm:$0xff] %v2350_v52  ;;  %v1433_v49 = vmul.f32 %v4373_v20, %v4283_v50  ;;  %v1436_v62 = vmul.f32 %v4367_v55, %v4281_v22 }
 0x27a   : > { %2479 = vst [vmem:[%s4409_s12 + $0xa8] sm:$0xff] %v2351_v2  ;;  %v2359_v38 = vmax.f32 %v2231_v11, 0.0  ;;  %v1437_v8 = vmul.f32 %v4373_v20, %v4281_v22  ;;  %2482 = vst [vmem:[%s4409_s12 + $0xc0] sm:$0xff] %v2354_v18  ;;  %v2234_v54 = vadd.f32 %v4453_v4, %v1763_v40  ;;  %v1440_v51 = vmul.f32 %v4367_v55, %v4287_v42 }
 0x27b   : > { %2483 = vst [vmem:[%s4409_s12 + $0xc8] sm:$0xff] %v2355_v24  ;;  %2486 = vst [vmem:[%s4409_s12 + $0xe0] sm:$0xff] %v2358_v34  ;;  %v1441_v19 = vmul.f32 %v4373_v20, %v4287_v42  ;;  %v1444_v7 = vmul.f32 %v4367_v55, %v4285_v26  ;;  %v1765_v41 = vadd.f32 %v4363_v35, %v1433_v49  ;;  %v1792_v17 = vpop.f32.mrb[36].mxu0  ;;  %v4516_v40 = vpop.permute.xlu1 %2123 }
 0x27c   : > { %2487 = vst [vmem:[%s4409_s12 + $0xe8] sm:$0xff] %v2359_v38  ;;  %v1767_v3 = vadd.f32 %v4365_v23, %v1436_v62  ;;  %v1769_v59 = vadd.f32 %v4369_v10, %v1437_v8  ;;  %v1445_v44 = vmul.f32 %v4373_v20, %v4285_v26  ;;  %v2362_v52 = vmax.f32 %v2234_v54, 0.0  ;;  %v1794_v24 = vpop.f32.mrb[37].mxu0  ;;  %v4524_v62 = vpop.permute.xlu0 %2127 }
 0x27d   : > { %v1773_v2 = vadd.f32 %v4399_v56, %v1440_v51  ;;  %v1775_v11 = vadd.f32 %v4403_v14, %v1441_v19  ;;  %v1777_v18 = vadd.f32 %v4416_v60, %v1444_v7  ;;  %v2235_v34 = vadd.f32 %v4453_v4, %v1765_v41  ;;  %v1796_v38 = vpop.f32.mrb[38].mxu0 }
 0x27e   : > { %v2238_v35 = vadd.f32 %v4460_v16, %v1767_v3  ;;  %v2239_v23 = vadd.f32 %v4460_v16, %v1769_v59  ;;  %v1779_v10 = vadd.f32 %v4423_v1, %v1445_v44  ;;  %2490 = vst [vmem:[%s4409_s12 + $0x100] sm:$0xff] %v2362_v52  ;;  %v1448_v49 = vmul.f32 %v4367_v55, %v4291_v5  ;;  %v1798_v8 = vpop.f32.mrb[39].mxu0 }
 0x27f   : > { %v2242_v56 = vadd.f32 %v4489_v27, %v1773_v2  ;;  %v2243_v14 = vadd.f32 %v4489_v27, %v1775_v11  ;;  %v2246_v60 = vadd.f32 %v4501_v25, %v1777_v18  ;;  %v2363_v1 = vmax.f32 %v2235_v34, 0.0 }
 0x280   : > { %v2366_v54 = vmax.f32 %v2238_v35, 0.0  ;;  %v2367_v51 = vmax.f32 %v2239_v23, 0.0  ;;  %v2247_v19 = vadd.f32 %v4501_v25, %v1779_v10  ;;  %v1783_v59 = vadd.f32 %v4455_v36, %v1448_v49  ;;  %v4545_v35 = vpop.permute.xlu1 %2131  ;;  %v4549_v10 = vpop.permute.xlu0 %2135 }
 0x281   : > { %v2370_v7 = vmax.f32 %v2242_v56, 0.0  ;;  %v2371_v41 = vmax.f32 %v2243_v14, 0.0  ;;  %v2374_v3 = vmax.f32 %v2246_v60, 0.0  ;;  %2491 = vst [vmem:[%s4409_s12 + $0x108] sm:$0xff] %v2363_v1  ;;  %v1449_v52 = vmul.f32 %v4373_v20, %v4291_v5  ;;  %5125 = vst [vmem:[#allocation18_spill] sm:$0xff] %v4545_v35 }
 0x282   : > { %2494 = vst [vmem:[%s4409_s12 + $0x120] sm:$0xff] %v2366_v54  ;;  %2495 = vst [vmem:[%s4409_s12 + $0x128] sm:$0xff] %v2367_v51  ;;  %v2375_v44 = vmax.f32 %v2247_v19, 0.0  ;;  %v1452_v2 = vmul.f32 %v4367_v55, %v4289_v30  ;;  %v1453_v11 = vmul.f32 %v4373_v20, %v4289_v30  ;;  %v2250_v18 = vadd.f32 %v4516_v40, %v1783_v59 }
 0x283   : > { %2498 = vst [vmem:[%s4409_s12 + $0x140] sm:$0xff] %v2370_v7  ;;  %2499 = vst [vmem:[%s4409_s12 + $0x148] sm:$0xff] %v2371_v41  ;;  %v1456_v36 = vmul.f32 %v4367_v55, %v4295_v9  ;;  %v1457_v34 = vmul.f32 %v4373_v20, %v4295_v9  ;;  %v1460_v23 = vmul.f32 %v4367_v55, %v4293_v15  ;;  %v1802_v1 = vpop.f32.mrb[40].mxu0  ;;  %v1915_v54 = vpop.f32.mrb[8].mxu1 }
 0x284   : > { %2502 = vst [vmem:[%s4409_s12 + $0x160] sm:$0xff] %v2374_v3  ;;  %5126 = vst [vmem:[#allocation19_spill] sm:$0xff] %v4549_v10  ;;  %v1785_v56 = vadd.f32 %v4462_v33, %v1449_v52  ;;  %v1787_v14 = vadd.f32 %v4468_v53, %v1452_v2  ;;  %v1789_v60 = vadd.f32 %v4476_v48, %v1453_v11  ;;  %v2378_v51 = vmax.f32 %v2250_v18, 0.0  ;;  %v1804_v3 = vpop.f32.mrb[41].mxu0  ;;  %v1917_v59 = vpop.f32.mrb[9].mxu1 }
 0x285   : > { %2503 = vst [vmem:[%s4409_s12 + $0x168] sm:$0xff] %v2375_v44  ;;  %v1461_v49 = vmul.f32 %v4373_v20, %v4293_v15  ;;  %v1793_v19 = vadd.f32 %v1792_v17, %v1456_v36  ;;  %v1795_v7 = vadd.f32 %v1794_v24, %v1457_v34  ;;  %v1797_v41 = vadd.f32 %v1796_v38, %v1460_v23  ;;  %v1806_v48 = vpop.f32.mrb[42].mxu0  ;;  %v1919_v2 = vpop.f32.mrb[10].mxu1 }
 0x286   : > { %v2251_v44 = vadd.f32 %v4516_v40, %v1785_v56  ;;  %v2254_v33 = vadd.f32 %v4524_v62, %v1787_v14  ;;  %v2255_v53 = vadd.f32 %v4524_v62, %v1789_v60  ;;  %2506 = vst [vmem:[%s4409_s12 + $0x180] sm:$0xff] %v2378_v51  ;;  %v1464_v38 = vmul.f32 %v4367_v55, %v4299_v58  ;;  %v1808_v18 = vpop.f32.mrb[43].mxu0  ;;  %v1921_v36 = vpop.f32.mrb[11].mxu1 }
 0x287   : > { %v1799_v52 = vadd.f32 %v1798_v8, %v1461_v49  ;;  %v2258_v11 = vadd.f32 %v4545_v35, %v1793_v19  ;;  %v2259_v17 = vadd.f32 %v4545_v35, %v1795_v7  ;;  %v2262_v24 = vadd.f32 %v4549_v10, %v1797_v41  ;;  %v4567_v14 = vpop.permute.xlu1 %2139 }
 0x288   : > { %v2379_v34 = vmax.f32 %v2251_v44, 0.0  ;;  %v2382_v8 = vmax.f32 %v2254_v33, 0.0  ;;  %v2383_v23 = vmax.f32 %v2255_v53, 0.0  ;;  %v1803_v19 = vadd.f32 %v1802_v1, %v1464_v38  ;;  %v5127_v1 = vld [vmem:[#allocation2_spill] sm:$0xff] }
 0x289   : > { %v2263_v56 = vadd.f32 %v4549_v10, %v1799_v52  ;;  %v2386_v60 = vmax.f32 %v2258_v11, 0.0  ;;  %v2387_v49 = vmax.f32 %v2259_v17, 0.0  ;;  %v2390_v51 = vmax.f32 %v2262_v24, 0.0  ;;  %v4588_v24 = vpop.permute.xlu0 %2143 }
 0x28a   : > { %2507 = vst [vmem:[%s4409_s12 + $0x188] sm:$0xff] %v2379_v34  ;;  %2510 = vst [vmem:[%s4409_s12 + $0x1a0] sm:$0xff] %v2382_v8  ;;  %v1402_v41 = vmul.f32 %v4375_v6, %v4267_v45  ;;  %v1465_v44 = vmul.f32 %v4373_v20, %v4299_v58  ;;  %v1403_v33 = vmul.f32 %v4377_v37, %v4267_v45 }
 0x28b   : > { %2511 = vst [vmem:[%s4409_s12 + $0x1a8] sm:$0xff] %v2383_v23  ;;  %v2391_v7 = vmax.f32 %v2263_v56, 0.0  ;;  %2514 = vst [vmem:[%s4409_s12 + $0x1c0] sm:$0xff] %v2386_v60  ;;  %v2266_v53 = vadd.f32 %v4567_v14, %v1803_v19  ;;  %v1468_v52 = vmul.f32 %v4367_v55, %v5127_v1  ;;  %v1406_v11 = vmul.f32 %v4375_v6, %v4271_v28  ;;  %v1812_v23 = vpop.f32.mrb[44].mxu0  ;;  %v1925_v56 = vpop.f32.mrb[12].mxu1 }
 0x28c   : > { %2515 = vst [vmem:[%s4409_s12 + $0x1c8] sm:$0xff] %v2387_v49  ;;  %2518 = vst [vmem:[%s4409_s12 + $0x1e0] sm:$0xff] %v2390_v51  ;;  %v1469_v17 = vmul.f32 %v4373_v20, %v5127_v1  ;;  %v1916_v38 = vadd.f32 %v1915_v54, %v1402_v41  ;;  %v1805_v34 = vadd.f32 %v1804_v3, %v1465_v44  ;;  %v1814_v58 = vpop.f32.mrb[45].mxu0  ;;  %v1927_v10 = vpop.f32.mrb[13].mxu1 }
 0x28d   : > { %2519 = vst [vmem:[%s4409_s12 + $0x1e8] sm:$0xff] %v2391_v7  ;;  %v1918_v45 = vadd.f32 %v1917_v59, %v1403_v33  ;;  %v1407_v8 = vmul.f32 %v4377_v37, %v4271_v28  ;;  %v2394_v60 = vmax.f32 %v2266_v53, 0.0  ;;  %v1807_v49 = vadd.f32 %v1806_v48, %v1468_v52  ;;  %v1816_v59 = vpop.f32.mrb[46].mxu0  ;;  %v1929_v7 = vpop.f32.mrb[14].mxu1 }
 0x28e   : > { %v1920_v51 = vadd.f32 %v1919_v2, %v1406_v11  ;;  %v1809_v19 = vadd.f32 %v1808_v18, %v1469_v17  ;;  %v2204_v1 = vadd.f32 %v4349_v61, %v1916_v38  ;;  %v2267_v54 = vadd.f32 %v4567_v14, %v1805_v34  ;;  %v5128_v18 = vld [vmem:[#allocation5_spill] sm:$0xff]  ;;  %v1818_v44 = vpop.f32.mrb[47].mxu0  ;;  %v4603_v11 = vpop.permute.xlu1 %2147 }
 0x28f   : > { %v2205_v35 = vadd.f32 %v4349_v61, %v1918_v45  ;;  %v1922_v3 = vadd.f32 %v1921_v36, %v1407_v8  ;;  %2522 = vst [vmem:[%s4409_s12 + $0x200] sm:$0xff] %v2394_v60  ;;  %v2270_v48 = vadd.f32 %v4588_v24, %v1807_v49  ;;  %v1472_v41 = vmul.f32 %v4367_v55, %v5128_v18  ;;  %v1931_v61 = vpop.f32.mrb[15].mxu1 }
 0x290   : > { %v2208_v28 = vadd.f32 %v4345_v32, %v1920_v51  ;;  %v2271_v2 = vadd.f32 %v4588_v24, %v1809_v19  ;;  %v2332_v33 = vmax.f32 %v2204_v1, 0.0  ;;  %v2395_v53 = vmax.f32 %v2267_v54, 0.0  ;;  %v4624_v54 = vpop.permute.xlu0 %2151 }
 0x291   : > { %v2333_v36 = vmax.f32 %v2205_v35, 0.0  ;;  %v2209_v52 = vadd.f32 %v4345_v32, %v1922_v3  ;;  %v2398_v38 = vmax.f32 %v2270_v48, 0.0  ;;  %v1813_v45 = vadd.f32 %v1812_v23, %v1472_v41  ;;  %v5129_v23 = vld [vmem:[#allocation4_spill] sm:$0xff] }
 0x292   : > { %v2336_v17 = vmax.f32 %v2208_v28, 0.0  ;;  %v2399_v34 = vmax.f32 %v2271_v2, 0.0  ;;  %2460 = vst [vmem:[%s4409_s12 + $0x10] sm:$0xff] %v2332_v33  ;;  %2523 = vst [vmem:[%s4409_s12 + $0x208] sm:$0xff] %v2395_v53  ;;  %v1410_v1 = vmul.f32 %v4375_v6, %v4265_v31  ;;  %v1473_v35 = vmul.f32 %v4373_v20, %v5128_v18 }
 0x293   : > { %2461 = vst [vmem:[%s4409_s12 + $0x18] sm:$0xff] %v2333_v36  ;;  %v2337_v8 = vmax.f32 %v2209_v52, 0.0  ;;  %v1411_v32 = vmul.f32 %v4377_v37, %v4265_v31  ;;  %2526 = vst [vmem:[%s4409_s12 + $0x220] sm:$0xff] %v2398_v38  ;;  %v2274_v60 = vadd.f32 %v4603_v11, %v1813_v45  ;;  %v1476_v49 = vmul.f32 %v4367_v55, %v5129_v23  ;;  %v1822_v2 = vpop.f32.mrb[48].mxu0  ;;  %v1935_v41 = vpop.f32.mrb[16].mxu1 }
 0x294   : > { %2464 = vst [vmem:[%s4409_s12 + $0x30] sm:$0xff] %v2336_v17  ;;  %2527 = vst [vmem:[%s4409_s12 + $0x228] sm:$0xff] %v2399_v34  ;;  %v1414_v51 = vmul.f32 %v4375_v6, %v4269_v21  ;;  %v1477_v19 = vmul.f32 %v4373_v20, %v5129_v23  ;;  %v1926_v3 = vadd.f32 %v1925_v56, %v1410_v1  ;;  %v1824_v17 = vpop.f32.mrb[49].mxu0  ;;  %v1937_v38 = vpop.f32.mrb[17].mxu1 }
 0x295   : > { %2465 = vst [vmem:[%s4409_s12 + $0x38] sm:$0xff] %v2337_v8  ;;  %v1815_v28 = vadd.f32 %v1814_v58, %v1473_v35  ;;  %v1928_v31 = vadd.f32 %v1927_v10, %v1411_v32  ;;  %v1415_v48 = vmul.f32 %v4377_v37, %v4269_v21  ;;  %v2402_v33 = vmax.f32 %v2274_v60, 0.0  ;;  %v1826_v10 = vpop.f32.mrb[50].mxu0  ;;  %v1939_v8 = vpop.f32.mrb[18].mxu1 }
 0x296   : > { %v1817_v36 = vadd.f32 %v1816_v59, %v1476_v49  ;;  %v1930_v53 = vadd.f32 %v1929_v7, %v1414_v51  ;;  %v1819_v52 = vadd.f32 %v1818_v44, %v1477_v19  ;;  %v2212_v34 = vadd.f32 %v4357_v57, %v1926_v3  ;;  %v5130_v44 = vld [vmem:[#allocation7_spill] sm:$0xff]  ;;  %v1828_v35 = vpop.f32.mrb[51].mxu0  ;;  %v4639_v51 = vpop.permute.xlu1 %2155 }
 0x297   : > { %v2213_v45 = vadd.f32 %v4357_v57, %v1928_v31  ;;  %v2275_v56 = vadd.f32 %v4603_v11, %v1815_v28  ;;  %v1932_v58 = vadd.f32 %v1931_v61, %v1415_v48  ;;  %2530 = vst [vmem:[%s4409_s12 + $0x240] sm:$0xff] %v2402_v33  ;;  %v1480_v1 = vmul.f32 %v4367_v55, %v5130_v44  ;;  %v1941_v57 = vpop.f32.mrb[19].mxu1 }
 0x298   : > { %v2216_v21 = vadd.f32 %v4359_v47, %v1930_v53  ;;  %v2278_v59 = vadd.f32 %v4624_v54, %v1817_v36  ;;  %v2279_v7 = vadd.f32 %v4624_v54, %v1819_v52  ;;  %v2340_v32 = vmax.f32 %v2212_v34, 0.0 }
 0x299   : > { %v2341_v61 = vmax.f32 %v2213_v45, 0.0  ;;  %v2403_v60 = vmax.f32 %v2275_v56, 0.0  ;;  %v2217_v49 = vadd.f32 %v4359_v47, %v1932_v58  ;;  %v1823_v31 = vadd.f32 %v1822_v2, %v1480_v1  ;;  %v5131_v2 = vld [vmem:[#allocation6_spill] sm:$0xff]  ;;  %v4660_v56 = vpop.permute.xlu0 %2159 }
 0x29a   : > { %v2344_v19 = vmax.f32 %v2216_v21, 0.0  ;;  %v2406_v3 = vmax.f32 %v2278_v59, 0.0  ;;  %v2407_v28 = vmax.f32 %v2279_v7, 0.0  ;;  %2468 = vst [vmem:[%s4409_s12 + $0x50] sm:$0xff] %v2340_v32  ;;  %v1418_v33 = vmul.f32 %v4375_v6, %v4275_v46 }
 0x29b   : > { %2469 = vst [vmem:[%s4409_s12 + $0x58] sm:$0xff] %v2341_v61  ;;  %2531 = vst [vmem:[%s4409_s12 + $0x248] sm:$0xff] %v2403_v60  ;;  %v2345_v48 = vmax.f32 %v2217_v49, 0.0  ;;  %v1481_v36 = vmul.f32 %v4373_v20, %v5130_v44  ;;  %v1419_v47 = vmul.f32 %v4377_v37, %v4275_v46  ;;  %v2282_v53 = vadd.f32 %v4639_v51, %v1823_v31  ;;  %v1832_v7 = vpop.f32.mrb[52].mxu0  ;;  %v1945_v1 = vpop.f32.mrb[20].mxu1 }
 0x29c   : > { %2472 = vst [vmem:[%s4409_s12 + $0x70] sm:$0xff] %v2344_v19  ;;  %2534 = vst [vmem:[%s4409_s12 + $0x260] sm:$0xff] %v2406_v3  ;;  %v1484_v52 = vmul.f32 %v4367_v55, %v5131_v2  ;;  %v1422_v34 = vmul.f32 %v4375_v6, %v4273_v0  ;;  %v1485_v45 = vmul.f32 %v4373_v20, %v5131_v2  ;;  %v1834_v19 = vpop.f32.mrb[53].mxu0  ;;  %v1947_v3 = vpop.f32.mrb[21].mxu1 }
 0x29d   : > { %2535 = vst [vmem:[%s4409_s12 + $0x268] sm:$0xff] %v2407_v28  ;;  %2473 = vst [vmem:[%s4409_s12 + $0x78] sm:$0xff] %v2345_v48  ;;  %v1936_v58 = vadd.f32 %v1935_v41, %v1418_v33  ;;  %v1825_v21 = vadd.f32 %v1824_v17, %v1481_v36  ;;  %v1938_v46 = vadd.f32 %v1937_v38, %v1419_v47  ;;  %v2410_v32 = vmax.f32 %v2282_v53, 0.0  ;;  %v1836_v38 = vpop.f32.mrb[54].mxu0  ;;  %v1949_v48 = vpop.f32.mrb[22].mxu1 }
 0x29e   : > { %v1423_v59 = vmul.f32 %v4377_v37, %v4273_v0  ;;  %v1827_v61 = vadd.f32 %v1826_v10, %v1484_v52  ;;  %v1940_v60 = vadd.f32 %v1939_v8, %v1422_v34  ;;  %v1829_v49 = vadd.f32 %v1828_v35, %v1485_v45  ;;  %v5132_v35 = vld [vmem:[#allocation9_spill] sm:$0xff]  ;;  %v1838_v36 = vpop.f32.mrb[55].mxu0  ;;  %v4675_v34 = vpop.permute.xlu1 %2163 }
 0x29f   : > { %v2220_v28 = vadd.f32 %v4371_v12, %v1936_v58  ;;  %v2221_v31 = vadd.f32 %v4371_v12, %v1938_v46  ;;  %v2283_v41 = vadd.f32 %v4639_v51, %v1825_v21  ;;  %2538 = vst [vmem:[%s4409_s12 + $0x280] sm:$0xff] %v2410_v32  ;;  %v1488_v33 = vmul.f32 %v4367_v55, %v5132_v35  ;;  %v1951_v12 = vpop.f32.mrb[23].mxu1 }
 0x2a0   : > { %v1942_v17 = vadd.f32 %v1941_v57, %v1423_v59  ;;  %v2224_v0 = vadd.f32 %v4381_v63, %v1940_v60  ;;  %v2286_v10 = vadd.f32 %v4660_v56, %v1827_v61  ;;  %v2287_v8 = vadd.f32 %v4660_v56, %v1829_v49 }
 0x2a1   : > { %v2348_v47 = vmax.f32 %v2220_v28, 0.0  ;;  %v2349_v57 = vmax.f32 %v2221_v31, 0.0  ;;  %v2411_v53 = vmax.f32 %v2283_v41, 0.0  ;;  %v1833_v46 = vadd.f32 %v1832_v7, %v1488_v33  ;;  %v5133_v7 = vld [vmem:[#allocation8_spill] sm:$0xff]  ;;  %v4696_v41 = vpop.permute.xlu0 %2167 }
 0x2a2   : > { %v2225_v52 = vadd.f32 %v4381_v63, %v1942_v17  ;;  %v2352_v45 = vmax.f32 %v2224_v0, 0.0  ;;  %v2414_v58 = vmax.f32 %v2286_v10, 0.0  ;;  %v2415_v21 = vmax.f32 %v2287_v8, 0.0 }
 0x2a3   : > { %2476 = vst [vmem:[%s4409_s12 + $0x90] sm:$0xff] %v2348_v47  ;;  %2477 = vst [vmem:[%s4409_s12 + $0x98] sm:$0xff] %v2349_v57  ;;  %v1426_v32 = vmul.f32 %v4375_v6, %v4279_v29  ;;  %v1489_v61 = vmul.f32 %v4373_v20, %v5132_v35  ;;  %v1427_v63 = vmul.f32 %v4377_v37, %v4279_v29  ;;  %v1842_v8 = vpop.f32.mrb[56].mxu0  ;;  %v1955_v33 = vpop.f32.mrb[24].mxu1 }
 0x2a4   : > { %2539 = vst [vmem:[%s4409_s12 + $0x288] sm:$0xff] %v2411_v53  ;;  %v2353_v59 = vmax.f32 %v2225_v52, 0.0  ;;  %2480 = vst [vmem:[%s4409_s12 + $0xb0] sm:$0xff] %v2352_v45  ;;  %v2290_v60 = vadd.f32 %v4675_v34, %v1833_v46  ;;  %v1492_v49 = vmul.f32 %v4367_v55, %v5133_v7  ;;  %v1430_v28 = vmul.f32 %v4375_v6, %v4277_v13  ;;  %v1844_v45 = vpop.f32.mrb[57].mxu0 }
 0x2a5   : > { %2542 = vst [vmem:[%s4409_s12 + $0x2a0] sm:$0xff] %v2414_v58  ;;  %2543 = vst [vmem:[%s4409_s12 + $0x2a8] sm:$0xff] %v2415_v21  ;;  %v1493_v31 = vmul.f32 %v4373_v20, %v5133_v7  ;;  %v1946_v17 = vadd.f32 %v1945_v1, %v1426_v32  ;;  %v1835_v0 = vadd.f32 %v1834_v19, %v1489_v61  ;;  %v1957_v58 = vpop.f32.mrb[25].mxu1 }
 0x2a6   : > { %2481 = vst [vmem:[%s4409_s12 + $0xb8] sm:$0xff] %v2353_v59  ;;  %v1948_v29 = vadd.f32 %v1947_v3, %v1427_v63  ;;  %v1431_v10 = vmul.f32 %v4377_v37, %v4277_v13  ;;  %v2418_v47 = vmax.f32 %v2290_v60, 0.0  ;;  %v1837_v57 = vadd.f32 %v1836_v38, %v1492_v49  ;;  %v1846_v3 = vpop.f32.mrb[58].mxu0  ;;  %v1959_v59 = vpop.f32.mrb[26].mxu1 }
 0x2a7   : > { %v1950_v53 = vadd.f32 %v1949_v48, %v1430_v28  ;;  %v1839_v52 = vadd.f32 %v1838_v36, %v1493_v31  ;;  %v2228_v21 = vadd.f32 %v4414_v39, %v1946_v17  ;;  %v2291_v1 = vadd.f32 %v4675_v34, %v1835_v0  ;;  %v5134_v36 = vld [vmem:[#allocation11_spill] sm:$0xff]  ;;  %v1848_v61 = vpop.f32.mrb[59].mxu0  ;;  %v4711_v28 = vpop.permute.xlu1 %2171 }
 0x2a8   : > { %v2229_v46 = vadd.f32 %v4414_v39, %v1948_v29  ;;  %v1952_v19 = vadd.f32 %v1951_v12, %v1431_v10  ;;  %2546 = vst [vmem:[%s4409_s12 + $0x2c0] sm:$0xff] %v2418_v47  ;;  %v2294_v38 = vadd.f32 %v4696_v41, %v1837_v57  ;;  %v1496_v32 = vmul.f32 %v4367_v55, %v5134_v36  ;;  %v1961_v39 = vpop.f32.mrb[27].mxu1 }
 0x2a9   : > { %v2232_v13 = vadd.f32 %v4421_v43, %v1950_v53  ;;  %v2295_v48 = vadd.f32 %v4696_v41, %v1839_v52  ;;  %v2356_v63 = vmax.f32 %v2228_v21, 0.0  ;;  %v2419_v60 = vmax.f32 %v2291_v1, 0.0  ;;  %v4732_v1 = vpop.permute.xlu0 %2175 }
 0x2aa   : > { %v2357_v12 = vmax.f32 %v2229_v46, 0.0  ;;  %v2233_v49 = vadd.f32 %v4421_v43, %v1952_v19  ;;  %v2422_v17 = vmax.f32 %v2294_v38, 0.0  ;;  %v1843_v29 = vadd.f32 %v1842_v8, %v1496_v32  ;;  %v5135_v8 = vld [vmem:[#allocation10_spill] sm:$0xff] }
 0x2ab   : > { %v2360_v31 = vmax.f32 %v2232_v13, 0.0  ;;  %v2423_v0 = vmax.f32 %v2295_v48, 0.0  ;;  %2484 = vst [vmem:[%s4409_s12 + $0xd0] sm:$0xff] %v2356_v63  ;;  %2547 = vst [vmem:[%s4409_s12 + $0x2c8] sm:$0xff] %v2419_v60  ;;  %v1434_v47 = vmul.f32 %v4375_v6, %v4283_v50  ;;  %v1497_v57 = vmul.f32 %v4373_v20, %v5134_v36  ;;  %v1852_v48 = vpop.f32.mrb[60].mxu0  ;;  %v1965_v32 = vpop.f32.mrb[28].mxu1 }
 0x2ac   : > { %2485 = vst [vmem:[%s4409_s12 + $0xd8] sm:$0xff] %v2357_v12  ;;  %v2361_v10 = vmax.f32 %v2233_v49, 0.0  ;;  %v1435_v43 = vmul.f32 %v4377_v37, %v4283_v50  ;;  %2550 = vst [vmem:[%s4409_s12 + $0x2e0] sm:$0xff] %v2422_v17  ;;  %v2298_v53 = vadd.f32 %v4711_v28, %v1843_v29  ;;  %v1500_v52 = vmul.f32 %v4367_v55, %v5135_v8  ;;  %v1967_v17 = vpop.f32.mrb[29].mxu1 }
 0x2ad   : > { %2488 = vst [vmem:[%s4409_s12 + $0xf0] sm:$0xff] %v2360_v31  ;;  %2551 = vst [vmem:[%s4409_s12 + $0x2e8] sm:$0xff] %v2423_v0  ;;  %v1438_v21 = vmul.f32 %v4375_v6, %v4281_v22  ;;  %v1501_v46 = vmul.f32 %v4373_v20, %v5135_v8  ;;  %v1956_v19 = vadd.f32 %v1955_v33, %v1434_v47  ;;  %v1854_v31 = vpop.f32.mrb[61].mxu0 }
 0x2ae   : > { %2489 = vst [vmem:[%s4409_s12 + $0xf8] sm:$0xff] %v2361_v10  ;;  %v1845_v13 = vadd.f32 %v1844_v45, %v1497_v57  ;;  %v1958_v50 = vadd.f32 %v1957_v58, %v1435_v43  ;;  %v1439_v38 = vmul.f32 %v4377_v37, %v4281_v22  ;;  %v2426_v63 = vmax.f32 %v2298_v53, 0.0  ;;  %v1856_v58 = vpop.f32.mrb[62].mxu0  ;;  %v1969_v10 = vpop.f32.mrb[30].mxu1 }
 0x2af   : > { %v1847_v12 = vadd.f32 %v1846_v3, %v1500_v52  ;;  %v1960_v60 = vadd.f32 %v1959_v59, %v1438_v21  ;;  %v1849_v49 = vadd.f32 %v1848_v61, %v1501_v46  ;;  %v2236_v0 = vadd.f32 %v4453_v4, %v1956_v19  ;;  %v5136_v61 = vld [vmem:[#allocation13_spill] sm:$0xff]  ;;  %v1858_v57 = vpop.f32.mrb[63].mxu0  ;;  %v4747_v21 = vpop.permute.xlu1 %2179 }
 0x2b0   : > { %v2237_v29 = vadd.f32 %v4453_v4, %v1958_v50  ;;  %v2299_v33 = vadd.f32 %v4711_v28, %v1845_v13  ;;  %v1962_v45 = vadd.f32 %v1961_v39, %v1439_v38  ;;  %2554 = vst [vmem:[%s4409_s12 + $0x300] sm:$0xff] %v2426_v63  ;;  %v1504_v47 = vmul.f32 %v4367_v55, %v5136_v61  ;;  %v1971_v4 = vpop.f32.mrb[31].mxu1 }
 0x2b1   : > { %v2240_v22 = vadd.f32 %v4460_v16, %v1960_v60  ;;  %v2302_v3 = vadd.f32 %v4732_v1, %v1847_v12  ;;  %v2303_v59 = vadd.f32 %v4732_v1, %v1849_v49  ;;  %v2364_v43 = vmax.f32 %v2236_v0, 0.0 }
 0x2b2   : > { %v2365_v39 = vmax.f32 %v2237_v29, 0.0  ;;  %v2427_v53 = vmax.f32 %v2299_v33, 0.0  ;;  %v2241_v52 = vadd.f32 %v4460_v16, %v1962_v45  ;;  %v1853_v50 = vadd.f32 %v1852_v48, %v1504_v47  ;;  %v5137_v48 = vld [vmem:[#allocation12_spill] sm:$0xff]  ;;  %v4768_v33 = vpop.permute.xlu0 %2183 }
 0x2b3   : > { %v2368_v46 = vmax.f32 %v2240_v22, 0.0  ;;  %v2430_v19 = vmax.f32 %v2302_v3, 0.0  ;;  %v2431_v13 = vmax.f32 %v2303_v59, 0.0  ;;  %2492 = vst [vmem:[%s4409_s12 + $0x110] sm:$0xff] %v2364_v43  ;;  %v1442_v63 = vmul.f32 %v4375_v6, %v4287_v42  ;;  %v1862_v59 = vpop.f32.mrb[64].mxu0  ;;  %v1975_v47 = vpop.f32.mrb[32].mxu1 }
 0x2b4   : > { %2493 = vst [vmem:[%s4409_s12 + $0x118] sm:$0xff] %v2365_v39  ;;  %2555 = vst [vmem:[%s4409_s12 + $0x308] sm:$0xff] %v2427_v53  ;;  %v2369_v38 = vmax.f32 %v2241_v52, 0.0  ;;  %v1505_v12 = vmul.f32 %v4373_v20, %v5136_v61  ;;  %v1443_v16 = vmul.f32 %v4377_v37, %v4287_v42  ;;  %v2306_v60 = vadd.f32 %v4747_v21, %v1853_v50 }
 0x2b5   : > { %2496 = vst [vmem:[%s4409_s12 + $0x130] sm:$0xff] %v2368_v46  ;;  %2558 = vst [vmem:[%s4409_s12 + $0x320] sm:$0xff] %v2430_v19  ;;  %v1508_v49 = vmul.f32 %v4367_v55, %v5137_v48  ;;  %v1446_v0 = vmul.f32 %v4375_v6, %v4285_v26  ;;  %v1509_v29 = vmul.f32 %v4373_v20, %v5137_v48  ;;  %v1864_v46 = vpop.f32.mrb[65].mxu0  ;;  %v1977_v19 = vpop.f32.mrb[33].mxu1 }
 0x2b6   : > { %2559 = vst [vmem:[%s4409_s12 + $0x328] sm:$0xff] %v2431_v13  ;;  %2497 = vst [vmem:[%s4409_s12 + $0x138] sm:$0xff] %v2369_v38  ;;  %v1966_v45 = vadd.f32 %v1965_v32, %v1442_v63  ;;  %v1855_v22 = vadd.f32 %v1854_v31, %v1505_v12  ;;  %v1968_v42 = vadd.f32 %v1967_v17, %v1443_v16  ;;  %v2434_v43 = vmax.f32 %v2306_v60, 0.0  ;;  %v1866_v17 = vpop.f32.mrb[66].mxu0  ;;  %v1979_v38 = vpop.f32.mrb[34].mxu1 }
 0x2b7   : > { %v1447_v3 = vmul.f32 %v4377_v37, %v4285_v26  ;;  %v1857_v39 = vadd.f32 %v1856_v58, %v1508_v49  ;;  %v1970_v53 = vadd.f32 %v1969_v10, %v1446_v0  ;;  %v1859_v52 = vadd.f32 %v1858_v57, %v1509_v29  ;;  %v5138_v57 = vld [vmem:[#allocation15_spill] sm:$0xff]  ;;  %v1868_v12 = vpop.f32.mrb[67].mxu0  ;;  %v4783_v0 = vpop.permute.xlu1 %2187 }
 0x2b8   : > { %v2244_v13 = vadd.f32 %v4489_v27, %v1966_v45  ;;  %v2245_v50 = vadd.f32 %v4489_v27, %v1968_v42  ;;  %v2307_v32 = vadd.f32 %v4747_v21, %v1855_v22  ;;  %2562 = vst [vmem:[%s4409_s12 + $0x340] sm:$0xff] %v2434_v43  ;;  %v1512_v63 = vmul.f32 %v4367_v55, %v5138_v57  ;;  %v1981_v27 = vpop.f32.mrb[35].mxu1 }
 0x2b9   : > { %v1972_v31 = vadd.f32 %v1971_v4, %v1447_v3  ;;  %v2248_v26 = vadd.f32 %v4501_v25, %v1970_v53  ;;  %v2310_v58 = vadd.f32 %v4768_v33, %v1857_v39  ;;  %v2311_v10 = vadd.f32 %v4768_v33, %v1859_v52 }
 0x2ba   : > { %v2372_v16 = vmax.f32 %v2244_v13, 0.0  ;;  %v2373_v4 = vmax.f32 %v2245_v50, 0.0  ;;  %v2435_v60 = vmax.f32 %v2307_v32, 0.0  ;;  %v1863_v42 = vadd.f32 %v1862_v59, %v1512_v63  ;;  %v5139_v59 = vld [vmem:[#allocation14_spill] sm:$0xff]  ;;  %v4804_v32 = vpop.permute.xlu0 %2191 }
 0x2bb   : > { %v2249_v49 = vadd.f32 %v4501_v25, %v1972_v31  ;;  %v2376_v29 = vmax.f32 %v2248_v26, 0.0  ;;  %v2438_v45 = vmax.f32 %v2310_v58, 0.0  ;;  %v2439_v22 = vmax.f32 %v2311_v10, 0.0  ;;  %v1872_v10 = vpop.f32.mrb[68].mxu0  ;;  %v1985_v63 = vpop.f32.mrb[36].mxu1 }
 0x2bc   : > { %2500 = vst [vmem:[%s4409_s12 + $0x150] sm:$0xff] %v2372_v16  ;;  %2501 = vst [vmem:[%s4409_s12 + $0x158] sm:$0xff] %v2373_v4  ;;  %v1450_v43 = vmul.f32 %v4375_v6, %v4291_v5  ;;  %v1513_v39 = vmul.f32 %v4373_v20, %v5138_v57  ;;  %v1451_v25 = vmul.f32 %v4377_v37, %v4291_v5 }
 0x2bd   : > { %2563 = vst [vmem:[%s4409_s12 + $0x348] sm:$0xff] %v2435_v60  ;;  %v2377_v3 = vmax.f32 %v2249_v49, 0.0  ;;  %2504 = vst [vmem:[%s4409_s12 + $0x170] sm:$0xff] %v2376_v29  ;;  %v2314_v53 = vadd.f32 %v4783_v0, %v1863_v42  ;;  %v1516_v52 = vmul.f32 %v4367_v55, %v5139_v59  ;;  %v1454_v13 = vmul.f32 %v4375_v6, %v4289_v30  ;;  %v1874_v29 = vpop.f32.mrb[69].mxu0 }
 0x2be   : > { %2566 = vst [vmem:[%s4409_s12 + $0x360] sm:$0xff] %v2438_v45  ;;  %2567 = vst [vmem:[%s4409_s12 + $0x368] sm:$0xff] %v2439_v22  ;;  %v1517_v50 = vmul.f32 %v4373_v20, %v5139_v59  ;;  %v1976_v31 = vadd.f32 %v1975_v47, %v1450_v43  ;;  %v1865_v26 = vadd.f32 %v1864_v46, %v1513_v39  ;;  %v1987_v45 = vpop.f32.mrb[37].mxu1 }
 0x2bf   : > { %2505 = vst [vmem:[%s4409_s12 + $0x178] sm:$0xff] %v2377_v3  ;;  %v1978_v5 = vadd.f32 %v1977_v19, %v1451_v25  ;;  %v1455_v58 = vmul.f32 %v4377_v37, %v4289_v30  ;;  %v2442_v16 = vmax.f32 %v2314_v53, 0.0  ;;  %v1867_v4 = vadd.f32 %v1866_v17, %v1516_v52  ;;  %v1876_v19 = vpop.f32.mrb[70].mxu0  ;;  %v1989_v3 = vpop.f32.mrb[38].mxu1 }
 0x2c0   : > { %v1980_v60 = vadd.f32 %v1979_v38, %v1454_v13  ;;  %v1869_v49 = vadd.f32 %v1868_v12, %v1517_v50  ;;  %v2252_v22 = vadd.f32 %v4516_v40, %v1976_v31  ;;  %v2315_v47 = vadd.f32 %v4783_v0, %v1865_v26  ;;  %v5140_v12 = vld [vmem:[#allocation17_spill] sm:$0xff]  ;;  %v1878_v39 = vpop.f32.mrb[71].mxu0  ;;  %v4819_v13 = vpop.permute.xlu1 %2195 }
 0x2c1   : > { %v2253_v42 = vadd.f32 %v4516_v40, %v1978_v5  ;;  %v1982_v46 = vadd.f32 %v1981_v27, %v1455_v58  ;;  %2570 = vst [vmem:[%s4409_s12 + $0x380] sm:$0xff] %v2442_v16  ;;  %v2318_v17 = vadd.f32 %v4804_v32, %v1867_v4  ;;  %v1520_v43 = vmul.f32 %v4367_v55, %v5140_v12  ;;  %v1991_v40 = vpop.f32.mrb[39].mxu1 }
 0x2c2   : > { %v2256_v30 = vadd.f32 %v4524_v62, %v1980_v60  ;;  %v2319_v38 = vadd.f32 %v4804_v32, %v1869_v49  ;;  %v2380_v25 = vmax.f32 %v2252_v22, 0.0  ;;  %v2443_v53 = vmax.f32 %v2315_v47, 0.0  ;;  %v5141_v49 = vld [vmem:[#allocation16_spill] sm:$0xff] }
 0x2c3   : > { %v2381_v27 = vmax.f32 %v2253_v42, 0.0  ;;  %v2257_v52 = vadd.f32 %v4524_v62, %v1982_v46  ;;  %v2446_v31 = vmax.f32 %v2318_v17, 0.0  ;;  %v1873_v5 = vadd.f32 %v1872_v10, %v1520_v43  ;;  %v4843_v17 = vpop.permute.xlu0 %2199 }
 0x2c4   : > { %v2384_v50 = vmax.f32 %v2256_v30, 0.0  ;;  %v2447_v26 = vmax.f32 %v2319_v38, 0.0  ;;  %2508 = vst [vmem:[%s4409_s12 + $0x190] sm:$0xff] %v2380_v25  ;;  %2571 = vst [vmem:[%s4409_s12 + $0x388] sm:$0xff] %v2443_v53  ;;  %v1458_v16 = vmul.f32 %v4375_v6, %v4295_v9  ;;  %v1521_v4 = vmul.f32 %v4373_v20, %v5140_v12  ;;  %v1995_v38 = vpop.f32.mrb[40].mxu1 }
 0x2c5   : > { %2509 = vst [vmem:[%s4409_s12 + $0x198] sm:$0xff] %v2381_v27  ;;  %v2385_v58 = vmax.f32 %v2257_v52, 0.0  ;;  %v1459_v62 = vmul.f32 %v4377_v37, %v4295_v9  ;;  %2574 = vst [vmem:[%s4409_s12 + $0x3a0] sm:$0xff] %v2446_v31  ;;  %v2322_v60 = vadd.f32 %v4819_v13, %v1873_v5  ;;  %v1524_v10 = vmul.f32 %v4367_v55, %v5141_v49  ;;  %v1997_v53 = vpop.f32.mrb[41].mxu1  ;;  %v5142_v52 = vld [vmem:[#allocation18_spill] sm:$0xff] }
 0x2c6   : > { %2512 = vst [vmem:[%s4409_s12 + $0x1b0] sm:$0xff] %v2384_v50  ;;  %2575 = vst [vmem:[%s4409_s12 + $0x3a8] sm:$0xff] %v2447_v26  ;;  %v1462_v22 = vmul.f32 %v4375_v6, %v4293_v15  ;;  %v1525_v42 = vmul.f32 %v4373_v20, %v5141_v49  ;;  %v1986_v47 = vadd.f32 %v1985_v63, %v1458_v16 }
 0x2c7   : > { %2513 = vst [vmem:[%s4409_s12 + $0x1b8] sm:$0xff] %v2385_v58  ;;  %v1875_v46 = vadd.f32 %v1874_v29, %v1521_v4  ;;  %v1988_v30 = vadd.f32 %v1987_v45, %v1459_v62  ;;  %v1463_v9 = vmul.f32 %v4377_v37, %v4293_v15  ;;  %v2450_v43 = vmax.f32 %v2322_v60, 0.0  ;;  %v1999_v29 = vpop.f32.mrb[42].mxu1  ;;  %v5143_v15 = vld [vmem:[#allocation19_spill] sm:$0xff] }
 0x2c8   : > { %v1877_v25 = vadd.f32 %v1876_v19, %v1524_v10  ;;  %v1990_v55 = vadd.f32 %v1989_v3, %v1462_v22  ;;  %v1879_v27 = vadd.f32 %v1878_v39, %v1525_v42  ;;  %v2260_v50 = vadd.f32 %v5142_v52, %v1986_v47  ;;  %v5144_v3 = vld [vmem:[#allocation3_spill] sm:$0xff]  ;;  %v2001_v5 = vpop.f32.mrb[43].mxu1 }
 0x2c9   : > { %v2261_v20 = vadd.f32 %v5142_v52, %v1988_v30  ;;  %v2323_v63 = vadd.f32 %v4819_v13, %v1875_v46  ;;  %v1992_v31 = vadd.f32 %v1991_v40, %v1463_v9  ;;  %2578 = vst [vmem:[%s4409_s12 + $0x3c0] sm:$0xff] %v2450_v43  ;;  %v1466_v39 = vmul.f32 %v4375_v6, %v5144_v3  ;;  %v5145_v46 = vld [vmem:[#allocation2_spill] sm:$0xff] }
 0x2ca   : > { %v2264_v45 = vadd.f32 %v5143_v15, %v1990_v55  ;;  %v2326_v26 = vadd.f32 %v4843_v17, %v1877_v25  ;;  %v2327_v19 = vadd.f32 %v4843_v17, %v1879_v27  ;;  %v2388_v58 = vmax.f32 %v2260_v50, 0.0 }
 0x2cb   : > { %v2389_v16 = vmax.f32 %v2261_v20, 0.0  ;;  %v2451_v40 = vmax.f32 %v2323_v63, 0.0  ;;  %v2265_v4 = vadd.f32 %v5143_v15, %v1992_v31  ;;  %v1996_v22 = vadd.f32 %v1995_v38, %v1466_v39  ;;  %v2005_v52 = vpop.f32.mrb[44].mxu1 }
 0x2cc   : > { %v2392_v62 = vmax.f32 %v2264_v45, 0.0  ;;  %v2454_v60 = vmax.f32 %v2326_v26, 0.0  ;;  %v2455_v10 = vmax.f32 %v2327_v19, 0.0  ;;  %2516 = vst [vmem:[%s4409_s12 + $0x1d0] sm:$0xff] %v2388_v58  ;;  %v1467_v47 = vmul.f32 %v4377_v37, %v5144_v3  ;;  %v2007_v31 = vpop.f32.mrb[45].mxu1 }
 0x2cd   : > { %2517 = vst [vmem:[%s4409_s12 + $0x1d8] sm:$0xff] %v2389_v16  ;;  %2579 = vst [vmem:[%s4409_s12 + $0x3c8] sm:$0xff] %v2451_v40  ;;  %v2393_v42 = vmax.f32 %v2265_v4, 0.0  ;;  %v1470_v30 = vmul.f32 %v4375_v6, %v5145_v46  ;;  %v1471_v9 = vmul.f32 %v4377_v37, %v5145_v46  ;;  %v2268_v43 = vadd.f32 %v4567_v14, %v1996_v22 }
 0x2ce   : > { %2520 = vst [vmem:[%s4409_s12 + $0x1f0] sm:$0xff] %v2392_v62  ;;  %2582 = vst [vmem:[%s4409_s12 + $0x3e0] sm:$0xff] %v2454_v60  ;;  %v1474_v38 = vmul.f32 %v4375_v6, %v5128_v18  ;;  %v1998_v25 = vadd.f32 %v1997_v53, %v1467_v47  ;;  %v1475_v50 = vmul.f32 %v4377_v37, %v5128_v18 }
 0x2cf   : > { %2583 = vst [vmem:[%s4409_s12 + $0x3e8] sm:$0xff] %v2455_v10  ;;  %2521 = vst [vmem:[%s4409_s12 + $0x1f8] sm:$0xff] %v2393_v42  ;;  %v2000_v55 = vadd.f32 %v1999_v29, %v1470_v30  ;;  %v2002_v27 = vadd.f32 %v2001_v5, %v1471_v9  ;;  %v2396_v20 = vmax.f32 %v2268_v43, 0.0  ;;  %v1478_v15 = vmul.f32 %v4375_v6, %v5129_v23  ;;  %v2009_v29 = vpop.f32.mrb[46].mxu1 }
 0x2d0   : > { %v2006_v63 = vadd.f32 %v2005_v52, %v1474_v38  ;;  %v2269_v45 = vadd.f32 %v4567_v14, %v1998_v25  ;;  %v2008_v53 = vadd.f32 %v2007_v31, %v1475_v50  ;;  %v1479_v39 = vmul.f32 %v4377_v37, %v5129_v23  ;;  %v2011_v5 = vpop.f32.mrb[47].mxu1 }
 0x2d1   : > { %v2272_v26 = vadd.f32 %v4588_v24, %v2000_v55  ;;  %v2273_v19 = vadd.f32 %v4588_v24, %v2002_v27  ;;  %2524 = vst [vmem:[%s4409_s12 + $0x210] sm:$0xff] %v2396_v20  ;;  %v2010_v3 = vadd.f32 %v2009_v29, %v1478_v15  ;;  %v1482_v22 = vmul.f32 %v4375_v6, %v5130_v44 }
 0x2d2   : > { %v2276_v18 = vadd.f32 %v4603_v11, %v2006_v63  ;;  %v2397_v14 = vmax.f32 %v2269_v45, 0.0  ;;  %v2277_v24 = vadd.f32 %v4603_v11, %v2008_v53  ;;  %v2012_v62 = vadd.f32 %v2011_v5, %v1479_v39 }
 0x2d3   : > { %v2400_v58 = vmax.f32 %v2272_v26, 0.0  ;;  %v2401_v16 = vmax.f32 %v2273_v19, 0.0  ;;  %v2280_v4 = vadd.f32 %v4624_v54, %v2010_v3  ;;  %v2015_v42 = vpop.f32.mrb[48].mxu1  ;;  %v1483_v11 = vmul.f32 %v4377_v37, %v5130_v44 }
 0x2d4   : > { %v2404_v40 = vmax.f32 %v2276_v18, 0.0  ;;  %2525 = vst [vmem:[%s4409_s12 + $0x218] sm:$0xff] %v2397_v14  ;;  %v2405_v60 = vmax.f32 %v2277_v24, 0.0  ;;  %v2281_v23 = vadd.f32 %v4624_v54, %v2012_v62  ;;  %v2016_v46 = vadd.f32 %v2015_v42, %v1482_v22  ;;  %v2017_v30 = vpop.f32.mrb[49].mxu1 }
 0x2d5   : > { %2528 = vst [vmem:[%s4409_s12 + $0x230] sm:$0xff] %v2400_v58  ;;  %2529 = vst [vmem:[%s4409_s12 + $0x238] sm:$0xff] %v2401_v16  ;;  %v2408_v10 = vmax.f32 %v2280_v4, 0.0  ;;  %v1486_v9 = vmul.f32 %v4375_v6, %v5131_v2  ;;  %v2018_v43 = vadd.f32 %v2017_v30, %v1483_v11  ;;  %v2019_v38 = vpop.f32.mrb[50].mxu1  ;;  %v1487_v54 = vmul.f32 %v4377_v37, %v5131_v2 }
 0x2d6   : > { %2532 = vst [vmem:[%s4409_s12 + $0x250] sm:$0xff] %v2404_v40  ;;  %2533 = vst [vmem:[%s4409_s12 + $0x258] sm:$0xff] %v2405_v60  ;;  %v2409_v47 = vmax.f32 %v2281_v23, 0.0  ;;  %v2284_v25 = vadd.f32 %v4639_v51, %v2016_v46  ;;  %v2021_v44 = vpop.f32.mrb[51].mxu1  ;;  %v1490_v2 = vmul.f32 %v4375_v6, %v5132_v35  ;;  %v1491_v19 = vmul.f32 %v4377_v37, %v5132_v35 }
 0x2d7   : > { %2536 = vst [vmem:[%s4409_s12 + $0x270] sm:$0xff] %v2408_v10  ;;  %v2020_v55 = vadd.f32 %v2019_v38, %v1486_v9  ;;  %v2285_v27 = vadd.f32 %v4639_v51, %v2018_v43  ;;  %v2022_v52 = vadd.f32 %v2021_v44, %v1487_v54  ;;  %v1494_v29 = vmul.f32 %v4375_v6, %v5133_v7 }
 0x2d8   : > { %2537 = vst [vmem:[%s4409_s12 + $0x278] sm:$0xff] %v2409_v47  ;;  %v2412_v50 = vmax.f32 %v2284_v25, 0.0  ;;  %v1495_v3 = vmul.f32 %v4377_v37, %v5133_v7  ;;  %v1498_v7 = vmul.f32 %v4375_v6, %v5134_v36  ;;  %v1499_v23 = vmul.f32 %v4377_v37, %v5134_v36 }
 0x2d9   : > { %v2288_v20 = vadd.f32 %v4660_v56, %v2020_v55  ;;  %v2413_v63 = vmax.f32 %v2285_v27, 0.0  ;;  %v2289_v31 = vadd.f32 %v4660_v56, %v2022_v52  ;;  %v1502_v42 = vmul.f32 %v4375_v6, %v5135_v8 }
 0x2da   : > { %2540 = vst [vmem:[%s4409_s12 + $0x290] sm:$0xff] %v2412_v50  ;;  %v1503_v47 = vmul.f32 %v4377_v37, %v5135_v8  ;;  %v1506_v8 = vmul.f32 %v4375_v6, %v5136_v61  ;;  %v1507_v50 = vmul.f32 %v4377_v37, %v5136_v61 }
 0x2db   : > { %v2416_v15 = vmax.f32 %v2288_v20, 0.0  ;;  %2541 = vst [vmem:[%s4409_s12 + $0x298] sm:$0xff] %v2413_v63  ;;  %v2417_v45 = vmax.f32 %v2289_v31, 0.0  ;;  %v2025_v26 = vpop.f32.mrb[52].mxu1  ;;  %v1510_v63 = vmul.f32 %v4375_v6, %v5137_v48 }
 0x2dc   : > { %v2026_v51 = vadd.f32 %v2025_v26, %v1490_v2  ;;  %v2027_v53 = vpop.f32.mrb[53].mxu1 }
 0x2dd   : > { %2544 = vst [vmem:[%s4409_s12 + $0x2b0] sm:$0xff] %v2416_v15  ;;  %2545 = vst [vmem:[%s4409_s12 + $0x2b8] sm:$0xff] %v2417_v45  ;;  %v2028_v56 = vadd.f32 %v2027_v53, %v1491_v19  ;;  %v2029_v18 = vpop.f32.mrb[54].mxu1  ;;  %v1511_v15 = vmul.f32 %v4377_v37, %v5137_v48  ;;  %v1514_v48 = vmul.f32 %v4375_v6, %v5138_v57 }
 0x2de   : > { %v2292_v39 = vadd.f32 %v4675_v34, %v2026_v51  ;;  %v2030_v5 = vadd.f32 %v2029_v18, %v1494_v29  ;;  %v2031_v14 = vpop.f32.mrb[55].mxu1 }
 0x2df   : > { %v2293_v35 = vadd.f32 %v4675_v34, %v2028_v56  ;;  %v2032_v58 = vadd.f32 %v2031_v14, %v1495_v3 }
 0x2e0   : > { %v2420_v16 = vmax.f32 %v2292_v39, 0.0  ;;  %v2296_v24 = vadd.f32 %v4696_v41, %v2030_v5  ;;  %v1515_v5 = vmul.f32 %v4377_v37, %v5138_v57 }
 0x2e1   : > { %v2421_v40 = vmax.f32 %v2293_v35, 0.0  ;;  %v2297_v4 = vadd.f32 %v4696_v41, %v2032_v58  ;;  %v1518_v35 = vmul.f32 %v4375_v6, %v5139_v59 }
 0x2e2   : > { %2548 = vst [vmem:[%s4409_s12 + $0x2d0] sm:$0xff] %v2420_v16  ;;  %v2424_v62 = vmax.f32 %v2296_v24, 0.0  ;;  %v1519_v16 = vmul.f32 %v4377_v37, %v5139_v59  ;;  %v1522_v59 = vmul.f32 %v4375_v6, %v5140_v12 }
 0x2e3   : > { %2549 = vst [vmem:[%s4409_s12 + $0x2d8] sm:$0xff] %v2421_v40  ;;  %v2425_v60 = vmax.f32 %v2297_v4, 0.0  ;;  %v2035_v10 = vpop.f32.mrb[56].mxu1 }
 0x2e4   : > { %2552 = vst [vmem:[%s4409_s12 + $0x2f0] sm:$0xff] %v2424_v62  ;;  %v2036_v34 = vadd.f32 %v2035_v10, %v1498_v7  ;;  %v2037_v22 = vpop.f32.mrb[57].mxu1 }
 0x2e5   : > { %2553 = vst [vmem:[%s4409_s12 + $0x2f8] sm:$0xff] %v2425_v60  ;;  %v2038_v41 = vadd.f32 %v2037_v22, %v1499_v23  ;;  %v2039_v11 = vpop.f32.mrb[58].mxu1 }
 0x2e6   : > { %v2300_v46 = vadd.f32 %v4711_v28, %v2036_v34  ;;  %v2040_v30 = vadd.f32 %v2039_v11, %v1502_v42  ;;  %v2041_v9 = vpop.f32.mrb[59].mxu1 }
 0x2e7   : > { %v2301_v36 = vadd.f32 %v4711_v28, %v2038_v41  ;;  %v2042_v43 = vadd.f32 %v2041_v9, %v1503_v47  ;;  %v1523_v41 = vmul.f32 %v4377_v37, %v5140_v12  ;;  %v1526_v47 = vmul.f32 %v4375_v6, %v5141_v49 }
 0x2e8   : > { %v2428_v38 = vmax.f32 %v2300_v46, 0.0  ;;  %v2304_v54 = vadd.f32 %v4732_v1, %v2040_v30  ;;  %v1527_v30 = vmul.f32 %v4377_v37, %v5141_v49 }
 0x2e9   : > { %v2429_v25 = vmax.f32 %v2301_v36, 0.0  ;;  %v2305_v55 = vadd.f32 %v4732_v1, %v2042_v43 }
 0x2ea   : > { %2556 = vst [vmem:[%s4409_s12 + $0x310] sm:$0xff] %v2428_v38  ;;  %v2432_v44 = vmax.f32 %v2304_v54, 0.0 }
 0x2eb   : > { %2557 = vst [vmem:[%s4409_s12 + $0x318] sm:$0xff] %v2429_v25  ;;  %v2433_v27 = vmax.f32 %v2305_v55, 0.0  ;;  %v2045_v52 = vpop.f32.mrb[60].mxu1 }
 0x2ec   : > { %2560 = vst [vmem:[%s4409_s12 + $0x330] sm:$0xff] %v2432_v44  ;;  %v2046_v28 = vadd.f32 %v2045_v52, %v1506_v8  ;;  %v2047_v20 = vpop.f32.mrb[61].mxu1 }
 0x2ed   : > { %2561 = vst [vmem:[%s4409_s12 + $0x338] sm:$0xff] %v2433_v27  ;;  %v2048_v1 = vadd.f32 %v2047_v20, %v1507_v50  ;;  %v2049_v31 = vpop.f32.mrb[62].mxu1 }
 0x2ee   : > { %v2308_v2 = vadd.f32 %v4747_v21, %v2046_v28  ;;  %v2050_v45 = vadd.f32 %v2049_v31, %v1510_v63  ;;  %v2051_v26 = vpop.f32.mrb[63].mxu1 }
 0x2ef   : > { %v2309_v61 = vadd.f32 %v4747_v21, %v2048_v1  ;;  %v2052_v19 = vadd.f32 %v2051_v26, %v1511_v15 }
 0x2f0   : > { %v2436_v51 = vmax.f32 %v2308_v2, 0.0  ;;  %v2312_v53 = vadd.f32 %v4768_v33, %v2050_v45 }
 0x2f1   : > { %v2437_v29 = vmax.f32 %v2309_v61, 0.0  ;;  %v2313_v56 = vadd.f32 %v4768_v33, %v2052_v19 }
 0x2f2   : > { %2564 = vst [vmem:[%s4409_s12 + $0x350] sm:$0xff] %v2436_v51  ;;  %v2440_v18 = vmax.f32 %v2312_v53, 0.0 }
 0x2f3   : > { %2565 = vst [vmem:[%s4409_s12 + $0x358] sm:$0xff] %v2437_v29  ;;  %v2441_v3 = vmax.f32 %v2313_v56, 0.0  ;;  %v2055_v39 = vpop.f32.mrb[64].mxu1 }
 0x2f4   : > { %2568 = vst [vmem:[%s4409_s12 + $0x370] sm:$0xff] %v2440_v18  ;;  %v2056_v21 = vadd.f32 %v2055_v39, %v1514_v48  ;;  %v2057_v14 = vpop.f32.mrb[65].mxu1 }
 0x2f5   : > { %2569 = vst [vmem:[%s4409_s12 + $0x378] sm:$0xff] %v2441_v3  ;;  %v2058_v33 = vadd.f32 %v2057_v14, %v1515_v5  ;;  %v2059_v58 = vpop.f32.mrb[66].mxu1 }
 0x2f6   : > { %v2316_v24 = vadd.f32 %v4783_v0, %v2056_v21  ;;  %v2060_v40 = vadd.f32 %v2059_v58, %v1518_v35  ;;  %v2061_v4 = vpop.f32.mrb[67].mxu1 }
 0x2f7   : > { %v2317_v57 = vadd.f32 %v4783_v0, %v2058_v33  ;;  %v2062_v62 = vadd.f32 %v2061_v4, %v1519_v16 }
 0x2f8   : > { %v2444_v7 = vmax.f32 %v2316_v24, 0.0  ;;  %v2320_v60 = vadd.f32 %v4804_v32, %v2060_v40 }
 0x2f9   : > { %v2445_v10 = vmax.f32 %v2317_v57, 0.0  ;;  %v2321_v23 = vadd.f32 %v4804_v32, %v2062_v62 }
 0x2fa   : > { %2572 = vst [vmem:[%s4409_s12 + $0x390] sm:$0xff] %v2444_v7  ;;  %v2448_v34 = vmax.f32 %v2320_v60, 0.0 }
 0x2fb   : > { %2573 = vst [vmem:[%s4409_s12 + $0x398] sm:$0xff] %v2445_v10  ;;  %v2449_v22 = vmax.f32 %v2321_v23, 0.0  ;;  %v2065_v42 = vpop.f32.mrb[68].mxu1 }
 0x2fc   : > { %2576 = vst [vmem:[%s4409_s12 + $0x3b0] sm:$0xff] %v2448_v34  ;;  %v2066_v0 = vadd.f32 %v2065_v42, %v1522_v59  ;;  %v2067_v11 = vpop.f32.mrb[69].mxu1 }
 0x2fd   : > { %2577 = vst [vmem:[%s4409_s12 + $0x3b8] sm:$0xff] %v2449_v22  ;;  %v2068_v32 = vadd.f32 %v2067_v11, %v1523_v41  ;;  %v2069_v46 = vpop.f32.mrb[70].mxu1 }
 0x2fe   : > { %v2324_v9 = vadd.f32 %v4819_v13, %v2066_v0  ;;  %v2070_v36 = vadd.f32 %v2069_v46, %v1526_v47  ;;  %v2071_v12 = vpop.f32.mrb[71].mxu1 }
 0x2ff   : > { %v2325_v43 = vadd.f32 %v4819_v13, %v2068_v32  ;;  %v2072_v38 = vadd.f32 %v2071_v12, %v1527_v30 }
 0x300   : > { %v2452_v54 = vmax.f32 %v2324_v9, 0.0  ;;  %v2328_v25 = vadd.f32 %v4843_v17, %v2070_v36 }
 0x301   : > { %v2453_v6 = vmax.f32 %v2325_v43, 0.0  ;;  %v2329_v55 = vadd.f32 %v4843_v17, %v2072_v38 }
 0x302   : > { %2580 = vst [vmem:[%s4409_s12 + $0x3d0] sm:$0xff] %v2452_v54  ;;  %v2456_v44 = vmax.f32 %v2328_v25, 0.0 }
 0x303   : > { %2581 = vst [vmem:[%s4409_s12 + $0x3d8] sm:$0xff] %v2453_v6  ;;  %v2457_v8 = vmax.f32 %v2329_v55, 0.0 }
 0x304   : > { %2584 = vst [vmem:[%s4409_s12 + $0x3f0] sm:$0xff] %v2456_v44 }
 0x305   : > { %2585 = vst [vmem:[%s4409_s12 + $0x3f8] sm:$0xff] %v2457_v8 }
 0x306 PF: > { %s18_s27 = sadd.s32 1, %s3188_s27  }
 0x307   : > { %p15_p4 = scmp.ge.s32.totalorder %s18_s27, 4  }
 0x309   :  { %17 = sbr.rel (!%p15_p4) target bundleno = 1 (0x1), region = 85 }

</bundles_post_ra>
